<compile_context>
chip_gen: v5e
topology: v5e:2x2
jax: 0.10.0
libtpu: 0.0.40
codegen_flags: <defaults>
</compile_context>

<pallas_src>
import jax
import jax.numpy as jnp
from jax import lax
from jax.experimental import pallas as pl
from jax.experimental.pallas import tpu as pltpu

EPS = 1e-5


def _round_up(x, m):
    return ((x + m - 1) // m) * m


# ----------------------------------------------------------------------------
# Fused Pallas kernel builder (architecture dims are closed over, static)
# ----------------------------------------------------------------------------
def build_kernel(cfg, n_prot, n_drug, n_pairs):
    NP, ND, B = n_prot, n_drug, n_pairs
    N = NP + ND
    H1, H1P = cfg['h1'], cfg['h1p']
    FEAT, HK, HD = cfg['feat'], cfg['hk'], cfg['hd']
    OFF = cfg['offsets']
    DEC_PAD = cfg['dec_pad']
    n_dec = cfg['n_dec']
    f32, bf16 = jnp.float32, jnp.bfloat16

    def kernel(scal_ref, idx_ref, prot_ref, drug_ref, a_ref, bias_ref,
               w1p_ref, w1d_ref, w2_ref, wg_ref, wqv_ref, poolh_ref, *rest):
        o_ref = rest[-1]
        fw_ref = rest[-2]
        dec_refs = rest[:-2]

        def bias(name, width):                    # static lane slice of the pack
            off = OFF[name]
            return bias_ref[:, off:off + width]   # (1, width) f32

        def mm(x, w):                             # bf16 MXU matmul, f32 accumulate
            return jnp.dot(x.astype(bf16), w, preferred_element_type=f32)

        def bn(h):
            # BatchNorm1d (batch stats, identity affine); mean & E[x^2] fused
            # into ONE cross-sublane reduction via a lane concat.
            c = h.shape[1]
            s = jnp.mean(jnp.concatenate([h, h * h], axis=1), axis=0,
                         keepdims=True)
            m, msq = s[:, :c], s[:, c:]
            var = jnp.maximum(msq - m * m, 0.0)
            return (h - m) * lax.rsqrt(var + EPS)

        def ln(h, real_c):
            # LayerNorm over the REAL (unpadded) columns; padded columns of h
            # are exactly 0 post-BN, so full-row sums are exact. Mean & E[x^2]
            # fused into ONE cross-lane reduction via a sublane concat.
            rows = h.shape[0]
            inv = 1.0 / real_c
            s = jnp.sum(jnp.concatenate([h, h * h], axis=0), axis=1,
                        keepdims=True)
            m = s[:rows] * inv
            msq = s[rows:] * inv
            var = jnp.maximum(msq - m * m, 0.0)
            return (h - m) * lax.rsqrt(var + EPS)

        def nn_block(x, w, b, real_c):            # ReLU(xW+b) -> BN -> LN
            return ln(bn(jnp.maximum(mm(x, w) + b, 0.0)), real_c)

        # --- protein / drug feature NNs (2 layers each) ----------------------
        hp = nn_block(prot_ref[...], w1p_ref[...], bias('b1p', H1P), H1)
        hp = nn_block(hp, w2_ref[:, :FEAT], bias('b2p', FEAT), FEAT)
        hd = nn_block(drug_ref[...], w1d_ref[...], bias('b1d', H1P), H1)
        hd = nn_block(hd, w2_ref[:, FEAT:], bias('b2d', FEAT), FEAT)

        # --- node concat (in-VMEM, no placement matmuls) -> BN -> LN ---------
        nodes = ln(bn(jnp.concatenate([hp, hd], axis=0)), FEAT)      # (N, 256)
        nodes_bf = nodes.astype(bf16)          # hoisted: feeds GCN dot + gather

        # --- GCN: ELU(A_hat @ (nodes @ W) + b) -> BN -> LN --------------------
        xl = jnp.dot(nodes_bf, wg_ref[...], preferred_element_type=f32)
        h = (jnp.dot(a_ref[...], xl.astype(bf16), preferred_element_type=f32)
             + bias('bg', FEAT))
        h = jnp.where(h > 0, h, jnp.exp(jnp.minimum(h, 0.0)) - 1.0)   # ELU
        h = ln(bn(h), FEAT)                                           # (N, 256)

        # --- merged pair gather: ONE one-hot matmul over [nodes | h] ---------
        iota = lax.broadcasted_iota(jnp.int32, (2 * B, N), 1)
        onehot = jnp.where(idx_ref[...] == iota, 1.0, 0.0).astype(bf16)
        nh = jnp.concatenate([nodes_bf, h.astype(bf16)], axis=1)      # (N, 512)
        gathered = jnp.dot(onehot, nh, preferred_element_type=f32)    # (2B, 512)
        prot_ori = gathered[:B, :FEAT]
        drug_ori = gathered[B:, :FEAT]
        feat_stack = gathered[:, FEAT:]          # rows: [prot_feat ; drug_feat]

        # --- BANLayer (v_num=q_num=1); wq|wv merged into one matmul ----------
        qv = jnp.maximum(mm(feat_stack, wqv_ref[...]) + bias('bqv', 2 * HK),
                         0.0)                                         # (2B,1536)
        q = qv[:B, :HK]                          # protein rows x wq
        v = qv[B:, HK:]                          # drug rows x wv
        vq = v * q                                                    # (B, 768)

        # merged [sum-pool(k) | hmat_t @ 1] matmul, lane-padded to 384
        r = mm(vq, poolh_ref[...])                                    # (B, 384)
        pooled = r[:, :HD]
        att_sum = r[:, HD:HD + 1] + scal_ref[3]  # + sum(h_bias), scalar in SMEM
        logits = bn(att_sum * pooled)

        # attention-weighted fusion with the pre-GCN originals
        x = (scal_ref[0] * logits + scal_ref[1] * prot_ori
             + scal_ref[2] * drug_ori)

        # --- decoder: [ReLU(xW+b) -> BN] * L, lane-padded hidden dims --------
        for i in range(n_dec):
            x = bn(jnp.maximum(mm(x, dec_refs[i][...])
                               + bias(f'dec{i}', DEC_PAD[i]), 0.0))

        # lane-padded sigmoid head; padded columns are sigmoid(0)=0.5 and are
        # discarded by the wrapper (only column 0 is a real output).
        z = mm(x, fw_ref[...]) + bias('fb', 128)
        o_ref[...] = 1.0 / (1.0 + jnp.exp(-z))

    return kernel


# ----------------------------------------------------------------------------
# Parameter init (PyTorch-equivalent fresh init, plain f32 "logical" params)
# ----------------------------------------------------------------------------
def _linear_init(key, fan_in, fan_out):
    kw, kb = jax.random.split(key)
    bound = 1.0 / (fan_in ** 0.5)
    w = jax.random.uniform(kw, (fan_in, fan_out), jnp.float32, -bound, bound)
    b = jax.random.uniform(kb, (1, fan_out), jnp.float32, -bound, bound)
    return w, b


def init_params(key, p_in, d_in, nn_hid, feat, deco_hid, h_dim=256, k=3, h_out=2):
    keys = iter(jax.random.split(key, 32))

    def nn_params(in_dim):
        layers = []
        dims = [in_dim, nn_hid, feat]
        for l in range(2):
            w, b = _linear_init(next(keys), dims[l], dims[l + 1])
            layers.append(dict(w=w, b=b))     # BN/LN affine = identity, folded
        return layers

    params = {}
    params['protein_nn'] = nn_params(p_in)
    params['drug_nn'] = nn_params(d_in)

    gw, gb = _linear_init(next(keys), feat, feat)
    params['gcn'] = dict(w=gw, b=gb)

    wv, bv = _linear_init(next(keys), feat, h_dim * k)
    wq, bq = _linear_init(next(keys), feat, h_dim * k)
    hmat_t = jax.random.normal(next(keys), (h_dim * k, h_out), jnp.float32)
    hbias = jax.random.normal(next(keys), (1, h_out), jnp.float32)
    # AvgPool1d(k, stride=k) * k == sum-pool over consecutive triples (0/1 mat)
    pool = jnp.zeros((h_dim * k, h_dim), jnp.float32)
    pool = pool.at[jnp.arange(h_dim * k), jnp.arange(h_dim * k) // k].set(1.0)
    attention = jnp.ones((3,), jnp.float32) / 3.0

    decode = []
    dims = [feat] + list(deco_hid)
    for l in range(len(deco_hid)):
        w, b = _linear_init(next(keys), dims[l], dims[l + 1])
        decode.append(dict(w=w, b=b))
    fw, fb = _linear_init(next(keys), deco_hid[-1], 1)

    params['dec'] = dict(wv=wv, bv=bv, wq=wq, bq=bq, hmat_t=hmat_t,
                         hbias=hbias, pool=pool, attention=attention,
                         decode=decode, fw=fw, fb=fb)
    return params


# ----------------------------------------------------------------------------
# ONE-TIME preprocessing: bf16 cast, lane padding, operand packing.
# Runs eagerly (outside jit), so none of this happens per forward call.
# ----------------------------------------------------------------------------
def preprocess_params(params):
    f32, wdt = jnp.float32, jnp.bfloat16
    pnn, dnn = params['protein_nn'], params['drug_nn']
    g, d = params['gcn'], params['dec']

    feat = g['w'].shape[0]
    h1 = pnn[0]['w'].shape[1]
    h1p = _round_up(h1, 128)
    hk = d['wv'].shape[1]                       # h_dim * k
    hd_dim = d['pool'].shape[1]                 # h_dim
    dec_real = [lp['w'].shape[1] for lp in d['decode']]
    dec_pad = [_round_up(c, 128) for c in dec_real]

    def pad_to(a, rows, cols):
        out = jnp.zeros((rows, cols), f32)
        return out.at[:a.shape[0], :a.shape[1]].set(a)

    w1p = pad_to(pnn[0]['w'], pnn[0]['w'].shape[0], h1p).astype(wdt)
    w1d = pad_to(dnn[0]['w'], dnn[0]['w'].shape[0], h1p).astype(wdt)
    w2 = jnp.concatenate([pad_to(pnn[1]['w'], h1p, feat),
                          pad_to(dnn[1]['w'], h1p, feat)], axis=1).astype(wdt)
    wg = g['w'].astype(wdt)
    wqv = jnp.concatenate([d['wq'], d['wv']], axis=1).astype(wdt)   # (256,1536)

    # merged [pool | hmat_t @ 1] (sum over h_out folded in), lane-padded
    hmat_sum = jnp.sum(d['hmat_t'], axis=1, keepdims=True)          # (768, 1)
    poolh = jnp.zeros((hk, _round_up(hd_dim + 1, 128)), f32)
    poolh = poolh.at[:, :hd_dim].set(d['pool'])
    poolh = poolh.at[:, hd_dim:hd_dim + 1].set(hmat_sum)
    poolh = poolh.astype(wdt)

    dec_ws = []
    prev_real, prev_pad = feat, _round_up(feat, 128)
    for lp, cp in zip(d['decode'], dec_pad):
        dec_ws.append(pad_to(lp['w'], prev_pad, cp).astype(wdt))
        prev_real, prev_pad = lp['w'].shape[1], cp
    fw = pad_to(d['fw'], prev_pad, 128).astype(wdt)

    # Pack ALL biases into one (1, K) f32 array; widths multiples of 128.
    parts, offsets = [], {}
    cursor = 0

    def add(name, b, width):
        nonlocal cursor
        b = b.reshape(1, -1)
        parts.append(jnp.zeros((1, width), f32).at[:, :b.shape[1]].set(b))
        offsets[name] = cursor
        cursor += width

    add('b1p', pnn[0]['b'], h1p)
    add('b2p', pnn[1]['b'], feat)
    add('b1d', dnn[0]['b'], h1p)
    add('b2d', dnn[1]['b'], feat)
    add('bg', g['b'], feat)
    add('bqv', jnp.concatenate([d['bq'], d['bv']], axis=1), 2 * hk)
    for i, (lp, cp) in enumerate(zip(d['decode'], dec_pad)):
        add(f'dec{i}', lp['b'], cp)
    add('fb', d['fb'], 128)
    biases = jnp.concatenate(parts, axis=1)

    # [softmax(attention), sum(h_bias)] -> 4 scalars in SMEM
    scal = jnp.concatenate([jax.nn.softmax(d['attention'], axis=0),
                            jnp.sum(d['hbias']).reshape(1)]).astype(f32)

    ops = dict(scal=scal, biases=biases, w1p=w1p, w1d=w1d, w2=w2, wg=wg,
               wqv=wqv, poolh=poolh, dec_ws=tuple(dec_ws), fw=fw)
    cfg = dict(h1=h1, h1p=h1p, feat=feat, hk=hk, hd=hd_dim,
               dec_pad=tuple(dec_pad), offsets=offsets, n_dec=len(dec_ws))
    return ops, cfg


# ----------------------------------------------------------------------------
# Plain-JAX glue: adjacency build + pallas_call
# ----------------------------------------------------------------------------
def build_gcn_adj(edge_index, edge_weight, n):
    """Dense normalized adjacency, PyG gcn_norm semantics (self-loops, w=1)."""
    row, col = edge_index[0], edge_index[1]
    loop = jnp.arange(n, dtype=edge_index.dtype)
    row = jnp.concatenate([row, loop])
    col = jnp.concatenate([col, loop])
    w = jnp.concatenate([edge_weight, jnp.ones((n,), edge_weight.dtype)])
    deg = jnp.zeros((n,), edge_weight.dtype).at[col].add(w)
    dinv = jnp.where(deg > 0, lax.rsqrt(deg), 0.0)
    norm = dinv[row] * w * dinv[col]
    a = jnp.zeros((n, n), edge_weight.dtype).at[col, row].add(norm)
    return a


def make_forward(cfg, n_prot, n_drug, n_pairs):
    n = n_prot + n_drug
    kernel = build_kernel(cfg, n_prot, n_drug, n_pairs)

    def forward(ops, proteins, drugs, edge_index, protein_index, drug_index,
                edge_weight):
        a_hat = build_gcn_adj(edge_index, edge_weight, n).astype(jnp.bfloat16)
        pair_idx = jnp.concatenate([protein_index, drug_index]
                                   ).astype(jnp.int32).reshape(2 * n_pairs, 1)

        operands = [ops['scal'], pair_idx, proteins, drugs, a_hat,
                    ops['biases'], ops['w1p'], ops['w1d'], ops['w2'],
                    ops['wg'], ops['wqv'], ops['poolh'],
                    *ops['dec_ws'], ops['fw']]

        vmem = pl.BlockSpec(memory_space=pltpu.MemorySpace.VMEM)
        smem = pl.BlockSpec(memory_space=pltpu.MemorySpace.SMEM)

        out = pl.pallas_call(
            kernel,
            out_shape=jax.ShapeDtypeStruct((n_pairs, 128), jnp.float32),
            in_specs=[smem] + [vmem] * (len(operands) - 1),
            out_specs=vmem,
            compiler_params=pltpu.CompilerParams(
                vmem_limit_bytes=32 * 1024 * 1024),
        )(*operands)

        return out[:, 0]                         # output.view(-1)

    return forward


# ----------------------------------------------------------------------------
# Main
# ----------------------------------------------------------------------------
if __name__ == "__main__":
    key = jax.random.PRNGKey(0)
    k_par, k_p, k_d, k_e, k_w, k_pi, k_di = jax.random.split(key, 7)

    # Small hyper-params consistent with the module
    # (BAN / decoder hard-code 256-d node features).
    P_NUM, D_NUM = 8, 8
    P_IN, D_IN = 48, 32
    NN_HID = 64
    FEAT = 256                   # gat_noutput == DECO_hyper[0]
    DECO_HID = [64, 32]
    N_NODES = P_NUM + D_NUM
    N_EDGES = 20
    N_PAIRS = 8

    params = init_params(k_par, P_IN, D_IN, NN_HID, FEAT, DECO_HID)
    ops, cfg = preprocess_params(params)     # one-time bf16 cast / pad / pack

    proteins = jax.random.normal(k_p, (P_NUM, P_IN), jnp.float32)
    drugs = jax.random.normal(k_d, (D_NUM, D_IN), jnp.float32)
    edge_index = jax.random.randint(k_e, (2, N_EDGES), 0, N_NODES, jnp.int32)
    edge_weight = jax.random.uniform(k_w, (N_EDGES,), jnp.float32, 0.1, 1.0)
    protein_index = jax.random.randint(k_pi, (N_PAIRS,), 0, P_NUM, jnp.int32)
    drug_index = jax.random.randint(k_di, (N_PAIRS,), P_NUM, N_NODES, jnp.int32)

    fwd = jax.jit(make_forward(cfg, P_NUM, D_NUM, N_PAIRS))
    out = fwd(ops, proteins, drugs, edge_index, protein_index, drug_index,
              edge_weight)
    out = jax.block_until_ready(out)

    assert out.shape == (N_PAIRS,), out.shape
    assert bool(jnp.all(jnp.isfinite(out)))
    assert bool(jnp.all((out >= 0.0) & (out <= 1.0)))
    print("KERNEL_OK")
</pallas_src>

<mosaic_0001>
module attributes {stable_mosaic.version = 11 : i64} {
  func.func @kernel(%arg0: memref<4xf32, #tpu.memory_space<smem>>, %arg1: memref<16x1xi32, #tpu.memory_space<vmem>>, %arg2: memref<8x48xf32, #tpu.memory_space<vmem>>, %arg3: memref<8x32xf32, #tpu.memory_space<vmem>>, %arg4: memref<16x16xbf16, #tpu.memory_space<vmem>>, %arg5: memref<1x2944xf32, #tpu.memory_space<vmem>>, %arg6: memref<48x128xbf16, #tpu.memory_space<vmem>>, %arg7: memref<32x128xbf16, #tpu.memory_space<vmem>>, %arg8: memref<128x512xbf16, #tpu.memory_space<vmem>>, %arg9: memref<256x256xbf16, #tpu.memory_space<vmem>>, %arg10: memref<256x1536xbf16, #tpu.memory_space<vmem>>, %arg11: memref<768x384xbf16, #tpu.memory_space<vmem>>, %arg12: memref<256x128xbf16, #tpu.memory_space<vmem>>, %arg13: memref<128x128xbf16, #tpu.memory_space<vmem>>, %arg14: memref<128x128xbf16, #tpu.memory_space<vmem>>, %arg15: memref<8x128xf32, #tpu.memory_space<vmem>>) attributes {dimension_semantics = [], scalar_prefetch = 0 : i64, scratch_operands = 0 : i64, tpu.core_type = #tpu.core_type<tc>} {
    %c0 = arith.constant 0 : index
    %c0_0 = arith.constant 0 : index
    %0 = vector.load %arg2[%c0, %c0_0] : memref<8x48xf32, #tpu.memory_space<vmem>>, vector<8x48xf32>
    %c0_1 = arith.constant 0 : index
    %c0_2 = arith.constant 0 : index
    %1 = vector.load %arg6[%c0_1, %c0_2] : memref<48x128xbf16, #tpu.memory_space<vmem>>, vector<48x128xbf16>
    %c0_3 = arith.constant 0 : index
    %c0_4 = arith.constant 0 : index
    %2 = vector.load %arg5[%c0_3, %c0_4] : memref<1x2944xf32, #tpu.memory_space<vmem>>, vector<1x128xf32>
    %3 = arith.truncf %0 : vector<8x48xf32> to vector<8x48xbf16>
    %cst = arith.constant dense<0.000000e+00> : vector<8x128xf32>
    %4 = tpu.matmul %3, %1, %cst {dimension_numbers = #tpu.dot_dimension_numbers<[1], [0], [0], [1], [0, 0, 1, 1], [], []>} : vector<8x48xbf16>, vector<48x128xbf16>, vector<8x128xf32> -> vector<8x128xf32>
    %5 = vector.broadcast %2 : vector<1x128xf32> to vector<8x128xf32>
    %6 = arith.addf %4, %5 : vector<8x128xf32>
    %cst_5 = arith.constant 0.000000e+00 : f32
    %7 = vector.broadcast %cst_5 : f32 to vector<8x128xf32>
    %8 = arith.maximumf %6, %7 : vector<8x128xf32>
    %9 = arith.mulf %8, %8 : vector<8x128xf32>
    %10 = tpu.concatenate %8, %9 in 1 : vector<8x128xf32>, vector<8x128xf32> -> vector<8x256xf32>
    %cst_6 = arith.constant dense<0.000000e+00> : vector<256xf32>
    %11 = vector.multi_reduction <add>, %10, %cst_6 [0] : vector<8x256xf32> to vector<256xf32>
    %12 = vector.shape_cast %11 : vector<256xf32> to vector<1x256xf32>
    %cst_7 = arith.constant 8.000000e+00 : f32
    %13 = vector.broadcast %cst_7 : f32 to vector<1x256xf32>
    %14 = arith.divf %12, %13 : vector<1x256xf32>
    %15 = vector.extract_strided_slice %14 {offsets = [0, 0], sizes = [1, 128], strides = [1, 1]} : vector<1x256xf32> to vector<1x128xf32>
    %16 = vector.extract_strided_slice %14 {offsets = [0, 128], sizes = [1, 128], strides = [1, 1]} : vector<1x256xf32> to vector<1x128xf32>
    %17 = arith.mulf %15, %15 : vector<1x128xf32>
    %18 = arith.subf %16, %17 : vector<1x128xf32>
    %cst_8 = arith.constant 0.000000e+00 : f32
    %19 = vector.broadcast %cst_8 : f32 to vector<1x128xf32>
    %20 = arith.maximumf %18, %19 : vector<1x128xf32>
    %21 = vector.broadcast %15 : vector<1x128xf32> to vector<8x128xf32>
    %22 = arith.subf %8, %21 : vector<8x128xf32>
    %cst_9 = arith.constant 9.99999974E-6 : f32
    %23 = vector.broadcast %cst_9 : f32 to vector<1x128xf32>
    %24 = arith.addf %20, %23 : vector<1x128xf32>
    %25 = math.rsqrt %24 : vector<1x128xf32>
    %26 = vector.broadcast %25 : vector<1x128xf32> to vector<8x128xf32>
    %27 = arith.mulf %22, %26 : vector<8x128xf32>
    %28 = arith.mulf %27, %27 : vector<8x128xf32>
    %29 = tpu.concatenate %27, %28 in 0 : vector<8x128xf32>, vector<8x128xf32> -> vector<16x128xf32>
    %cst_10 = arith.constant dense<0.000000e+00> : vector<16xf32>
    %30 = vector.multi_reduction <add>, %29, %cst_10 [1] : vector<16x128xf32> to vector<16xf32>
    %31 = vector.shape_cast %30 : vector<16xf32> to vector<16x1xf32>
    %32 = vector.extract_strided_slice %31 {offsets = [0, 0], sizes = [8, 1], strides = [1, 1]} : vector<16x1xf32> to vector<8x1xf32>
    %cst_11 = arith.constant 1.562500e-02 : f32
    %33 = vector.broadcast %cst_11 : f32 to vector<8x1xf32>
    %34 = arith.mulf %32, %33 : vector<8x1xf32>
    %35 = vector.extract_strided_slice %31 {offsets = [8, 0], sizes = [8, 1], strides = [1, 1]} : vector<16x1xf32> to vector<8x1xf32>
    %cst_12 = arith.constant 1.562500e-02 : f32
    %36 = vector.broadcast %cst_12 : f32 to vector<8x1xf32>
    %37 = arith.mulf %35, %36 : vector<8x1xf32>
    %38 = arith.mulf %34, %34 : vector<8x1xf32>
    %39 = arith.subf %37, %38 : vector<8x1xf32>
    %cst_13 = arith.constant 0.000000e+00 : f32
    %40 = vector.broadcast %cst_13 : f32 to vector<8x1xf32>
    %41 = arith.maximumf %39, %40 : vector<8x1xf32>
    %42 = vector.broadcast %34 : vector<8x1xf32> to vector<8x128xf32>
    %43 = arith.subf %27, %42 : vector<8x128xf32>
    %cst_14 = arith.constant 9.99999974E-6 : f32
    %44 = vector.broadcast %cst_14 : f32 to vector<8x1xf32>
    %45 = arith.addf %41, %44 : vector<8x1xf32>
    %46 = math.rsqrt %45 : vector<8x1xf32>
    %47 = vector.broadcast %46 : vector<8x1xf32> to vector<8x128xf32>
    %48 = arith.mulf %43, %47 : vector<8x128xf32>
    %c0_15 = arith.constant 0 : index
    %c0_16 = arith.constant 0 : index
    %49 = vector.load %arg8[%c0_15, %c0_16] : memref<128x512xbf16, #tpu.memory_space<vmem>>, vector<128x256xbf16>
    %c0_17 = arith.constant 0 : index
    %c128 = arith.constant 128 : index
    %50 = vector.load %arg5[%c0_17, %c128] : memref<1x2944xf32, #tpu.memory_space<vmem>>, vector<1x256xf32>
    %51 = arith.truncf %48 : vector<8x128xf32> to vector<8x128xbf16>
    %cst_18 = arith.constant dense<0.000000e+00> : vector<8x256xf32>
    %52 = tpu.matmul %51, %49, %cst_18 {dimension_numbers = #tpu.dot_dimension_numbers<[1], [0], [0], [1], [0, 0, 1, 1], [], []>} : vector<8x128xbf16>, vector<128x256xbf16>, vector<8x256xf32> -> vector<8x256xf32>
    %53 = vector.broadcast %50 : vector<1x256xf32> to vector<8x256xf32>
    %54 = arith.addf %52, %53 : vector<8x256xf32>
    %cst_19 = arith.constant 0.000000e+00 : f32
    %55 = vector.broadcast %cst_19 : f32 to vector<8x256xf32>
    %56 = arith.maximumf %54, %55 : vector<8x256xf32>
    %57 = arith.mulf %56, %56 : vector<8x256xf32>
    %58 = tpu.concatenate %56, %57 in 1 : vector<8x256xf32>, vector<8x256xf32> -> vector<8x512xf32>
    %cst_20 = arith.constant dense<0.000000e+00> : vector<512xf32>
    %59 = vector.multi_reduction <add>, %58, %cst_20 [0] : vector<8x512xf32> to vector<512xf32>
    %60 = vector.shape_cast %59 : vector<512xf32> to vector<1x512xf32>
    %cst_21 = arith.constant 8.000000e+00 : f32
    %61 = vector.broadcast %cst_21 : f32 to vector<1x512xf32>
    %62 = arith.divf %60, %61 : vector<1x512xf32>
    %63 = vector.extract_strided_slice %62 {offsets = [0, 0], sizes = [1, 256], strides = [1, 1]} : vector<1x512xf32> to vector<1x256xf32>
    %64 = vector.extract_strided_slice %62 {offsets = [0, 256], sizes = [1, 256], strides = [1, 1]} : vector<1x512xf32> to vector<1x256xf32>
    %65 = arith.mulf %63, %63 : vector<1x256xf32>
    %66 = arith.subf %64, %65 : vector<1x256xf32>
    %cst_22 = arith.constant 0.000000e+00 : f32
    %67 = vector.broadcast %cst_22 : f32 to vector<1x256xf32>
    %68 = arith.maximumf %66, %67 : vector<1x256xf32>
    %69 = vector.broadcast %63 : vector<1x256xf32> to vector<8x256xf32>
    %70 = arith.subf %56, %69 : vector<8x256xf32>
    %cst_23 = arith.constant 9.99999974E-6 : f32
    %71 = vector.broadcast %cst_23 : f32 to vector<1x256xf32>
    %72 = arith.addf %68, %71 : vector<1x256xf32>
    %73 = math.rsqrt %72 : vector<1x256xf32>
    %74 = vector.broadcast %73 : vector<1x256xf32> to vector<8x256xf32>
    %75 = arith.mulf %70, %74 : vector<8x256xf32>
    %76 = arith.mulf %75, %75 : vector<8x256xf32>
    %77 = tpu.concatenate %75, %76 in 0 : vector<8x256xf32>, vector<8x256xf32> -> vector<16x256xf32>
    %cst_24 = arith.constant dense<0.000000e+00> : vector<16xf32>
    %78 = vector.multi_reduction <add>, %77, %cst_24 [1] : vector<16x256xf32> to vector<16xf32>
    %79 = vector.shape_cast %78 : vector<16xf32> to vector<16x1xf32>
    %80 = vector.extract_strided_slice %79 {offsets = [0, 0], sizes = [8, 1], strides = [1, 1]} : vector<16x1xf32> to vector<8x1xf32>
    %cst_25 = arith.constant 3.906250e-03 : f32
    %81 = vector.broadcast %cst_25 : f32 to vector<8x1xf32>
    %82 = arith.mulf %80, %81 : vector<8x1xf32>
    %83 = vector.extract_strided_slice %79 {offsets = [8, 0], sizes = [8, 1], strides = [1, 1]} : vector<16x1xf32> to vector<8x1xf32>
    %cst_26 = arith.constant 3.906250e-03 : f32
    %84 = vector.broadcast %cst_26 : f32 to vector<8x1xf32>
    %85 = arith.mulf %83, %84 : vector<8x1xf32>
    %86 = arith.mulf %82, %82 : vector<8x1xf32>
    %87 = arith.subf %85, %86 : vector<8x1xf32>
    %cst_27 = arith.constant 0.000000e+00 : f32
    %88 = vector.broadcast %cst_27 : f32 to vector<8x1xf32>
    %89 = arith.maximumf %87, %88 : vector<8x1xf32>
    %90 = vector.broadcast %82 : vector<8x1xf32> to vector<8x256xf32>
    %91 = arith.subf %75, %90 : vector<8x256xf32>
    %cst_28 = arith.constant 9.99999974E-6 : f32
    %92 = vector.broadcast %cst_28 : f32 to vector<8x1xf32>
    %93 = arith.addf %89, %92 : vector<8x1xf32>
    %94 = math.rsqrt %93 : vector<8x1xf32>
    %95 = vector.broadcast %94 : vector<8x1xf32> to vector<8x256xf32>
    %96 = arith.mulf %91, %95 : vector<8x256xf32>
    %c0_29 = arith.constant 0 : index
    %c0_30 = arith.constant 0 : index
    %97 = vector.load %arg3[%c0_29, %c0_30] : memref<8x32xf32, #tpu.memory_space<vmem>>, vector<8x32xf32>
    %c0_31 = arith.constant 0 : index
    %c0_32 = arith.constant 0 : index
    %98 = vector.load %arg7[%c0_31, %c0_32] : memref<32x128xbf16, #tpu.memory_space<vmem>>, vector<32x128xbf16>
    %c0_33 = arith.constant 0 : index
    %c384 = arith.constant 384 : index
    %99 = vector.load %arg5[%c0_33, %c384] : memref<1x2944xf32, #tpu.memory_space<vmem>>, vector<1x128xf32>
    %100 = arith.truncf %97 : vector<8x32xf32> to vector<8x32xbf16>
    %cst_34 = arith.constant dense<0.000000e+00> : vector<8x128xf32>
    %101 = tpu.matmul %100, %98, %cst_34 {dimension_numbers = #tpu.dot_dimension_numbers<[1], [0], [0], [1], [0, 0, 1, 1], [], []>} : vector<8x32xbf16>, vector<32x128xbf16>, vector<8x128xf32> -> vector<8x128xf32>
    %102 = vector.broadcast %99 : vector<1x128xf32> to vector<8x128xf32>
    %103 = arith.addf %101, %102 : vector<8x128xf32>
    %cst_35 = arith.constant 0.000000e+00 : f32
    %104 = vector.broadcast %cst_35 : f32 to vector<8x128xf32>
    %105 = arith.maximumf %103, %104 : vector<8x128xf32>
    %106 = arith.mulf %105, %105 : vector<8x128xf32>
    %107 = tpu.concatenate %105, %106 in 1 : vector<8x128xf32>, vector<8x128xf32> -> vector<8x256xf32>
    %cst_36 = arith.constant dense<0.000000e+00> : vector<256xf32>
    %108 = vector.multi_reduction <add>, %107, %cst_36 [0] : vector<8x256xf32> to vector<256xf32>
    %109 = vector.shape_cast %108 : vector<256xf32> to vector<1x256xf32>
    %cst_37 = arith.constant 8.000000e+00 : f32
    %110 = vector.broadcast %cst_37 : f32 to vector<1x256xf32>
    %111 = arith.divf %109, %110 : vector<1x256xf32>
    %112 = vector.extract_strided_slice %111 {offsets = [0, 0], sizes = [1, 128], strides = [1, 1]} : vector<1x256xf32> to vector<1x128xf32>
    %113 = vector.extract_strided_slice %111 {offsets = [0, 128], sizes = [1, 128], strides = [1, 1]} : vector<1x256xf32> to vector<1x128xf32>
    %114 = arith.mulf %112, %112 : vector<1x128xf32>
    %115 = arith.subf %113, %114 : vector<1x128xf32>
    %cst_38 = arith.constant 0.000000e+00 : f32
    %116 = vector.broadcast %cst_38 : f32 to vector<1x128xf32>
    %117 = arith.maximumf %115, %116 : vector<1x128xf32>
    %118 = vector.broadcast %112 : vector<1x128xf32> to vector<8x128xf32>
    %119 = arith.subf %105, %118 : vector<8x128xf32>
    %cst_39 = arith.constant 9.99999974E-6 : f32
    %120 = vector.broadcast %cst_39 : f32 to vector<1x128xf32>
    %121 = arith.addf %117, %120 : vector<1x128xf32>
    %122 = math.rsqrt %121 : vector<1x128xf32>
    %123 = vector.broadcast %122 : vector<1x128xf32> to vector<8x128xf32>
    %124 = arith.mulf %119, %123 : vector<8x128xf32>
    %125 = arith.mulf %124, %124 : vector<8x128xf32>
    %126 = tpu.concatenate %124, %125 in 0 : vector<8x128xf32>, vector<8x128xf32> -> vector<16x128xf32>
    %cst_40 = arith.constant dense<0.000000e+00> : vector<16xf32>
    %127 = vector.multi_reduction <add>, %126, %cst_40 [1] : vector<16x128xf32> to vector<16xf32>
    %128 = vector.shape_cast %127 : vector<16xf32> to vector<16x1xf32>
    %129 = vector.extract_strided_slice %128 {offsets = [0, 0], sizes = [8, 1], strides = [1, 1]} : vector<16x1xf32> to vector<8x1xf32>
    %cst_41 = arith.constant 1.562500e-02 : f32
    %130 = vector.broadcast %cst_41 : f32 to vector<8x1xf32>
    %131 = arith.mulf %129, %130 : vector<8x1xf32>
    %132 = vector.extract_strided_slice %128 {offsets = [8, 0], sizes = [8, 1], strides = [1, 1]} : vector<16x1xf32> to vector<8x1xf32>
    %cst_42 = arith.constant 1.562500e-02 : f32
    %133 = vector.broadcast %cst_42 : f32 to vector<8x1xf32>
    %134 = arith.mulf %132, %133 : vector<8x1xf32>
    %135 = arith.mulf %131, %131 : vector<8x1xf32>
    %136 = arith.subf %134, %135 : vector<8x1xf32>
    %cst_43 = arith.constant 0.000000e+00 : f32
    %137 = vector.broadcast %cst_43 : f32 to vector<8x1xf32>
    %138 = arith.maximumf %136, %137 : vector<8x1xf32>
    %139 = vector.broadcast %131 : vector<8x1xf32> to vector<8x128xf32>
    %140 = arith.subf %124, %139 : vector<8x128xf32>
    %cst_44 = arith.constant 9.99999974E-6 : f32
    %141 = vector.broadcast %cst_44 : f32 to vector<8x1xf32>
    %142 = arith.addf %138, %141 : vector<8x1xf32>
    %143 = math.rsqrt %142 : vector<8x1xf32>
    %144 = vector.broadcast %143 : vector<8x1xf32> to vector<8x128xf32>
    %145 = arith.mulf %140, %144 : vector<8x128xf32>
    %c0_45 = arith.constant 0 : index
    %c256 = arith.constant 256 : index
    %146 = vector.load %arg8[%c0_45, %c256] : memref<128x512xbf16, #tpu.memory_space<vmem>>, vector<128x256xbf16>
    %c0_46 = arith.constant 0 : index
    %c512 = arith.constant 512 : index
    %147 = vector.load %arg5[%c0_46, %c512] : memref<1x2944xf32, #tpu.memory_space<vmem>>, vector<1x256xf32>
    %148 = arith.truncf %145 : vector<8x128xf32> to vector<8x128xbf16>
    %cst_47 = arith.constant dense<0.000000e+00> : vector<8x256xf32>
    %149 = tpu.matmul %148, %146, %cst_47 {dimension_numbers = #tpu.dot_dimension_numbers<[1], [0], [0], [1], [0, 0, 1, 1], [], []>} : vector<8x128xbf16>, vector<128x256xbf16>, vector<8x256xf32> -> vector<8x256xf32>
    %150 = vector.broadcast %147 : vector<1x256xf32> to vector<8x256xf32>
    %151 = arith.addf %149, %150 : vector<8x256xf32>
    %cst_48 = arith.constant 0.000000e+00 : f32
    %152 = vector.broadcast %cst_48 : f32 to vector<8x256xf32>
    %153 = arith.maximumf %151, %152 : vector<8x256xf32>
    %154 = arith.mulf %153, %153 : vector<8x256xf32>
    %155 = tpu.concatenate %153, %154 in 1 : vector<8x256xf32>, vector<8x256xf32> -> vector<8x512xf32>
    %cst_49 = arith.constant dense<0.000000e+00> : vector<512xf32>
    %156 = vector.multi_reduction <add>, %155, %cst_49 [0] : vector<8x512xf32> to vector<512xf32>
    %157 = vector.shape_cast %156 : vector<512xf32> to vector<1x512xf32>
    %cst_50 = arith.constant 8.000000e+00 : f32
    %158 = vector.broadcast %cst_50 : f32 to vector<1x512xf32>
    %159 = arith.divf %157, %158 : vector<1x512xf32>
    %160 = vector.extract_strided_slice %159 {offsets = [0, 0], sizes = [1, 256], strides = [1, 1]} : vector<1x512xf32> to vector<1x256xf32>
    %161 = vector.extract_strided_slice %159 {offsets = [0, 256], sizes = [1, 256], strides = [1, 1]} : vector<1x512xf32> to vector<1x256xf32>
    %162 = arith.mulf %160, %160 : vector<1x256xf32>
    %163 = arith.subf %161, %162 : vector<1x256xf32>
    %cst_51 = arith.constant 0.000000e+00 : f32
    %164 = vector.broadcast %cst_51 : f32 to vector<1x256xf32>
    %165 = arith.maximumf %163, %164 : vector<1x256xf32>
    %166 = vector.broadcast %160 : vector<1x256xf32> to vector<8x256xf32>
    %167 = arith.subf %153, %166 : vector<8x256xf32>
    %cst_52 = arith.constant 9.99999974E-6 : f32
    %168 = vector.broadcast %cst_52 : f32 to vector<1x256xf32>
    %169 = arith.addf %165, %168 : vector<1x256xf32>
    %170 = math.rsqrt %169 : vector<1x256xf32>
    %171 = vector.broadcast %170 : vector<1x256xf32> to vector<8x256xf32>
    %172 = arith.mulf %167, %171 : vector<8x256xf32>
    %173 = arith.mulf %172, %172 : vector<8x256xf32>
    %174 = tpu.concatenate %172, %173 in 0 : vector<8x256xf32>, vector<8x256xf32> -> vector<16x256xf32>
    %cst_53 = arith.constant dense<0.000000e+00> : vector<16xf32>
    %175 = vector.multi_reduction <add>, %174, %cst_53 [1] : vector<16x256xf32> to vector<16xf32>
    %176 = vector.shape_cast %175 : vector<16xf32> to vector<16x1xf32>
    %177 = vector.extract_strided_slice %176 {offsets = [0, 0], sizes = [8, 1], strides = [1, 1]} : vector<16x1xf32> to vector<8x1xf32>
    %cst_54 = arith.constant 3.906250e-03 : f32
    %178 = vector.broadcast %cst_54 : f32 to vector<8x1xf32>
    %179 = arith.mulf %177, %178 : vector<8x1xf32>
    %180 = vector.extract_strided_slice %176 {offsets = [8, 0], sizes = [8, 1], strides = [1, 1]} : vector<16x1xf32> to vector<8x1xf32>
    %cst_55 = arith.constant 3.906250e-03 : f32
    %181 = vector.broadcast %cst_55 : f32 to vector<8x1xf32>
    %182 = arith.mulf %180, %181 : vector<8x1xf32>
    %183 = arith.mulf %179, %179 : vector<8x1xf32>
    %184 = arith.subf %182, %183 : vector<8x1xf32>
    %cst_56 = arith.constant 0.000000e+00 : f32
    %185 = vector.broadcast %cst_56 : f32 to vector<8x1xf32>
    %186 = arith.maximumf %184, %185 : vector<8x1xf32>
    %187 = vector.broadcast %179 : vector<8x1xf32> to vector<8x256xf32>
    %188 = arith.subf %172, %187 : vector<8x256xf32>
    %cst_57 = arith.constant 9.99999974E-6 : f32
    %189 = vector.broadcast %cst_57 : f32 to vector<8x1xf32>
    %190 = arith.addf %186, %189 : vector<8x1xf32>
    %191 = math.rsqrt %190 : vector<8x1xf32>
    %192 = vector.broadcast %191 : vector<8x1xf32> to vector<8x256xf32>
    %193 = arith.mulf %188, %192 : vector<8x256xf32>
    %194 = tpu.concatenate %96, %193 in 0 : vector<8x256xf32>, vector<8x256xf32> -> vector<16x256xf32>
    %195 = arith.mulf %194, %194 : vector<16x256xf32>
    %196 = tpu.concatenate %194, %195 in 1 : vector<16x256xf32>, vector<16x256xf32> -> vector<16x512xf32>
    %cst_58 = arith.constant dense<0.000000e+00> : vector<512xf32>
    %197 = vector.multi_reduction <add>, %196, %cst_58 [0] : vector<16x512xf32> to vector<512xf32>
    %198 = vector.shape_cast %197 : vector<512xf32> to vector<1x512xf32>
    %cst_59 = arith.constant 1.600000e+01 : f32
    %199 = vector.broadcast %cst_59 : f32 to vector<1x512xf32>
    %200 = arith.divf %198, %199 : vector<1x512xf32>
    %201 = vector.extract_strided_slice %200 {offsets = [0, 0], sizes = [1, 256], strides = [1, 1]} : vector<1x512xf32> to vector<1x256xf32>
    %202 = vector.extract_strided_slice %200 {offsets = [0, 256], sizes = [1, 256], strides = [1, 1]} : vector<1x512xf32> to vector<1x256xf32>
    %203 = arith.mulf %201, %201 : vector<1x256xf32>
    %204 = arith.subf %202, %203 : vector<1x256xf32>
    %cst_60 = arith.constant 0.000000e+00 : f32
    %205 = vector.broadcast %cst_60 : f32 to vector<1x256xf32>
    %206 = arith.maximumf %204, %205 : vector<1x256xf32>
    %207 = vector.broadcast %201 : vector<1x256xf32> to vector<16x256xf32>
    %208 = arith.subf %194, %207 : vector<16x256xf32>
    %cst_61 = arith.constant 9.99999974E-6 : f32
    %209 = vector.broadcast %cst_61 : f32 to vector<1x256xf32>
    %210 = arith.addf %206, %209 : vector<1x256xf32>
    %211 = math.rsqrt %210 : vector<1x256xf32>
    %212 = vector.broadcast %211 : vector<1x256xf32> to vector<16x256xf32>
    %213 = arith.mulf %208, %212 : vector<16x256xf32>
    %214 = arith.mulf %213, %213 : vector<16x256xf32>
    %215 = tpu.concatenate %213, %214 in 0 : vector<16x256xf32>, vector<16x256xf32> -> vector<32x256xf32>
    %cst_62 = arith.constant dense<0.000000e+00> : vector<32xf32>
    %216 = vector.multi_reduction <add>, %215, %cst_62 [1] : vector<32x256xf32> to vector<32xf32>
    %217 = vector.shape_cast %216 : vector<32xf32> to vector<32x1xf32>
    %218 = vector.extract_strided_slice %217 {offsets = [0, 0], sizes = [16, 1], strides = [1, 1]} : vector<32x1xf32> to vector<16x1xf32>
    %cst_63 = arith.constant 3.906250e-03 : f32
    %219 = vector.broadcast %cst_63 : f32 to vector<16x1xf32>
    %220 = arith.mulf %218, %219 : vector<16x1xf32>
    %221 = vector.extract_strided_slice %217 {offsets = [16, 0], sizes = [16, 1], strides = [1, 1]} : vector<32x1xf32> to vector<16x1xf32>
    %cst_64 = arith.constant 3.906250e-03 : f32
    %222 = vector.broadcast %cst_64 : f32 to vector<16x1xf32>
    %223 = arith.mulf %221, %222 : vector<16x1xf32>
    %224 = arith.mulf %220, %220 : vector<16x1xf32>
    %225 = arith.subf %223, %224 : vector<16x1xf32>
    %cst_65 = arith.constant 0.000000e+00 : f32
    %226 = vector.broadcast %cst_65 : f32 to vector<16x1xf32>
    %227 = arith.maximumf %225, %226 : vector<16x1xf32>
    %228 = vector.broadcast %220 : vector<16x1xf32> to vector<16x256xf32>
    %229 = arith.subf %213, %228 : vector<16x256xf32>
    %cst_66 = arith.constant 9.99999974E-6 : f32
    %230 = vector.broadcast %cst_66 : f32 to vector<16x1xf32>
    %231 = arith.addf %227, %230 : vector<16x1xf32>
    %232 = math.rsqrt %231 : vector<16x1xf32>
    %233 = vector.broadcast %232 : vector<16x1xf32> to vector<16x256xf32>
    %234 = arith.mulf %229, %233 : vector<16x256xf32>
    %235 = arith.truncf %234 : vector<16x256xf32> to vector<16x256xbf16>
    %c0_67 = arith.constant 0 : index
    %c0_68 = arith.constant 0 : index
    %236 = vector.load %arg9[%c0_67, %c0_68] : memref<256x256xbf16, #tpu.memory_space<vmem>>, vector<256x256xbf16>
    %cst_69 = arith.constant dense<0.000000e+00> : vector<16x256xf32>
    %237 = tpu.matmul %235, %236, %cst_69 {dimension_numbers = #tpu.dot_dimension_numbers<[1], [0], [0], [1], [0, 0, 1, 1], [], []>} : vector<16x256xbf16>, vector<256x256xbf16>, vector<16x256xf32> -> vector<16x256xf32>
    %c0_70 = arith.constant 0 : index
    %c0_71 = arith.constant 0 : index
    %238 = vector.load %arg4[%c0_70, %c0_71] : memref<16x16xbf16, #tpu.memory_space<vmem>>, vector<16x16xbf16>
    %239 = arith.truncf %237 : vector<16x256xf32> to vector<16x256xbf16>
    %cst_72 = arith.constant dense<0.000000e+00> : vector<16x256xf32>
    %240 = tpu.matmul %238, %239, %cst_72 {dimension_numbers = #tpu.dot_dimension_numbers<[1], [0], [0], [1], [0, 0, 1, 1], [], []>} : vector<16x16xbf16>, vector<16x256xbf16>, vector<16x256xf32> -> vector<16x256xf32>
    %c0_73 = arith.constant 0 : index
    %c768 = arith.constant 768 : index
    %241 = vector.load %arg5[%c0_73, %c768] : memref<1x2944xf32, #tpu.memory_space<vmem>>, vector<1x256xf32>
    %242 = vector.broadcast %241 : vector<1x256xf32> to vector<16x256xf32>
    %243 = arith.addf %240, %242 : vector<16x256xf32>
    %cst_74 = arith.constant 0.000000e+00 : f32
    %244 = vector.broadcast %cst_74 : f32 to vector<16x256xf32>
    %245 = arith.cmpf ogt, %243, %244 : vector<16x256xf32>
    %cst_75 = arith.constant 0.000000e+00 : f32
    %246 = vector.broadcast %cst_75 : f32 to vector<16x256xf32>
    %247 = arith.minimumf %243, %246 : vector<16x256xf32>
    %248 = math.exp %247 : vector<16x256xf32>
    %cst_76 = arith.constant 1.000000e+00 : f32
    %249 = vector.broadcast %cst_76 : f32 to vector<16x256xf32>
    %250 = arith.subf %248, %249 : vector<16x256xf32>
    %251 = arith.select %245, %243, %250 : vector<16x256xi1>, vector<16x256xf32>
    %252 = arith.mulf %251, %251 : vector<16x256xf32>
    %253 = tpu.concatenate %251, %252 in 1 : vector<16x256xf32>, vector<16x256xf32> -> vector<16x512xf32>
    %cst_77 = arith.constant dense<0.000000e+00> : vector<512xf32>
    %254 = vector.multi_reduction <add>, %253, %cst_77 [0] : vector<16x512xf32> to vector<512xf32>
    %255 = vector.shape_cast %254 : vector<512xf32> to vector<1x512xf32>
    %cst_78 = arith.constant 1.600000e+01 : f32
    %256 = vector.broadcast %cst_78 : f32 to vector<1x512xf32>
    %257 = arith.divf %255, %256 : vector<1x512xf32>
    %258 = vector.extract_strided_slice %257 {offsets = [0, 0], sizes = [1, 256], strides = [1, 1]} : vector<1x512xf32> to vector<1x256xf32>
    %259 = vector.extract_strided_slice %257 {offsets = [0, 256], sizes = [1, 256], strides = [1, 1]} : vector<1x512xf32> to vector<1x256xf32>
    %260 = arith.mulf %258, %258 : vector<1x256xf32>
    %261 = arith.subf %259, %260 : vector<1x256xf32>
    %cst_79 = arith.constant 0.000000e+00 : f32
    %262 = vector.broadcast %cst_79 : f32 to vector<1x256xf32>
    %263 = arith.maximumf %261, %262 : vector<1x256xf32>
    %264 = vector.broadcast %258 : vector<1x256xf32> to vector<16x256xf32>
    %265 = arith.subf %251, %264 : vector<16x256xf32>
    %cst_80 = arith.constant 9.99999974E-6 : f32
    %266 = vector.broadcast %cst_80 : f32 to vector<1x256xf32>
    %267 = arith.addf %263, %266 : vector<1x256xf32>
    %268 = math.rsqrt %267 : vector<1x256xf32>
    %269 = vector.broadcast %268 : vector<1x256xf32> to vector<16x256xf32>
    %270 = arith.mulf %265, %269 : vector<16x256xf32>
    %271 = arith.mulf %270, %270 : vector<16x256xf32>
    %272 = tpu.concatenate %270, %271 in 0 : vector<16x256xf32>, vector<16x256xf32> -> vector<32x256xf32>
    %cst_81 = arith.constant dense<0.000000e+00> : vector<32xf32>
    %273 = vector.multi_reduction <add>, %272, %cst_81 [1] : vector<32x256xf32> to vector<32xf32>
    %274 = vector.shape_cast %273 : vector<32xf32> to vector<32x1xf32>
    %275 = vector.extract_strided_slice %274 {offsets = [0, 0], sizes = [16, 1], strides = [1, 1]} : vector<32x1xf32> to vector<16x1xf32>
    %cst_82 = arith.constant 3.906250e-03 : f32
    %276 = vector.broadcast %cst_82 : f32 to vector<16x1xf32>
    %277 = arith.mulf %275, %276 : vector<16x1xf32>
    %278 = vector.extract_strided_slice %274 {offsets = [16, 0], sizes = [16, 1], strides = [1, 1]} : vector<32x1xf32> to vector<16x1xf32>
    %cst_83 = arith.constant 3.906250e-03 : f32
    %279 = vector.broadcast %cst_83 : f32 to vector<16x1xf32>
    %280 = arith.mulf %278, %279 : vector<16x1xf32>
    %281 = arith.mulf %277, %277 : vector<16x1xf32>
    %282 = arith.subf %280, %281 : vector<16x1xf32>
    %cst_84 = arith.constant 0.000000e+00 : f32
    %283 = vector.broadcast %cst_84 : f32 to vector<16x1xf32>
    %284 = arith.maximumf %282, %283 : vector<16x1xf32>
    %285 = vector.broadcast %277 : vector<16x1xf32> to vector<16x256xf32>
    %286 = arith.subf %270, %285 : vector<16x256xf32>
    %cst_85 = arith.constant 9.99999974E-6 : f32
    %287 = vector.broadcast %cst_85 : f32 to vector<16x1xf32>
    %288 = arith.addf %284, %287 : vector<16x1xf32>
    %289 = math.rsqrt %288 : vector<16x1xf32>
    %290 = vector.broadcast %289 : vector<16x1xf32> to vector<16x256xf32>
    %291 = arith.mulf %286, %290 : vector<16x256xf32>
    %292 = tpu.iota {dimensions = array<i32: 1>} : vector<16x16xi32>
    %c0_86 = arith.constant 0 : index
    %c0_87 = arith.constant 0 : index
    %293 = vector.load %arg1[%c0_86, %c0_87] : memref<16x1xi32, #tpu.memory_space<vmem>>, vector<16x1xi32>
    %294 = vector.broadcast %293 : vector<16x1xi32> to vector<16x16xi32>
    %295 = arith.cmpi eq, %294, %292 : vector<16x16xi32>
    %cst_88 = arith.constant 1.000000e+00 : f32
    %cst_89 = arith.constant 0.000000e+00 : f32
    %296 = vector.broadcast %cst_88 : f32 to vector<16x16xf32>
    %297 = vector.broadcast %cst_89 : f32 to vector<16x16xf32>
    %298 = arith.select %295, %296, %297 : vector<16x16xi1>, vector<16x16xf32>
    %299 = arith.truncf %298 : vector<16x16xf32> to vector<16x16xbf16>
    %300 = arith.truncf %291 : vector<16x256xf32> to vector<16x256xbf16>
    %301 = tpu.concatenate %235, %300 in 1 : vector<16x256xbf16>, vector<16x256xbf16> -> vector<16x512xbf16>
    %cst_90 = arith.constant dense<0.000000e+00> : vector<16x512xf32>
    %302 = tpu.matmul %299, %301, %cst_90 {dimension_numbers = #tpu.dot_dimension_numbers<[1], [0], [0], [1], [0, 0, 1, 1], [], []>} : vector<16x16xbf16>, vector<16x512xbf16>, vector<16x512xf32> -> vector<16x512xf32>
    %303 = vector.extract_strided_slice %302 {offsets = [0, 0], sizes = [8, 256], strides = [1, 1]} : vector<16x512xf32> to vector<8x256xf32>
    %304 = vector.extract_strided_slice %302 {offsets = [8, 0], sizes = [8, 256], strides = [1, 1]} : vector<16x512xf32> to vector<8x256xf32>
    %305 = vector.extract_strided_slice %302 {offsets = [0, 256], sizes = [16, 256], strides = [1, 1]} : vector<16x512xf32> to vector<16x256xf32>
    %c0_91 = arith.constant 0 : index
    %c0_92 = arith.constant 0 : index
    %306 = vector.load %arg10[%c0_91, %c0_92] : memref<256x1536xbf16, #tpu.memory_space<vmem>>, vector<256x1536xbf16>
    %307 = arith.truncf %305 : vector<16x256xf32> to vector<16x256xbf16>
    %cst_93 = arith.constant dense<0.000000e+00> : vector<16x1536xf32>
    %308 = tpu.matmul %307, %306, %cst_93 {dimension_numbers = #tpu.dot_dimension_numbers<[1], [0], [0], [1], [0, 0, 1, 1], [], []>} : vector<16x256xbf16>, vector<256x1536xbf16>, vector<16x1536xf32> -> vector<16x1536xf32>
    %c0_94 = arith.constant 0 : index
    %c1024 = arith.constant 1024 : index
    %309 = vector.load %arg5[%c0_94, %c1024] : memref<1x2944xf32, #tpu.memory_space<vmem>>, vector<1x1536xf32>
    %310 = vector.broadcast %309 : vector<1x1536xf32> to vector<16x1536xf32>
    %311 = arith.addf %308, %310 : vector<16x1536xf32>
    %cst_95 = arith.constant 0.000000e+00 : f32
    %312 = vector.broadcast %cst_95 : f32 to vector<16x1536xf32>
    %313 = arith.maximumf %311, %312 : vector<16x1536xf32>
    %314 = vector.extract_strided_slice %313 {offsets = [0, 0], sizes = [8, 768], strides = [1, 1]} : vector<16x1536xf32> to vector<8x768xf32>
    %315 = vector.extract_strided_slice %313 {offsets = [8, 768], sizes = [8, 768], strides = [1, 1]} : vector<16x1536xf32> to vector<8x768xf32>
    %316 = arith.mulf %315, %314 : vector<8x768xf32>
    %c0_96 = arith.constant 0 : index
    %c0_97 = arith.constant 0 : index
    %317 = vector.load %arg11[%c0_96, %c0_97] : memref<768x384xbf16, #tpu.memory_space<vmem>>, vector<768x384xbf16>
    %318 = arith.truncf %316 : vector<8x768xf32> to vector<8x768xbf16>
    %cst_98 = arith.constant dense<0.000000e+00> : vector<8x384xf32>
    %319 = tpu.matmul %318, %317, %cst_98 {dimension_numbers = #tpu.dot_dimension_numbers<[1], [0], [0], [1], [0, 0, 1, 1], [], []>} : vector<8x768xbf16>, vector<768x384xbf16>, vector<8x384xf32> -> vector<8x384xf32>
    %320 = vector.extract_strided_slice %319 {offsets = [0, 0], sizes = [8, 256], strides = [1, 1]} : vector<8x384xf32> to vector<8x256xf32>
    %321 = vector.extract_strided_slice %319 {offsets = [0, 256], sizes = [8, 1], strides = [1, 1]} : vector<8x384xf32> to vector<8x1xf32>
    %c3 = arith.constant 3 : index
    %322 = memref.load %arg0[%c3] : memref<4xf32, #tpu.memory_space<smem>>
    %323 = vector.broadcast %322 : f32 to vector<8x1xf32>
    %324 = arith.addf %321, %323 : vector<8x1xf32>
    %325 = vector.broadcast %324 : vector<8x1xf32> to vector<8x256xf32>
    %326 = arith.mulf %325, %320 : vector<8x256xf32>
    %327 = arith.mulf %326, %326 : vector<8x256xf32>
    %328 = tpu.concatenate %326, %327 in 1 : vector<8x256xf32>, vector<8x256xf32> -> vector<8x512xf32>
    %cst_99 = arith.constant dense<0.000000e+00> : vector<512xf32>
    %329 = vector.multi_reduction <add>, %328, %cst_99 [0] : vector<8x512xf32> to vector<512xf32>
    %330 = vector.shape_cast %329 : vector<512xf32> to vector<1x512xf32>
    %cst_100 = arith.constant 8.000000e+00 : f32
    %331 = vector.broadcast %cst_100 : f32 to vector<1x512xf32>
    %332 = arith.divf %330, %331 : vector<1x512xf32>
    %333 = vector.extract_strided_slice %332 {offsets = [0, 0], sizes = [1, 256], strides = [1, 1]} : vector<1x512xf32> to vector<1x256xf32>
    %334 = vector.extract_strided_slice %332 {offsets = [0, 256], sizes = [1, 256], strides = [1, 1]} : vector<1x512xf32> to vector<1x256xf32>
    %335 = arith.mulf %333, %333 : vector<1x256xf32>
    %336 = arith.subf %334, %335 : vector<1x256xf32>
    %cst_101 = arith.constant 0.000000e+00 : f32
    %337 = vector.broadcast %cst_101 : f32 to vector<1x256xf32>
    %338 = arith.maximumf %336, %337 : vector<1x256xf32>
    %339 = vector.broadcast %333 : vector<1x256xf32> to vector<8x256xf32>
    %340 = arith.subf %326, %339 : vector<8x256xf32>
    %cst_102 = arith.constant 9.99999974E-6 : f32
    %341 = vector.broadcast %cst_102 : f32 to vector<1x256xf32>
    %342 = arith.addf %338, %341 : vector<1x256xf32>
    %343 = math.rsqrt %342 : vector<1x256xf32>
    %344 = vector.broadcast %343 : vector<1x256xf32> to vector<8x256xf32>
    %345 = arith.mulf %340, %344 : vector<8x256xf32>
    %c0_103 = arith.constant 0 : index
    %346 = memref.load %arg0[%c0_103] : memref<4xf32, #tpu.memory_space<smem>>
    %347 = vector.broadcast %346 : f32 to vector<8x256xf32>
    %348 = arith.mulf %347, %345 : vector<8x256xf32>
    %c1 = arith.constant 1 : index
    %349 = memref.load %arg0[%c1] : memref<4xf32, #tpu.memory_space<smem>>
    %350 = vector.broadcast %349 : f32 to vector<8x256xf32>
    %351 = arith.mulf %350, %303 : vector<8x256xf32>
    %352 = arith.addf %348, %351 : vector<8x256xf32>
    %c2 = arith.constant 2 : index
    %353 = memref.load %arg0[%c2] : memref<4xf32, #tpu.memory_space<smem>>
    %354 = vector.broadcast %353 : f32 to vector<8x256xf32>
    %355 = arith.mulf %354, %304 : vector<8x256xf32>
    %356 = arith.addf %352, %355 : vector<8x256xf32>
    %c0_104 = arith.constant 0 : index
    %c0_105 = arith.constant 0 : index
    %357 = vector.load %arg12[%c0_104, %c0_105] : memref<256x128xbf16, #tpu.memory_space<vmem>>, vector<256x128xbf16>
    %358 = arith.truncf %356 : vector<8x256xf32> to vector<8x256xbf16>
    %cst_106 = arith.constant dense<0.000000e+00> : vector<8x128xf32>
    %359 = tpu.matmul %358, %357, %cst_106 {dimension_numbers = #tpu.dot_dimension_numbers<[1], [0], [0], [1], [0, 0, 1, 1], [], []>} : vector<8x256xbf16>, vector<256x128xbf16>, vector<8x128xf32> -> vector<8x128xf32>
    %c0_107 = arith.constant 0 : index
    %c2560 = arith.constant 2560 : index
    %360 = vector.load %arg5[%c0_107, %c2560] : memref<1x2944xf32, #tpu.memory_space<vmem>>, vector<1x128xf32>
    %361 = vector.broadcast %360 : vector<1x128xf32> to vector<8x128xf32>
    %362 = arith.addf %359, %361 : vector<8x128xf32>
    %cst_108 = arith.constant 0.000000e+00 : f32
    %363 = vector.broadcast %cst_108 : f32 to vector<8x128xf32>
    %364 = arith.maximumf %362, %363 : vector<8x128xf32>
    %365 = arith.mulf %364, %364 : vector<8x128xf32>
    %366 = tpu.concatenate %364, %365 in 1 : vector<8x128xf32>, vector<8x128xf32> -> vector<8x256xf32>
    %cst_109 = arith.constant dense<0.000000e+00> : vector<256xf32>
    %367 = vector.multi_reduction <add>, %366, %cst_109 [0] : vector<8x256xf32> to vector<256xf32>
    %368 = vector.shape_cast %367 : vector<256xf32> to vector<1x256xf32>
    %cst_110 = arith.constant 8.000000e+00 : f32
    %369 = vector.broadcast %cst_110 : f32 to vector<1x256xf32>
    %370 = arith.divf %368, %369 : vector<1x256xf32>
    %371 = vector.extract_strided_slice %370 {offsets = [0, 0], sizes = [1, 128], strides = [1, 1]} : vector<1x256xf32> to vector<1x128xf32>
    %372 = vector.extract_strided_slice %370 {offsets = [0, 128], sizes = [1, 128], strides = [1, 1]} : vector<1x256xf32> to vector<1x128xf32>
    %373 = arith.mulf %371, %371 : vector<1x128xf32>
    %374 = arith.subf %372, %373 : vector<1x128xf32>
    %cst_111 = arith.constant 0.000000e+00 : f32
    %375 = vector.broadcast %cst_111 : f32 to vector<1x128xf32>
    %376 = arith.maximumf %374, %375 : vector<1x128xf32>
    %377 = vector.broadcast %371 : vector<1x128xf32> to vector<8x128xf32>
    %378 = arith.subf %364, %377 : vector<8x128xf32>
    %cst_112 = arith.constant 9.99999974E-6 : f32
    %379 = vector.broadcast %cst_112 : f32 to vector<1x128xf32>
    %380 = arith.addf %376, %379 : vector<1x128xf32>
    %381 = math.rsqrt %380 : vector<1x128xf32>
    %382 = vector.broadcast %381 : vector<1x128xf32> to vector<8x128xf32>
    %383 = arith.mulf %378, %382 : vector<8x128xf32>
    %c0_113 = arith.constant 0 : index
    %c0_114 = arith.constant 0 : index
    %384 = vector.load %arg13[%c0_113, %c0_114] : memref<128x128xbf16, #tpu.memory_space<vmem>>, vector<128x128xbf16>
    %385 = arith.truncf %383 : vector<8x128xf32> to vector<8x128xbf16>
    %cst_115 = arith.constant dense<0.000000e+00> : vector<8x128xf32>
    %386 = tpu.matmul %385, %384, %cst_115 {dimension_numbers = #tpu.dot_dimension_numbers<[1], [0], [0], [1], [0, 0, 1, 1], [], []>} : vector<8x128xbf16>, vector<128x128xbf16>, vector<8x128xf32> -> vector<8x128xf32>
    %c0_116 = arith.constant 0 : index
    %c2688 = arith.constant 2688 : index
    %387 = vector.load %arg5[%c0_116, %c2688] : memref<1x2944xf32, #tpu.memory_space<vmem>>, vector<1x128xf32>
    %388 = vector.broadcast %387 : vector<1x128xf32> to vector<8x128xf32>
    %389 = arith.addf %386, %388 : vector<8x128xf32>
    %cst_117 = arith.constant 0.000000e+00 : f32
    %390 = vector.broadcast %cst_117 : f32 to vector<8x128xf32>
    %391 = arith.maximumf %389, %390 : vector<8x128xf32>
    %392 = arith.mulf %391, %391 : vector<8x128xf32>
    %393 = tpu.concatenate %391, %392 in 1 : vector<8x128xf32>, vector<8x128xf32> -> vector<8x256xf32>
    %cst_118 = arith.constant dense<0.000000e+00> : vector<256xf32>
    %394 = vector.multi_reduction <add>, %393, %cst_118 [0] : vector<8x256xf32> to vector<256xf32>
    %395 = vector.shape_cast %394 : vector<256xf32> to vector<1x256xf32>
    %cst_119 = arith.constant 8.000000e+00 : f32
    %396 = vector.broadcast %cst_119 : f32 to vector<1x256xf32>
    %397 = arith.divf %395, %396 : vector<1x256xf32>
    %398 = vector.extract_strided_slice %397 {offsets = [0, 0], sizes = [1, 128], strides = [1, 1]} : vector<1x256xf32> to vector<1x128xf32>
    %399 = vector.extract_strided_slice %397 {offsets = [0, 128], sizes = [1, 128], strides = [1, 1]} : vector<1x256xf32> to vector<1x128xf32>
    %400 = arith.mulf %398, %398 : vector<1x128xf32>
    %401 = arith.subf %399, %400 : vector<1x128xf32>
    %cst_120 = arith.constant 0.000000e+00 : f32
    %402 = vector.broadcast %cst_120 : f32 to vector<1x128xf32>
    %403 = arith.maximumf %401, %402 : vector<1x128xf32>
    %404 = vector.broadcast %398 : vector<1x128xf32> to vector<8x128xf32>
    %405 = arith.subf %391, %404 : vector<8x128xf32>
    %cst_121 = arith.constant 9.99999974E-6 : f32
    %406 = vector.broadcast %cst_121 : f32 to vector<1x128xf32>
    %407 = arith.addf %403, %406 : vector<1x128xf32>
    %408 = math.rsqrt %407 : vector<1x128xf32>
    %409 = vector.broadcast %408 : vector<1x128xf32> to vector<8x128xf32>
    %410 = arith.mulf %405, %409 : vector<8x128xf32>
    %c0_122 = arith.constant 0 : index
    %c0_123 = arith.constant 0 : index
    %411 = vector.load %arg14[%c0_122, %c0_123] : memref<128x128xbf16, #tpu.memory_space<vmem>>, vector<128x128xbf16>
    %412 = arith.truncf %410 : vector<8x128xf32> to vector<8x128xbf16>
    %cst_124 = arith.constant dense<0.000000e+00> : vector<8x128xf32>
    %413 = tpu.matmul %412, %411, %cst_124 {dimension_numbers = #tpu.dot_dimension_numbers<[1], [0], [0], [1], [0, 0, 1, 1], [], []>} : vector<8x128xbf16>, vector<128x128xbf16>, vector<8x128xf32> -> vector<8x128xf32>
    %c0_125 = arith.constant 0 : index
    %c2816 = arith.constant 2816 : index
    %414 = vector.load %arg5[%c0_125, %c2816] : memref<1x2944xf32, #tpu.memory_space<vmem>>, vector<1x128xf32>
    %415 = vector.broadcast %414 : vector<1x128xf32> to vector<8x128xf32>
    %416 = arith.addf %413, %415 : vector<8x128xf32>
    %cst_126 = arith.constant 0.000000e+00 : f32
    %417 = vector.broadcast %cst_126 : f32 to vector<8x128xf32>
    %418 = arith.subf %417, %416 : vector<8x128xf32>
    %419 = math.exp %418 : vector<8x128xf32>
    %cst_127 = arith.constant 1.000000e+00 : f32
    %420 = vector.broadcast %cst_127 : f32 to vector<8x128xf32>
    %421 = arith.addf %420, %419 : vector<8x128xf32>
    %cst_128 = arith.constant 1.000000e+00 : f32
    %422 = vector.broadcast %cst_128 : f32 to vector<8x128xf32>
    %423 = arith.divf %422, %421 : vector<8x128xf32>
    %c0_129 = arith.constant 0 : index
    %c0_130 = arith.constant 0 : index
    %424 = vector.load %arg15[%c0_129, %c0_130] : memref<8x128xf32, #tpu.memory_space<vmem>>, vector<8x128xf32>
    tpu.vector_store %arg15[%c0_129, %c0_130], %423 {strides = array<i32>} : memref<8x128xf32, #tpu.memory_space<vmem>>, vector<8x128xf32>,
    return
  }
}

</mosaic_0001>

<bundles_post_ra>
// kernel: forward.1
= control target key start
LH: loop header
LB: loop body
LE: loop exit
PB: predicated region body
PF: predicated region fallthrough
CT: control target
= control target key end

     0   :  { %20 = vsyncpa [#allocation3], 0  ;;  %s6894_s21 = smov [#allocation2]   ;;  %s9885_s0 = inlined_call_operand.vmem [shape: f32[4], index: 0, kind: input, shape index: {}]   ;;  %s9886_s1 = inlined_call_operand.vmem [shape: s32[16,1], index: 1, kind: input, shape index: {}]   ;;  %s9887_s2 = inlined_call_operand.vmem [shape: f32[8,48], index: 2, kind: input, shape index: {}]   ;;  %s9888_s3 = inlined_call_operand.vmem [shape: f32[8,32], index: 3, kind: input, shape index: {}]   ;;  %s9889_s4 = inlined_call_operand.vmem [shape: bf16[16,16], index: 4, kind: input, shape index: {}]   ;;  %s9890_s5 = inlined_call_operand.vmem [shape: f32[1,2944], index: 5, kind: input, shape index: {}]   ;;  %s9891_s6 = inlined_call_operand.vmem [shape: bf16[48,128], index: 6, kind: input, shape index: {}]   ;;  %s9892_s7 = inlined_call_operand.vmem [shape: bf16[32,128], index: 7, kind: input, shape index: {}]   ;;  %s9893_s8 = inlined_call_operand.vmem [shape: bf16[128,512], index: 8, kind: input, shape index: {}]   ;;  %s9894_s9 = inlined_call_operand.vmem [shape: bf16[256,256], index: 9, kind: input, shape index: {}]   ;;  %s9895_s10 = inlined_call_operand.vmem [shape: bf16[256,1536], index: 10, kind: input, shape index: {}]   ;;  %s9896_s11 = inlined_call_operand.vmem [shape: bf16[768,384], index: 11, kind: input, shape index: {}]   ;;  %s9897_s12 = inlined_call_operand.vmem [shape: bf16[256,128], index: 12, kind: input, shape index: {}]   ;;  %s9898_s13 = inlined_call_operand.vmem [shape: bf16[128,128], index: 13, kind: input, shape index: {}]   ;;  %s9899_s14 = inlined_call_operand.vmem [shape: bf16[128,128], index: 14, kind: input, shape index: {}]   ;;  %s9900_s15 = inlined_call_operand.vmem [shape: f32[8,128], index: 15, kind: output, shape index: {}]  }
   0x1   :  { %s26_s20 = sshll.u32 %s9885_s0, 4  ;;  %s27_s20 = int_to_ptr.vmem [resolvable:$true] %s26_s20 }
   0x2   :  { %29 = dma.vmem_to_smem %s27_s20, 16, %s6894_s21, [#allocation3]  }
   0x3   :  { %6892 = dma.done.wait [#allocation3], 16  }
   0x4   :  { %6893 = vsyncadd [#allocation3], 4294967280 }
   0x5   :  { %62 = sfence }
   0x6   :  { %v6371_v0 = vld [vmem:[%s9891_s6 + $0x10] sm:$0xff]  ;;  %v6370_v1 = vld [vmem:[%s9891_s6 + $0x8] sm:$0xff]  ;;  %v6369_v2 = vld [vmem:[%s9891_s6] sm:$0xff]  ;;  %vm94_vm0 = vcmask 392192   ;;  %v6895_v5 = vmov 8.0   ;;  %vm416_vm8 = vcmask 261120  }
   0x7   :  { %103 = vmatpush.bf16.msra.mxu1 %v6371_v0  ;;  %v64_v3 = vld [vmem:[%s9887_s2] sm:$0xff]  ;;  %6820 = vrcp.f32 %v6895_v5  ;;  %v6387_v47 = vld [vmem:[%s9893_s8 + $0xec] sm:$0xf0]  ;;  %v4675_v50 = vld [vmem:[%s9893_s8 + $0xf0] sm:$0xf0]  ;;  %s6239_s16 = sld [smem:[#allocation2 + $0x1]] }
   0x8   :  { %v72_v4 = vpack.c.bf16 %v64_v3, %v64_v3  ;;  %v6815_v7 = vld [vmem:[%s9890_s5] ss:$0 sm:$0xff]  ;;  %v6386_v48 = vld [vmem:[%s9893_s8 + $0xe4] sm:$0xf]  ;;  %v6385_v53 = vld [vmem:[%s9893_s8 + $0xcc] sm:$0xf0] }
   0x9   :  { %v4673_v46 = vld [vmem:[%s9893_s8 + $0xe0] sm:$0xf]  ;;  %v4678_v51 = vor.u32 %v6386_v48, %v4675_v50  ;;  %v6384_v54 = vld [vmem:[%s9893_s8 + $0xc4] sm:$0xf]  ;;  %v4667_v56 = vld [vmem:[%s9893_s8 + $0xd0] sm:$0xf0] }
   0xa   :  { %v4674_v49 = vor.u32 %v6387_v47, %v4673_v46  ;;  %v4665_v52 = vld [vmem:[%s9893_s8 + $0xc0] sm:$0xf]  ;;  %v4670_v57 = vor.u32 %v6384_v54, %v4667_v56  ;;  %v6383_v59 = vld [vmem:[%s9893_s8 + $0xac] sm:$0xf0]  ;;  %v6382_v60 = vld [vmem:[%s9893_s8 + $0xa4] sm:$0xf] }
   0xb   :  { %104 = vmatpush.bf16.msra.mxu1 %v6370_v1  ;;  %289 = vmatpush.bf16.msra.mxu2 %v4678_v51  ;;  %v4666_v55 = vor.u32 %v6385_v53, %v4665_v52  ;;  %v4657_v58 = vld [vmem:[%s9893_s8 + $0xa0] sm:$0xf]  ;;  %v4659_v62 = vld [vmem:[%s9893_s8 + $0xb0] sm:$0xf0]  ;;  %v6381_v1 = vld [vmem:[%s9893_s8 + $0x8c] sm:$0xf0] }
   0xc   :  { %v4658_v61 = vor.u32 %v6383_v59, %v4657_v58  ;;  %v4662_v63 = vor.u32 %v6382_v60, %v4659_v62  ;;  %v4649_v0 = vld [vmem:[%s9893_s8 + $0x80] sm:$0xf]  ;;  %s6240_s17 = sld [smem:[#allocation2 + $0x2]] }
   0xd   :  { %v6821_v6 = vpop.eup %6820  ;;  %v4650_v3 = vor.u32 %v6381_v1, %v4649_v0  ;;  %v394_v52 = vld [vmem:[%s9888_s3] sm:$0xff] }
   0xe   :  { %v126_v8 = vmul.f32 8.0, %v6821_v6  ;;  %vm130_vm1 = vweird.f32 %v6821_v6  ;;  %v400_v53 = vpack.c.bf16 %v394_v52, %v394_v52  ;;  %v189_v54 = vld [vmem:[%s9890_s5 + $0x1] sm:$0x3] }
   0xf   :  { %105 = vmatpush.bf16.msra.mxu1 %v6369_v2  ;;  %290 = vmatpush.bf16.msra.mxu2 %v4670_v57  ;;  %v6380_v2 = vld [vmem:[%s9893_s8 + $0x84] sm:$0xf]  ;;  %v193_v58 = vperm.slane %v189_v54, 1 }
  0x10   :  { %v127_v11 = vsub.f32 1.0, %v126_v8  ;;  %v6378_v8 = vld [vmem:[%s9893_s8 + $0x64] sm:$0xf] }
  0x12   :  { %4614 = vmatmul.msk.bf16.vlgmr.msra.gmra.mxu1 %vm94_vm0, %v72_v4  ;;  %v128_v15 = vmul.f32 %v6821_v6, %v127_v11  ;;  %v4651_v4 = vld [vmem:[%s9893_s8 + $0x90] sm:$0xf0] }
  0x13   :  { %276 = vmatpush.bf16.msrb.mxu1 %v4674_v49  ;;  %291 = vmatpush.bf16.msra.mxu2 %v4662_v63  ;;  %v4654_v5 = vor.u32 %v6380_v2, %v4651_v4 }
  0x14   :  { %v129_v21 = vadd.f32 %v6821_v6, %v128_v15 }
  0x16   :  { %v6997_v26 = vsel %vm130_vm1, %v6821_v6, %v129_v21  ;;  %v4641_v6 = vld [vmem:[%s9893_s8 + $0x60] sm:$0xf] }
  0x17   :  { %277 = vmatpush.bf16.msrb.mxu1 %v4666_v55  ;;  %292 = vmatpush.bf16.msra.mxu2 %v4654_v5  ;;  %v192_v55 = vperm.slane %v189_v54, 0 }
  0x1b   :  { %278 = vmatpush.bf16.msrb.mxu1 %v4658_v61 }
  0x1f   :  { %279 = vmatpush.bf16.msrb.mxu1 %v4650_v3 }
  0x8f   :  { %v107_v9 = vpop.f32.mrf.mxu1 }
  0x90   :  { %v108_v10 = vadd.f32 %v6815_v7, %v107_v9  ;;  %v6379_v7 = vld [vmem:[%s9893_s8 + $0x6c] sm:$0xf0] }
  0x91   :  { %v4642_v9 = vor.u32 %v6379_v7, %v4641_v6 }
  0x92   :  { %v111_v12 = vmax.f32 %v108_v10, 0.0  ;;  %v4643_v10 = vld [vmem:[%s9893_s8 + $0x70] sm:$0xf0] }
  0x93   :  { %v4646_v11 = vor.u32 %v6378_v8, %v4643_v10  ;;  %280 = vmatpush.bf16.msrb.mxu1 %v4642_v9 }
  0x94   :  { %v112_v13 = vmul.f32 %v111_v12, %v111_v12  ;;  %v113_v14 = vrot.slane %v111_v12, 4 }
  0x95   :  { %293 = vmatpush.bf16.msra.mxu2 %v4646_v11 }
  0x96   :  { %v114_v16 = vadd.f32 %v113_v14, %v111_v12  ;;  %v119_v17 = vrot.slane %v112_v13, 4  ;;  %v6376_v14 = vld [vmem:[%s9893_s8 + $0x44] sm:$0xf] }
  0x97   :  { %v109_v18 = vpop.f32.mrf.mxu1 }
  0x98   :  { %v115_v19 = vrot.slane %v114_v16, 2  ;;  %v120_v20 = vadd.f32 %v119_v17, %v112_v13  ;;  %v6377_v13 = vld [vmem:[%s9893_s8 + $0x4c] sm:$0xf0]  ;;  %v4625_v18 = vld [vmem:[%s9893_s8 + $0x20] sm:$0xf] }
  0x9a   :  { %v116_v22 = vadd.f32 %v115_v19, %v114_v16  ;;  %v121_v23 = vrot.slane %v120_v20, 2  ;;  %v4635_v16 = vld [vmem:[%s9893_s8 + $0x50] sm:$0xf0]  ;;  %v6375_v19 = vld [vmem:[%s9893_s8 + $0x2c] sm:$0xf0] }
  0x9b   :  { %v4638_v17 = vor.u32 %v6376_v14, %v4635_v16  ;;  %v4626_v21 = vor.u32 %v6375_v19, %v4625_v18 }
  0x9c   :  { %v122_v24 = vadd.f32 %v121_v23, %v120_v20  ;;  %v117_v25 = vrot.slane %v116_v22, 1  ;;  %v6374_v20 = vld [vmem:[%s9893_s8 + $0x24] sm:$0xf]  ;;  %v4617_v23 = vld [vmem:[%s9893_s8] sm:$0xf] }
  0x9d   :  { %294 = vmatpush.bf16.msra.mxu2 %v4638_v17 }
  0x9e   :  { %v123_v27 = vrot.slane %v122_v24, 1  ;;  %v118_v28 = vadd.f32 %v117_v25, %v116_v22  ;;  %v4627_v22 = vld [vmem:[%s9893_s8 + $0x30] sm:$0xf0] }
  0x9f   :  { %v4630_v25 = vor.u32 %v6374_v20, %v4627_v22 }
  0xa0   :  { %v124_v29 = vadd.f32 %v123_v27, %v122_v24  ;;  %v132_v30 = vmul.f32 %v6997_v26, %v118_v28  ;;  %v6373_v24 = vld [vmem:[%s9893_s8 + $0xc] sm:$0xf0]  ;;  %v6372_v27 = vld [vmem:[%s9893_s8 + $0x4] sm:$0xf]  ;;  %v4619_v28 = vld [vmem:[%s9893_s8 + $0x10] sm:$0xf0] }
  0xa1   :  { %295 = vmatpush.bf16.msra.mxu2 %v4630_v25 }
  0xa2   :  { %v133_v31 = vmul.f32 %v6997_v26, %v124_v29  ;;  %v134_v32 = vmul.f32 %v132_v30, %v132_v30  ;;  %v137_v42 = vsub.f32 %v111_v12, %v132_v30  ;;  %v4633_v12 = vld [vmem:[%s9893_s8 + $0x40] sm:$0xf]  ;;  %v4618_v30 = vor.u32 %v6373_v24, %v4617_v23 }
  0xa3   :  { %v4634_v15 = vor.u32 %v6377_v13, %v4633_v12  ;;  %v6816_v23 = vld [vmem:[%s9890_s5 + $0x3] ss:$0 sm:$0xff] }
  0xa4   :  { %v135_v33 = vsub.f32 %v133_v31, %v134_v32  ;;  %v4622_v31 = vor.u32 %v6372_v27, %v4619_v28 }
  0xa5   :  { %281 = vmatpush.bf16.msrb.mxu1 %v4634_v15 }
  0xa6   :  { %v136_v34 = vmax.f32 %v135_v33, 0.0  ;;  %296 = vmatpush.bf16.msra.mxu2 %v4622_v31  ;;  %v6389_v33 = vld [vmem:[%s9892_s7 + $0x8] sm:$0xff] }
  0xa8   :  { %v138_v35 = vadd.f32 1e-05, %v136_v34 }
  0xa9   :  { %282 = vmatpush.bf16.msrb.mxu1 %v4626_v21 }
  0xaa   :  { %6822 = vrsqrt.f32 %v138_v35  ;;  %vm145_vm3 = vweird.f32 %v138_v35  ;;  %426 = vmatpush.bf16.msrb.mxu2 %v6389_v33 }
  0xad   :  { %283 = vmatpush.bf16.msrb.mxu1 %v4618_v30 }
  0xb0   :  { %v6823_v36 = vpop.eup %6822 }
  0xb1   :  { %v140_v37 = vmul.f32 %v6823_v36, %v138_v35  ;;  %vm146_vm2 = vweird.f32 %v6823_v36 }
  0xb2   :  { %vm147_vm4 = vmor %vm145_vm3, %vm146_vm2 }
  0xb3   :  { %v141_v38 = vmul.f32 %v6823_v36, %v140_v37  ;;  %v6388_v37 = vld [vmem:[%s9892_s7] sm:$0xff] }
  0xb4   :  { %427 = vmatpush.bf16.msrb.mxu2 %v6388_v37 }
  0xb5   :  { %v142_v39 = vmul.f32 0.5, %v141_v38 }
  0xb7   :  { %v143_v40 = vsub.f32 1.5, %v142_v39 }
  0xb9   :  { %v144_v41 = vmul.f32 %v6823_v36, %v143_v40 }
  0xbb   :  { %v148_v43 = vsel %vm147_vm4, %v6823_v36, %v144_v41 }
  0xbc   :  { %v7001_v44 = vmul.f32 %v148_v43, %v137_v42 }
  0xbe   :  { %151 = vadd.xlane.f32.xlu0 %v7001_v44  ;;  %v150_v45 = vmul.f32 %v7001_v44, %v7001_v44 }
  0xc6   :  { %153 = vadd.xlane.f32.xlu0 %v150_v45 }
 0x131   :  { %v152_v29 = vpop.xlane.xlu0 %151 }
 0x132   :  { %v155_v32 = vmul.f32 0.015625, %v152_v29 }
 0x134   :  { %v157_v35 = vmul.f32 %v155_v32, %v155_v32  ;;  %v160_v48 = vsub.f32 %v7001_v44, %v155_v32 }
 0x139   :  { %v154_v34 = vpop.xlane.xlu0 %153 }
 0x13a   :  { %v156_v36 = vmul.f32 0.015625, %v154_v34 }
 0x13c   :  { %v158_v38 = vsub.f32 %v156_v36, %v157_v35 }
 0x13e   :  { %v159_v39 = vmax.f32 %v158_v38, 0.0 }
 0x140   :  { %v161_v40 = vadd.f32 1e-05, %v159_v39 }
 0x142   :  { %6824 = vrsqrt.f32 %v161_v40  ;;  %vm168_vm6 = vweird.f32 %v161_v40 }
 0x148   :  { %v6825_v41 = vpop.eup %6824 }
 0x149   :  { %v163_v42 = vmul.f32 %v6825_v41, %v161_v40  ;;  %vm169_vm5 = vweird.f32 %v6825_v41 }
 0x14a   :  { %vm170_vm7 = vmor %vm168_vm6, %vm169_vm5 }
 0x14b   :  { %v164_v43 = vmul.f32 %v6825_v41, %v163_v42 }
 0x14d   :  { %v165_v45 = vmul.f32 0.5, %v164_v43 }
 0x14f   :  { %v166_v46 = vsub.f32 1.5, %v165_v45 }
 0x151   :  { %v167_v47 = vmul.f32 %v6825_v41, %v166_v46 }
 0x153   :  { %v171_v49 = vsel %vm170_vm7, %v6825_v41, %v167_v47 }
 0x154   :  { %v172_v50 = vmul.f32 %v171_v49, %v160_v48 }
 0x156   :  { %v190_v51 = vpack.c.bf16 %v172_v50, %v172_v50 }
 0x158   :  { %284 = vmatmul.bf16.vlgmr.msrb.gmra.mxu1 %v190_v51  ;;  %297 = vmatmul.bf16.vlgmr.msra.gmra.mxu2 %v190_v51 }
 0x168   :  { %4687 = vmatmul.msk.bf16.vlgmr.msrb.gmra.mxu2 %vm416_vm8, %v400_v53 }
 0x1d5   :  { %v285_v56 = vpop.f32.mrf.mxu1 }
 0x1d6   :  { %v286_v44 = vadd.f32 %v285_v56, %v192_v55 }
 0x1d8   :  { %v7115_v57 = vmax.f32 %v286_v44, 0.0 }
 0x1da   :  { %v304_v59 = vmul.f32 %v7115_v57, %v7115_v57  ;;  %v306_v60 = vrot.slane %v7115_v57, 4 }
 0x1db   :  { %v298_v61 = vpop.f32.mrf.mxu2 }
 0x1dc   :  { %v307_v62 = vadd.f32 %v306_v60, %v7115_v57  ;;  %v318_v63 = vrot.slane %v304_v59, 4  ;;  %v299_v0 = vadd.f32 %v298_v61, %v193_v58 }
 0x1dd   :  { %v287_v1 = vpop.f32.mrf.mxu1 }
 0x1de   :  { %v308_v2 = vrot.slane %v307_v62, 2  ;;  %v319_v3 = vadd.f32 %v318_v63, %v304_v59  ;;  %v7121_v4 = vmax.f32 %v299_v0, 0.0 }
 0x1e0   :  { %v309_v5 = vadd.f32 %v308_v2, %v307_v62  ;;  %v320_v6 = vrot.slane %v319_v3, 2  ;;  %v305_v7 = vmul.f32 %v7121_v4, %v7121_v4  ;;  %v312_v8 = vrot.slane %v7121_v4, 4 }
 0x1e2   :  { %v321_v9 = vadd.f32 %v320_v6, %v319_v3  ;;  %v313_v10 = vadd.f32 %v312_v8, %v7121_v4  ;;  %v324_v11 = vrot.slane %v305_v7, 4  ;;  %v310_v12 = vrot.slane %v309_v5, 1 }
 0x1e3   :  { %v300_v13 = vpop.f32.mrf.mxu2 }
 0x1e4   :  { %v322_v14 = vrot.slane %v321_v9, 1  ;;  %v314_v15 = vrot.slane %v313_v10, 2  ;;  %v325_v16 = vadd.f32 %v324_v11, %v305_v7  ;;  %v311_v17 = vadd.f32 %v310_v12, %v309_v5 }
 0x1e6   :  { %v323_v18 = vadd.f32 %v322_v14, %v321_v9  ;;  %v315_v19 = vadd.f32 %v314_v15, %v313_v10  ;;  %v326_v20 = vrot.slane %v325_v16, 2  ;;  %v7128_v21 = vmul.f32 %v311_v17, %v6997_v26 }
 0x1e8   :  { %v327_v22 = vadd.f32 %v326_v20, %v325_v16  ;;  %v316_v24 = vrot.slane %v315_v19, 1  ;;  %v332_v25 = vmul.f32 %v323_v18, %v6997_v26  ;;  %v334_v27 = vmul.f32 %v7128_v21, %v7128_v21 }
 0x1e9   :  { %v340_v12 = vsub.f32 %v7115_v57, %v7128_v21 }
 0x1ea   :  { %v328_v28 = vrot.slane %v327_v22, 1  ;;  %v317_v29 = vadd.f32 %v316_v24, %v315_v19  ;;  %v336_v30 = vsub.f32 %v332_v25, %v334_v27 }
 0x1eb   :  { %v429_v31 = vpop.f32.mrf.mxu2 }
 0x1ec   :  { %v329_v32 = vadd.f32 %v328_v28, %v327_v22  ;;  %v430_v33 = vadd.f32 %v6816_v23, %v429_v31  ;;  %v331_v34 = vmul.f32 %v317_v29, %v6997_v26  ;;  %v338_v35 = vmax.f32 %v336_v30, 0.0 }
 0x1ee   :  { %v7137_v36 = vmax.f32 %v430_v33, 0.0  ;;  %v333_v37 = vmul.f32 %v329_v32, %v6997_v26  ;;  %v335_v38 = vmul.f32 %v331_v34, %v331_v34  ;;  %v342_v39 = vadd.f32 1e-05, %v338_v35  ;;  %v4746_v32 = vld [vmem:[%s9893_s8 + $0xe8] sm:$0xf] }
 0x1ef   :  { %v341_v15 = vsub.f32 %v7121_v4, %v331_v34  ;;  %v6405_v33 = vld [vmem:[%s9893_s8 + $0xf4] sm:$0xf0]  ;;  %v6404_v34 = vld [vmem:[%s9893_s8 + $0xec] sm:$0xf] }
 0x1f0   :  { %v434_v40 = vmul.f32 %v7137_v36, %v7137_v36  ;;  %v435_v41 = vrot.slane %v7137_v36, 4  ;;  %v337_v42 = vsub.f32 %v333_v37, %v335_v38  ;;  %6826 = vrsqrt.f32 %v342_v39  ;;  %v4738_v38 = vld [vmem:[%s9893_s8 + $0xc8] sm:$0xf] }
 0x1f1   :  { %vm350_vm10 = vweird.f32 %v342_v39  ;;  %v4747_v35 = vor.u32 %v6405_v33, %v4746_v32 }
 0x1f2   :  { %v436_v43 = vadd.f32 %v435_v41, %v7137_v36  ;;  %v441_v45 = vrot.slane %v434_v40, 4  ;;  %v339_v46 = vmax.f32 %v337_v42, 0.0  ;;  %v4740_v42 = vld [vmem:[%s9893_s8 + $0xd8] sm:$0xf0] }
 0x1f3   :  { %v431_v47 = vpop.f32.mrf.mxu2  ;;  %591 = vmatpush.bf16.msra.mxu3 %v4747_v35 }
 0x1f4   :  { %v437_v48 = vrot.slane %v436_v43, 2  ;;  %v442_v49 = vadd.f32 %v441_v45, %v434_v40  ;;  %v343_v50 = vadd.f32 1e-05, %v339_v46  ;;  %v6402_v40 = vld [vmem:[%s9893_s8 + $0xcc] sm:$0xf] }
 0x1f5   :  { %v4730_v45 = vld [vmem:[%s9893_s8 + $0xa8] sm:$0xf]  ;;  %v6401_v46 = vld [vmem:[%s9893_s8 + $0xb4] sm:$0xf0]  ;;  %v6400_v47 = vld [vmem:[%s9893_s8 + $0xac] sm:$0xf] }
 0x1f6   :  { %v438_v51 = vadd.f32 %v437_v48, %v436_v43  ;;  %v443_v52 = vrot.slane %v442_v49, 2  ;;  %6828 = vrsqrt.f32 %v343_v50  ;;  %v6827_v53 = vpop.eup %6826  ;;  %vm360_vm13 = vweird.f32 %v343_v50 }
 0x1f7   :  { %v345_v55 = vmul.f32 %v6827_v53, %v342_v39  ;;  %vm351_vm9 = vweird.f32 %v6827_v53  ;;  %v6403_v39 = vld [vmem:[%s9893_s8 + $0xd4] sm:$0xf0]  ;;  %v4743_v43 = vor.u32 %v6402_v40, %v4740_v42  ;;  %v4731_v48 = vor.u32 %v6401_v46, %v4730_v45 }
 0x1f8   :  { %v444_v54 = vadd.f32 %v443_v52, %v442_v49  ;;  %v439_v56 = vrot.slane %v438_v51, 1  ;;  %vm352_vm11 = vmor %vm350_vm10, %vm351_vm9  ;;  %v4739_v41 = vor.u32 %v6403_v39, %v4738_v38  ;;  %v4732_v49 = vld [vmem:[%s9893_s8 + $0xb8] sm:$0xf0]  ;;  %v6399_v52 = vld [vmem:[%s9893_s8 + $0x94] sm:$0xf0] }
 0x1f9   :  { %v346_v58 = vmul.f32 %v6827_v53, %v345_v55  ;;  %v4724_v55 = vld [vmem:[%s9893_s8 + $0x98] sm:$0xf0]  ;;  %v504_v38 = vld [vmem:[%s9890_s5 + $0x4] sm:$0x3] }
 0x1fa   :  { %v445_v44 = vrot.slane %v444_v54, 1  ;;  %v440_v59 = vadd.f32 %v439_v56, %v438_v51  ;;  %592 = vmatpush.bf16.msra.mxu3 %v4739_v41  ;;  %v4722_v51 = vld [vmem:[%s9893_s8 + $0x88] sm:$0xf]  ;;  %v508_v39 = vperm.slane %v504_v38, 1 }
 0x1fb   :  { %v347_v62 = vmul.f32 0.5, %v346_v58  ;;  %v6397_v58 = vld [vmem:[%s9893_s8 + $0x74] sm:$0xf0] }
 0x1fc   :  { %v6829_v60 = vpop.eup %6828  ;;  %v446_v61 = vadd.f32 %v445_v44, %v444_v54  ;;  %v447_v63 = vmul.f32 %v440_v59, %v6997_v26  ;;  %v4723_v54 = vor.u32 %v6399_v52, %v4722_v51  ;;  %v4714_v44 = vld [vmem:[%s9893_s8 + $0x68] sm:$0xf]  ;;  %v6396_v59 = vld [vmem:[%s9893_s8 + $0x6c] sm:$0xf] }
 0x1fd   :  { %v355_v0 = vmul.f32 %v6829_v60, %v343_v50  ;;  %v348_v1 = vsub.f32 1.5, %v347_v62  ;;  %vm361_vm12 = vweird.f32 %v6829_v60  ;;  %v4735_v50 = vor.u32 %v6400_v47, %v4732_v49 }
 0x1fe   :  { %v448_v2 = vmul.f32 %v446_v61, %v6997_v26  ;;  %v449_v3 = vmul.f32 %v447_v63, %v447_v63  ;;  %vm362_vm14 = vmor %vm360_vm13, %vm361_vm12  ;;  %v452_v28 = vsub.f32 %v7137_v36, %v447_v63  ;;  %v4748_v36 = vld [vmem:[%s9893_s8 + $0xf8] sm:$0xf0]  ;;  %593 = vmatpush.bf16.msra.mxu3 %v4731_v48  ;;  %v4706_v63 = vld [vmem:[%s9893_s8 + $0x48] sm:$0xf] }
 0x1ff   :  { %v356_v5 = vmul.f32 %v6829_v60, %v355_v0  ;;  %v349_v6 = vmul.f32 %v6827_v53, %v348_v1  ;;  %v4751_v37 = vor.u32 %v6404_v34, %v4748_v36  ;;  %v4716_v61 = vld [vmem:[%s9893_s8 + $0x78] sm:$0xf0]  ;;  %v6395_v0 = vld [vmem:[%s9893_s8 + $0x54] sm:$0xf0]  ;;  %v6394_v1 = vld [vmem:[%s9893_s8 + $0x4c] sm:$0xf] }
 0x200   :  { %v450_v7 = vsub.f32 %v448_v2, %v449_v3  ;;  %v4719_v62 = vor.u32 %v6396_v59, %v4716_v61  ;;  %v4707_v2 = vor.u32 %v6395_v0, %v4706_v63  ;;  %v4708_v3 = vld [vmem:[%s9893_s8 + $0x58] sm:$0xf0] }
 0x201   :  { %v357_v8 = vmul.f32 0.5, %v356_v5  ;;  %v353_v10 = vsel %vm352_vm11, %v6827_v53, %v349_v6  ;;  %604 = vmatpush.bf16.msra.mxu0 %v4751_v37  ;;  %v6398_v53 = vld [vmem:[%s9893_s8 + $0x8c] sm:$0xf]  ;;  %v4698_v5 = vld [vmem:[%s9893_s8 + $0x28] sm:$0xf]  ;;  %v4711_v6 = vor.u32 %v6394_v1, %v4708_v3 }
 0x202   :  { %v451_v9 = vmax.f32 %v450_v7, 0.0  ;;  %v7149_v16 = vmul.f32 %v353_v10, %v340_v12  ;;  %v4727_v56 = vor.u32 %v6398_v53, %v4724_v55  ;;  %594 = vmatpush.bf16.msra.mxu3 %v4723_v54  ;;  %v6393_v7 = vld [vmem:[%s9893_s8 + $0x34] sm:$0xf0]  ;;  %v4690_v12 = vld [vmem:[%s9893_s8 + $0x8] sm:$0xf] }
 0x203   :  { %v358_v11 = vsub.f32 1.5, %v357_v8  ;;  %v6392_v8 = vld [vmem:[%s9893_s8 + $0x2c] sm:$0xf]  ;;  %v4699_v10 = vor.u32 %v6393_v7, %v4698_v5 }
 0x204   :  { %v453_v13 = vadd.f32 1e-05, %v451_v9  ;;  %v366_v20 = vmul.f32 %v7149_v16, %v7149_v16  ;;  %v4700_v9 = vld [vmem:[%s9893_s8 + $0x38] sm:$0xf0] }
 0x205   :  { %v359_v14 = vmul.f32 %v6829_v60, %v358_v11  ;;  %605 = vmatpush.bf16.msra.mxu0 %v4743_v43  ;;  %v4703_v11 = vor.u32 %v6392_v8, %v4700_v9  ;;  %v507_v43 = vperm.slane %v504_v38, 0 }
 0x206   :  { %6830 = vrsqrt.f32 %v453_v13  ;;  %vm460_vm0 = vweird.f32 %v453_v13 }
 0x207   :  { %v363_v17 = vsel %vm362_vm14, %v6829_v60, %v359_v14  ;;  %v4715_v60 = vor.u32 %v6397_v58, %v4714_v44  ;;  %v6390_v14 = vld [vmem:[%s9893_s8 + $0xc] sm:$0xf] }
 0x208   :  { %v7151_v18 = vmul.f32 %v363_v17, %v341_v15  ;;  %v4692_v15 = vld [vmem:[%s9893_s8 + $0x18] sm:$0xf0] }
 0x209   :  { %606 = vmatpush.bf16.msra.mxu0 %v4735_v50  ;;  %595 = vmatpush.bf16.msra.mxu3 %v4715_v60 }
 0x20a   :  { %v368_v19 = vadd.f32 %v7151_v18, %v7149_v16  ;;  %v367_v57 = vmul.f32 %v7151_v18, %v7151_v18 }
 0x20c   :  { %v6831_v21 = vpop.eup %6830  ;;  %369 = vadd.xlane.f32.xlu2 %v368_v19  ;;  %v371_v22 = vadd.f32 %v367_v57, %v366_v20  ;;  %v4695_v20 = vor.u32 %v6390_v14, %v4692_v15 }
 0x20d   :  { %v455_v4 = vmul.f32 %v6831_v21, %v453_v13  ;;  %vm461_vm15 = vweird.f32 %v6831_v21  ;;  %607 = vmatpush.bf16.msra.mxu0 %v4727_v56  ;;  %596 = vmatpush.bf16.msra.mxu3 %v4707_v2  ;;  %v6391_v13 = vld [vmem:[%s9893_s8 + $0x14] sm:$0xf0] }
 0x20e   :  { %372 = vadd.xlane.f32.xlu0 %v371_v22  ;;  %vm462_vm1 = vmor %vm460_vm0, %vm461_vm15  ;;  %v4691_v19 = vor.u32 %v6391_v13, %v4690_v12 }
 0x20f   :  { %v456_v23 = vmul.f32 %v6831_v21, %v455_v4 }
 0x211   :  { %v457_v24 = vmul.f32 0.5, %v456_v23  ;;  %608 = vmatpush.bf16.msra.mxu0 %v4719_v62  ;;  %597 = vmatpush.bf16.msra.mxu3 %v4699_v10 }
 0x213   :  { %v458_v25 = vsub.f32 1.5, %v457_v24 }
 0x215   :  { %v459_v27 = vmul.f32 %v6831_v21, %v458_v25  ;;  %609 = vmatpush.bf16.msra.mxu0 %v4711_v6  ;;  %598 = vmatpush.bf16.msra.mxu3 %v4691_v19 }
 0x217   :  { %v463_v29 = vsel %vm462_vm1, %v6831_v21, %v459_v27 }
 0x218   :  { %v7160_v30 = vmul.f32 %v463_v29, %v452_v28 }
 0x219   :  { %610 = vmatpush.bf16.msra.mxu0 %v4703_v11 }
 0x21a   :  { %466 = vadd.xlane.f32.xlu1 %v7160_v30  ;;  %v465_v31 = vmul.f32 %v7160_v30, %v7160_v30 }
 0x21d   :  { %611 = vmatpush.bf16.msra.mxu0 %v4695_v20 }
 0x222   :  { %468 = vadd.xlane.f32.xlu1 %v465_v31 }
 0x28d   :  { %v467_v17 = vpop.xlane.xlu1 %466 }
 0x28e   :  { %v470_v57 = vmul.f32 0.015625, %v467_v17 }
 0x290   :  { %v472_v22 = vmul.f32 %v470_v57, %v470_v57  ;;  %v475_v34 = vsub.f32 %v7160_v30, %v470_v57 }
 0x295   :  { %v469_v21 = vpop.xlane.xlu1 %468 }
 0x296   :  { %v471_v4 = vmul.f32 0.015625, %v469_v21 }
 0x298   :  { %v473_v23 = vsub.f32 %v471_v4, %v472_v22 }
 0x29a   :  { %v474_v24 = vmax.f32 %v473_v23, 0.0 }
 0x29c   :  { %v476_v25 = vadd.f32 1e-05, %v474_v24 }
 0x29e   :  { %6832 = vrsqrt.f32 %v476_v25  ;;  %vm483_vm3 = vweird.f32 %v476_v25 }
 0x2a4   :  { %v6833_v27 = vpop.eup %6832 }
 0x2a5   :  { %v478_v28 = vmul.f32 %v6833_v27, %v476_v25  ;;  %vm484_vm2 = vweird.f32 %v6833_v27 }
 0x2a6   :  { %vm485_vm4 = vmor %vm483_vm3, %vm484_vm2 }
 0x2a7   :  { %v479_v29 = vmul.f32 %v6833_v27, %v478_v28 }
 0x2a9   :  { %v480_v31 = vmul.f32 0.5, %v479_v29 }
 0x2ab   :  { %v481_v32 = vsub.f32 1.5, %v480_v31 }
 0x2ad   :  { %v482_v33 = vmul.f32 %v6833_v27, %v481_v32 }
 0x2af   :  { %v486_v35 = vsel %vm485_vm4, %v6833_v27, %v482_v33 }
 0x2b0   :  { %v487_v36 = vmul.f32 %v486_v35, %v475_v34 }
 0x2b2   :  { %v505_v37 = vpack.c.bf16 %v487_v36, %v487_v36 }
 0x2b4   :  { %599 = vmatmul.bf16.vlgmr.msra.gmra.mxu3 %v505_v37  ;;  %612 = vmatmul.bf16.vlgmr.msra.gmra.mxu0 %v505_v37 }
 0x331   :  { %v613_v40 = vpop.f32.mrf.mxu0 }
 0x332   :  { %v614_v41 = vadd.f32 %v613_v40, %v508_v39 }
 0x334   :  { %v7265_v42 = vmax.f32 %v614_v41, 0.0 }
 0x336   :  { %v620_v45 = vmul.f32 %v7265_v42, %v7265_v42  ;;  %v627_v30 = vrot.slane %v7265_v42, 4 }
 0x337   :  { %v600_v46 = vpop.f32.mrf.mxu3 }
 0x338   :  { %v628_v47 = vadd.f32 %v627_v30, %v7265_v42  ;;  %v639_v48 = vrot.slane %v620_v45, 4  ;;  %v601_v49 = vadd.f32 %v600_v46, %v507_v43 }
 0x339   :  { %v615_v50 = vpop.f32.mrf.mxu0 }
 0x33a   :  { %v629_v51 = vrot.slane %v628_v47, 2  ;;  %v640_v52 = vadd.f32 %v639_v48, %v620_v45  ;;  %v617_v53 = vmax.f32 %v601_v49, 0.0  ;;  %v370_v49 = vpop.xlane.xlu2 %369 }
 0x33b   :  { %v374_v50 = vmul.f32 0.00390625, %v370_v49 }
 0x33c   :  { %v630_v54 = vadd.f32 %v629_v51, %v628_v47  ;;  %v641_v55 = vrot.slane %v640_v52, 2  ;;  %v619_v56 = vmul.f32 %v617_v53, %v617_v53  ;;  %v621_v44 = vrot.slane %v617_v53, 4  ;;  %v373_v51 = vpop.xlane.xlu0 %372 }
 0x33e   :  { %v631_v58 = vrot.slane %v630_v54, 1  ;;  %v642_v59 = vadd.f32 %v641_v55, %v640_v52  ;;  %v622_v60 = vadd.f32 %v621_v44, %v617_v53  ;;  %v633_v61 = vrot.slane %v619_v56, 4 }
 0x33f   :  { %v602_v62 = vpop.f32.mrf.mxu3  ;;  %v376_v52 = vmul.f32 %v374_v50, %v374_v50 }
 0x340   :  { %v643_v63 = vrot.slane %v642_v59, 1  ;;  %v623_v0 = vrot.slane %v622_v60, 2  ;;  %v634_v1 = vadd.f32 %v633_v61, %v619_v56  ;;  %v632_v2 = vadd.f32 %v631_v58, %v630_v54 }
 0x341   :  { %v375_v54 = vmul.f32 0.00390625, %v373_v51 }
 0x342   :  { %v644_v3 = vadd.f32 %v643_v63, %v642_v59  ;;  %v624_v5 = vadd.f32 %v623_v0, %v622_v60  ;;  %v635_v6 = vrot.slane %v634_v1, 2  ;;  %v646_v7 = vmul.f32 %v632_v2, %v6997_v26 }
 0x343   :  { %v377_v55 = vsub.f32 %v375_v54, %v376_v52 }
 0x344   :  { %v625_v8 = vrot.slane %v624_v5, 1  ;;  %v636_v9 = vadd.f32 %v635_v6, %v634_v1  ;;  %v648_v10 = vmul.f32 %v644_v3, %v6997_v26  ;;  %v650_v11 = vmul.f32 %v646_v7, %v646_v7 }
 0x345   :  { %v656_v38 = vsub.f32 %v7265_v42, %v646_v7  ;;  %v378_v42 = vmax.f32 %v377_v55, 0.0  ;;  %v6896_v7 = vmov 16.0  }
 0x346   :  { %v637_v12 = vrot.slane %v636_v9, 1  ;;  %v626_v13 = vadd.f32 %v625_v8, %v624_v5  ;;  %v652_v14 = vsub.f32 %v648_v10, %v650_v11 }
 0x347   :  { %v381_v56 = vadd.f32 1e-05, %v378_v42 }
 0x348   :  { %v638_v15 = vadd.f32 %v637_v12, %v636_v9  ;;  %v645_v17 = vmul.f32 %v626_v13, %v6997_v26  ;;  %v654_v19 = vmax.f32 %v652_v14, 0.0  ;;  %v379_v14 = vsub.f32 %v7149_v16, %v374_v50 }
 0x349   :  { %vm388_vm12 = vweird.f32 %v381_v56 }
 0x34a   :  { %v647_v20 = vmul.f32 %v638_v15, %v6997_v26  ;;  %v649_v57 = vmul.f32 %v645_v17, %v645_v17  ;;  %v658_v21 = vadd.f32 1e-05, %v654_v19  ;;  %v655_v40 = vsub.f32 %v617_v53, %v645_v17 }
 0x34b   :  { %v380_v15 = vsub.f32 %v7151_v18, %v374_v50 }
 0x34c   :  { %v651_v22 = vsub.f32 %v647_v20, %v649_v57  ;;  %6834 = vrsqrt.f32 %v658_v21  ;;  %vm675_vm6 = vweird.f32 %v658_v21 }
 0x34e   :  { %v653_v4 = vmax.f32 %v651_v22, 0.0 }
 0x350   :  { %v657_v23 = vadd.f32 1e-05, %v653_v4 }
 0x352   :  { %v6835_v24 = vpop.eup %6834  ;;  %6836 = vrsqrt.f32 %v657_v23  ;;  %vm665_vm9 = vweird.f32 %v657_v23 }
 0x353   :  { %v670_v25 = vmul.f32 %v6835_v24, %v658_v21  ;;  %vm676_vm5 = vweird.f32 %v6835_v24  ;;  %6838 = vrsqrt.f32 %v381_v56 }
 0x354   :  { %vm677_vm7 = vmor %vm675_vm6, %vm676_vm5 }
 0x355   :  { %v671_v27 = vmul.f32 %v6835_v24, %v670_v25 }
 0x357   :  { %v672_v28 = vmul.f32 0.5, %v671_v27 }
 0x358   :  { %v6837_v29 = vpop.eup %6836 }
 0x359   :  { %v660_v31 = vmul.f32 %v6837_v29, %v657_v23  ;;  %v673_v32 = vsub.f32 1.5, %v672_v28  ;;  %vm666_vm8 = vweird.f32 %v6837_v29  ;;  %v6839_v53 = vpop.eup %6838 }
 0x35a   :  { %vm667_vm10 = vmor %vm665_vm9, %vm666_vm8  ;;  %v383_v59 = vmul.f32 %v6839_v53, %v381_v56  ;;  %vm389_vm11 = vweird.f32 %v6839_v53 }
 0x35b   :  { %v661_v33 = vmul.f32 %v6837_v29, %v660_v31  ;;  %v674_v34 = vmul.f32 %v6835_v24, %v673_v32  ;;  %vm390_vm13 = vmor %vm388_vm12, %vm389_vm11 }
 0x35c   :  { %v384_v0 = vmul.f32 %v6839_v53, %v383_v59 }
 0x35d   :  { %v662_v35 = vmul.f32 0.5, %v661_v33  ;;  %v678_v37 = vsel %vm677_vm7, %v6835_v24, %v674_v34 }
 0x35e   :  { %v680_v41 = vmul.f32 %v678_v37, %v656_v38  ;;  %v385_v3 = vmul.f32 0.5, %v384_v0 }
 0x35f   :  { %v663_v36 = vsub.f32 1.5, %v662_v35 }
 0x360   :  { %v682_v47 = vmul.f32 %v680_v41, %v680_v41  ;;  %v386_v5 = vsub.f32 1.5, %v385_v3 }
 0x361   :  { %v664_v39 = vmul.f32 %v6837_v29, %v663_v36 }
 0x362   :  { %v387_v8 = vmul.f32 %v6839_v53, %v386_v5 }
 0x363   :  { %v668_v43 = vsel %vm667_vm10, %v6837_v29, %v664_v39 }
 0x364   :  { %v679_v45 = vmul.f32 %v668_v43, %v655_v40  ;;  %v391_v11 = vsel %vm390_vm13, %v6839_v53, %v387_v8 }
 0x365   :  { %v7278_v19 = vmul.f32 %v391_v11, %v379_v14  ;;  %v7280_v20 = vmul.f32 %v391_v11, %v380_v15 }
 0x366   :  { %v683_v30 = vadd.f32 %v680_v41, %v679_v45  ;;  %v681_v46 = vmul.f32 %v679_v45, %v679_v45 }
 0x367   :  { %v709_v16 = vmul.f32 %v7278_v19, %v7278_v19  ;;  %v710_v18 = vmul.f32 %v7280_v20, %v7280_v20 }
 0x368   :  { %684 = vadd.xlane.f32.xlu2 %v683_v30  ;;  %v686_v48 = vadd.f32 %v682_v47, %v681_v46 }
 0x36a   :  { %687 = vadd.xlane.f32.xlu1 %v686_v48 }
 0x3db   :  { %v685_v44 = vpop.xlane.xlu2 %684 }
 0x3dc   :  { %v689_v58 = vmul.f32 0.00390625, %v685_v44 }
 0x3dd   :  { %v688_v60 = vpop.xlane.xlu1 %687 }
 0x3de   :  { %v690_v61 = vmul.f32 0.00390625, %v688_v60  ;;  %v691_v62 = vmul.f32 %v689_v58, %v689_v58  ;;  %v694_v22 = vsub.f32 %v679_v45, %v689_v58  ;;  %v695_v4 = vsub.f32 %v680_v41, %v689_v58 }
 0x3e0   :  { %v692_v63 = vsub.f32 %v690_v61, %v691_v62 }
 0x3e2   :  { %v693_v1 = vmax.f32 %v692_v63, 0.0 }
 0x3e4   :  { %v696_v2 = vadd.f32 1e-05, %v693_v1 }
 0x3e6   :  { %6840 = vrsqrt.f32 %v696_v2  ;;  %vm703_vm15 = vweird.f32 %v696_v2 }
 0x3e7   :  { %6842 = vrcp.f32 %v6896_v7 }
 0x3ec   :  { %v6841_v6 = vpop.eup %6840 }
 0x3ed   :  { %v698_v9 = vmul.f32 %v6841_v6, %v696_v2  ;;  %v6843_v13 = vpop.eup %6842  ;;  %vm704_vm14 = vweird.f32 %v6841_v6 }
 0x3ee   :  { %v742_v21 = vmul.f32 16.0, %v6843_v13  ;;  %vm705_vm0 = vmor %vm703_vm15, %vm704_vm14  ;;  %vm746_vm1 = vweird.f32 %v6843_v13  ;;  %vm1119_vm14 = vcmask 130048  }
 0x3ef   :  { %v699_v10 = vmul.f32 %v6841_v6, %v698_v9 }
 0x3f0   :  { %v743_v27 = vsub.f32 1.0, %v742_v21 }
 0x3f1   :  { %v700_v12 = vmul.f32 0.5, %v699_v10 }
 0x3f2   :  { %v744_v37 = vmul.f32 %v6843_v13, %v743_v27 }
 0x3f3   :  { %v701_v17 = vsub.f32 1.5, %v700_v12 }
 0x3f4   :  { %v745_v47 = vadd.f32 %v6843_v13, %v744_v37 }
 0x3f5   :  { %v702_v57 = vmul.f32 %v6841_v6, %v701_v17 }
 0x3f6   :  { %v7298_v56 = vsel %vm746_vm1, %v6843_v13, %v745_v47  ;;  %v6420_v47 = vld [vmem:[%s9894_s9 + $0x74] sm:$0xf] }
 0x3f7   :  { %v706_v23 = vsel %vm705_vm0, %v6841_v6, %v702_v57 }
 0x3f8   :  { %v7282_v24 = vmul.f32 %v706_v23, %v694_v22  ;;  %v7284_v25 = vmul.f32 %v706_v23, %v695_v4 }
 0x3fa   :  { %v711_v28 = vmul.f32 %v7282_v24, %v7282_v24  ;;  %v712_v29 = vmul.f32 %v7284_v25, %v7284_v25  ;;  %v713_v31 = vadd.f32 %v7282_v24, %v7278_v19  ;;  %v720_v32 = vadd.f32 %v7284_v25, %v7280_v20 }
 0x3fc   :  { %v714_v33 = vrot.slane %v713_v31, 4  ;;  %v721_v34 = vrot.slane %v720_v32, 4  ;;  %v727_v35 = vadd.f32 %v711_v28, %v709_v16  ;;  %v734_v36 = vadd.f32 %v712_v29, %v710_v18 }
 0x3fe   :  { %v728_v38 = vrot.slane %v727_v35, 4  ;;  %v735_v39 = vrot.slane %v734_v36, 4  ;;  %v715_v40 = vadd.f32 %v714_v33, %v713_v31  ;;  %v722_v41 = vadd.f32 %v721_v34, %v720_v32 }
 0x400   :  { %v729_v43 = vadd.f32 %v728_v38, %v727_v35  ;;  %v736_v45 = vadd.f32 %v735_v39, %v734_v36  ;;  %v716_v30 = vrot.slane %v715_v40, 2  ;;  %v723_v46 = vrot.slane %v722_v41, 2 }
 0x402   :  { %v730_v48 = vrot.slane %v729_v43, 2  ;;  %v737_v49 = vrot.slane %v736_v45, 2  ;;  %v717_v50 = vadd.f32 %v716_v30, %v715_v40  ;;  %v724_v51 = vadd.f32 %v723_v46, %v722_v41  ;;  %v4810_v41 = vld [vmem:[%s9894_s9 + $0x70] sm:$0xf]  ;;  %v6437_v46 = vld [vmem:[%s9894_s9 + $0xf4] sm:$0xf0] }
 0x404   :  { %v718_v52 = vrot.slane %v717_v50, 1  ;;  %v725_v54 = vrot.slane %v724_v51, 1  ;;  %v731_v55 = vadd.f32 %v730_v48, %v729_v43  ;;  %v738_v42 = vadd.f32 %v737_v49, %v736_v45  ;;  %v6421_v43 = vld [vmem:[%s9894_s9 + $0x74] sm:$0xf0]  ;;  %v4874_v45 = vld [vmem:[%s9894_s9 + $0xf0] sm:$0xf] }
 0x405   :  { %v4811_v30 = vor.u32 %v6421_v43, %v4810_v41  ;;  %v4812_v48 = vld [vmem:[%s9894_s9 + $0x78] sm:$0xf0]  ;;  %v4875_v49 = vor.u32 %v6437_v46, %v4874_v45  ;;  %v4770_v45 = vld [vmem:[%s9894_s9 + $0x20] sm:$0xf] }
 0x406   :  { %v719_v53 = vadd.f32 %v718_v52, %v717_v50  ;;  %v726_v44 = vadd.f32 %v725_v54, %v724_v51  ;;  %v732_v58 = vrot.slane %v731_v55, 1  ;;  %v739_v59 = vrot.slane %v738_v42, 1  ;;  %v6436_v51 = vld [vmem:[%s9894_s9 + $0xf4] sm:$0xf]  ;;  %v4876_v52 = vld [vmem:[%s9894_s9 + $0xf8] sm:$0xf0] }
 0x407   :  { %v4815_v50 = vor.u32 %v6420_v47, %v4812_v48  ;;  %1048 = vmatpush.bf16.msra.mxu1 %v4811_v30  ;;  %v4879_v54 = vor.u32 %v6436_v51, %v4876_v52  ;;  %1062 = vmatpush.bf16.msra.mxu2 %v4875_v49  ;;  %v4844_v41 = vld [vmem:[%s9894_s9 + $0xb8] sm:$0xf0]  ;;  %v6411_v30 = vld [vmem:[%s9894_s9 + $0x24] sm:$0xf0]  ;;  %v4834_v46 = vld [vmem:[%s9894_s9 + $0xa0] sm:$0xf] }
 0x408   :  { %v733_v60 = vadd.f32 %v732_v58, %v731_v55  ;;  %v740_v61 = vadd.f32 %v739_v59, %v738_v42  ;;  %v748_v62 = vmul.f32 %v7298_v56, %v719_v53  ;;  %v749_v63 = vmul.f32 %v7298_v56, %v726_v44  ;;  %v4802_v55 = vld [vmem:[%s9894_s9 + $0x60] sm:$0xf]  ;;  %v6419_v42 = vld [vmem:[%s9894_s9 + $0x64] sm:$0xf0]  ;;  %v6418_v59 = vld [vmem:[%s9894_s9 + $0x64] sm:$0xf] }
 0x409   :  { %1076 = vmatpush.bf16.msrb.mxu3 %v4815_v50  ;;  %v4866_v53 = vld [vmem:[%s9894_s9 + $0xe0] sm:$0xf]  ;;  %1090 = vmatpush.bf16.msrb.mxu0 %v4879_v54  ;;  %v4803_v44 = vor.u32 %v6419_v42, %v4802_v55  ;;  %v6435_v58 = vld [vmem:[%s9894_s9 + $0xe4] sm:$0xf0]  ;;  %v4771_v47 = vor.u32 %v6411_v30, %v4770_v45  ;;  %v6410_v49 = vld [vmem:[%s9894_s9 + $0x24] sm:$0xf] }
 0x40a   :  { %v750_v0 = vmul.f32 %v7298_v56, %v733_v60  ;;  %v751_v1 = vmul.f32 %v7298_v56, %v740_v61  ;;  %v752_v2 = vmul.f32 %v748_v62, %v748_v62  ;;  %v753_v3 = vmul.f32 %v749_v63, %v749_v63  ;;  %v4804_v60 = vld [vmem:[%s9894_s9 + $0x68] sm:$0xf0]  ;;  %v6427_v48 = vld [vmem:[%s9894_s9 + $0xa4] sm:$0xf0]  ;;  %v6426_v55 = vld [vmem:[%s9894_s9 + $0xa4] sm:$0xf] }
 0x40b   :  { %v760_v16 = vsub.f32 %v7282_v24, %v748_v62  ;;  %v758_v27 = vsub.f32 %v7278_v19, %v748_v62  ;;  %v761_v28 = vsub.f32 %v7284_v25, %v749_v63  ;;  %v759_v31 = vsub.f32 %v7280_v20, %v749_v63  ;;  %v6434_v63 = vld [vmem:[%s9894_s9 + $0xe4] sm:$0xf]  ;;  %1049 = vmatpush.bf16.msra.mxu1 %v4803_v44  ;;  %v4772_v50 = vld [vmem:[%s9894_s9 + $0x28] sm:$0xf0] }
 0x40c   :  { %v754_v5 = vsub.f32 %v750_v0, %v752_v2  ;;  %v755_v6 = vsub.f32 %v751_v1, %v753_v3  ;;  %v4867_v61 = vor.u32 %v6435_v58, %v4866_v53  ;;  %v4807_v62 = vor.u32 %v6418_v59, %v4804_v60  ;;  %v4868_v0 = vld [vmem:[%s9894_s9 + $0xe8] sm:$0xf0]  ;;  %v4794_v2 = vld [vmem:[%s9894_s9 + $0x50] sm:$0xf]  ;;  %v6417_v3 = vld [vmem:[%s9894_s9 + $0x54] sm:$0xf0] }
 0x40d   :  { %v4871_v1 = vor.u32 %v6434_v63, %v4868_v0  ;;  %v4835_v52 = vor.u32 %v6427_v48, %v4834_v46  ;;  %v4775_v54 = vor.u32 %v6410_v49, %v4772_v50  ;;  %v4836_v42 = vld [vmem:[%s9894_s9 + $0xa8] sm:$0xf0]  ;;  %v4762_v60 = vld [vmem:[%s9894_s9 + $0x10] sm:$0xf]  ;;  %v6425_v63 = vld [vmem:[%s9894_s9 + $0x94] sm:$0xf0] }
 0x40e   :  { %v756_v7 = vmax.f32 %v754_v5, 0.0  ;;  %v757_v8 = vmax.f32 %v755_v6, 0.0  ;;  %1063 = vmatpush.bf16.msra.mxu2 %v4867_v61  ;;  %1077 = vmatpush.bf16.msrb.mxu3 %v4807_v62  ;;  %v4858_v5 = vld [vmem:[%s9894_s9 + $0xd0] sm:$0xf]  ;;  %v4795_v6 = vor.u32 %v6417_v3, %v4794_v2  ;;  %v4839_v58 = vor.u32 %v6426_v55, %v4836_v42  ;;  %v6409_v61 = vld [vmem:[%s9894_s9 + $0x14] sm:$0xf0] }
 0x40f   :  { %1091 = vmatpush.bf16.msrb.mxu0 %v4871_v1  ;;  %v4826_v62 = vld [vmem:[%s9894_s9 + $0x90] sm:$0xf]  ;;  %v6408_v0 = vld [vmem:[%s9894_s9 + $0x14] sm:$0xf]  ;;  %v4764_v1 = vld [vmem:[%s9894_s9 + $0x18] sm:$0xf0] }
 0x410   :  { %v762_v9 = vadd.f32 1e-05, %v756_v7  ;;  %v763_v10 = vadd.f32 1e-05, %v757_v8  ;;  %v6433_v7 = vld [vmem:[%s9894_s9 + $0xd4] sm:$0xf0]  ;;  %1050 = vmatpush.bf16.msra.mxu1 %v4795_v6  ;;  %v4763_v6 = vor.u32 %v6409_v61, %v4762_v60 }
 0x411   :  { %v6416_v8 = vld [vmem:[%s9894_s9 + $0x54] sm:$0xf] }
 0x412   :  { %6844 = vrsqrt.f32 %v762_v9  ;;  %vm770_vm4 = vweird.f32 %v762_v9  ;;  %vm780_vm6 = vweird.f32 %v763_v10 }
 0x413   :  { %6846 = vrsqrt.f32 %v763_v10 }
 0x418   :  { %v6845_v11 = vpop.eup %6844 }
 0x419   :  { %v6847_v12 = vpop.eup %6846  ;;  %v765_v13 = vmul.f32 %v6845_v11, %v762_v9  ;;  %vm771_vm2 = vweird.f32 %v6845_v11  ;;  %v4796_v9 = vld [vmem:[%s9894_s9 + $0x58] sm:$0xf0] }
 0x41a   :  { %v775_v14 = vmul.f32 %v6847_v12, %v763_v10  ;;  %vm781_vm3 = vweird.f32 %v6847_v12  ;;  %vm772_vm5 = vmor %vm770_vm4, %vm771_vm2  ;;  %v4859_v10 = vor.u32 %v6433_v7, %v4858_v5  ;;  %v6424_v7 = vld [vmem:[%s9894_s9 + $0x94] sm:$0xf] }
 0x41b   :  { %v766_v15 = vmul.f32 %v6845_v11, %v765_v13  ;;  %vm782_vm7 = vmor %vm780_vm6, %vm781_vm3  ;;  %v4860_v13 = vld [vmem:[%s9894_s9 + $0xd8] sm:$0xf0] }
 0x41c   :  { %v776_v17 = vmul.f32 %v6847_v12, %v775_v14  ;;  %1064 = vmatpush.bf16.msra.mxu2 %v4859_v10  ;;  %v4767_v10 = vor.u32 %v6408_v0, %v4764_v1 }
 0x41d   :  { %v767_v57 = vmul.f32 0.5, %v766_v15  ;;  %v4786_v15 = vld [vmem:[%s9894_s9 + $0x40] sm:$0xf] }
 0x41e   :  { %v777_v21 = vmul.f32 0.5, %v776_v17  ;;  %v6415_v17 = vld [vmem:[%s9894_s9 + $0x44] sm:$0xf0] }
 0x41f   :  { %v768_v22 = vsub.f32 1.5, %v767_v57  ;;  %v4850_v57 = vld [vmem:[%s9894_s9 + $0xc0] sm:$0xf] }
 0x420   :  { %v778_v4 = vsub.f32 1.5, %v777_v21  ;;  %v4787_v21 = vor.u32 %v6415_v17, %v4786_v15 }
 0x421   :  { %v769_v23 = vmul.f32 %v6845_v11, %v768_v22  ;;  %v6431_v22 = vld [vmem:[%s9894_s9 + $0xc4] sm:$0xf0] }
 0x422   :  { %v779_v18 = vmul.f32 %v6847_v12, %v778_v4  ;;  %v6414_v4 = vld [vmem:[%s9894_s9 + $0x44] sm:$0xf]  ;;  %1051 = vmatpush.bf16.msra.mxu1 %v4787_v21 }
 0x423   :  { %v773_v29 = vsel %vm772_vm5, %v6845_v11, %v769_v23  ;;  %v4799_v11 = vor.u32 %v6416_v8, %v4796_v9  ;;  %v4788_v23 = vld [vmem:[%s9894_s9 + $0x48] sm:$0xf0]  ;;  %v4828_v8 = vld [vmem:[%s9894_s9 + $0x98] sm:$0xf0]  ;;  %v4827_v9 = vor.u32 %v6425_v63, %v4826_v62  ;;  %v6406_v21 = vld [vmem:[%s9894_s9 + $0x4] sm:$0xf] }
 0x424   :  { %v783_v32 = vsel %vm782_vm7, %v6847_v12, %v779_v18  ;;  %v7308_v33 = vmul.f32 %v773_v29, %v760_v16  ;;  %v7310_v34 = vmul.f32 %v773_v29, %v758_v27  ;;  %v6432_v12 = vld [vmem:[%s9894_s9 + $0xd4] sm:$0xf]  ;;  %v4851_v16 = vor.u32 %v6431_v22, %v4850_v57  ;;  %v6430_v27 = vld [vmem:[%s9894_s9 + $0xc4] sm:$0xf]  ;;  %v6423_v57 = vld [vmem:[%s9894_s9 + $0x84] sm:$0xf0] }
 0x425   :  { %v7312_v35 = vmul.f32 %v783_v32, %v761_v28  ;;  %v7314_v36 = vmul.f32 %v783_v32, %v759_v31  ;;  %v4863_v14 = vor.u32 %v6432_v12, %v4860_v13  ;;  %1078 = vmatpush.bf16.msrb.mxu3 %v4799_v11  ;;  %v4791_v18 = vor.u32 %v6414_v4, %v4788_v23  ;;  %v4852_v28 = vld [vmem:[%s9894_s9 + $0xc8] sm:$0xf0]  ;;  %v4778_v31 = vld [vmem:[%s9894_s9 + $0x30] sm:$0xf]  ;;  %v6413_v32 = vld [vmem:[%s9894_s9 + $0x34] sm:$0xf0] }
 0x426   :  { %v788_v24 = vmul.f32 %v7310_v34, %v7310_v34  ;;  %v790_v38 = vmul.f32 %v7308_v33, %v7308_v33  ;;  %v4855_v29 = vor.u32 %v6430_v27, %v4852_v28  ;;  %1065 = vmatpush.bf16.msra.mxu2 %v4851_v16  ;;  %v4831_v11 = vor.u32 %v6424_v7, %v4828_v8  ;;  %v4754_v12 = vld [vmem:[%s9894_s9] sm:$0xf]  ;;  %v6407_v13 = vld [vmem:[%s9894_s9 + $0x4] sm:$0xf0]  ;;  %v4756_v22 = vld [vmem:[%s9894_s9 + $0x8] sm:$0xf0] }
 0x427   :  { %v795_v19 = vadd.f32 %v7312_v35, %v7308_v33  ;;  %v792_v25 = vadd.f32 %v7314_v36, %v7310_v34  ;;  %v789_v20 = vmul.f32 %v7314_v36, %v7314_v36  ;;  %v791_v39 = vmul.f32 %v7312_v35, %v7312_v35  ;;  %1092 = vmatpush.bf16.msrb.mxu0 %v4863_v14  ;;  %v4818_v14 = vld [vmem:[%s9894_s9 + $0x80] sm:$0xf]  ;;  %v6422_v16 = vld [vmem:[%s9894_s9 + $0x84] sm:$0xf] }
 0x428   :  { %v4755_v17 = vor.u32 %v6407_v13, %v4754_v12  ;;  %v4819_v4 = vor.u32 %v6423_v57, %v4818_v14  ;;  %v4759_v23 = vor.u32 %v6406_v21, %v4756_v22 }
 0x429   :  { %796 = vadd.xlane.f32.xlu0 %v795_v19  ;;  %793 = vadd.xlane.f32.xlu2 %v792_v25  ;;  %v798_v37 = vadd.f32 %v789_v20, %v788_v24  ;;  %v801_v40 = vadd.f32 %v791_v39, %v790_v38  ;;  %v4842_v24 = vld [vmem:[%s9894_s9 + $0xb0] sm:$0xf]  ;;  %v4779_v19 = vor.u32 %v6413_v32, %v4778_v31  ;;  %v6429_v25 = vld [vmem:[%s9894_s9 + $0xb4] sm:$0xf0]  ;;  %v6412_v20 = vld [vmem:[%s9894_s9 + $0x34] sm:$0xf] }
 0x42a   :  { %1079 = vmatpush.bf16.msrb.mxu3 %v4791_v18  ;;  %v4843_v38 = vor.u32 %v6429_v25, %v4842_v24  ;;  %v4820_v18 = vld [vmem:[%s9894_s9 + $0x88] sm:$0xf0] }
 0x42b   :  { %799 = vadd.xlane.f32.xlu1 %v798_v37  ;;  %1093 = vmatpush.bf16.msrb.mxu0 %v4855_v29  ;;  %v4780_v37 = vld [vmem:[%s9894_s9 + $0x38] sm:$0xf0]  ;;  %v4823_v29 = vor.u32 %v6422_v16, %v4820_v18 }
 0x42c   :  { %v4783_v39 = vor.u32 %v6412_v20, %v4780_v37  ;;  %1052 = vmatpush.bf16.msra.mxu1 %v4779_v19  ;;  %1066 = vmatpush.bf16.msra.mxu2 %v4843_v38 }
 0x42e   :  { %1080 = vmatpush.bf16.msrb.mxu3 %v4783_v39 }
 0x430   :  { %1053 = vmatpush.bf16.msra.mxu1 %v4771_v47  ;;  %1067 = vmatpush.bf16.msra.mxu2 %v4835_v52 }
 0x431   :  { %802 = vadd.xlane.f32.xlu2 %v801_v40  ;;  %v6428_v40 = vld [vmem:[%s9894_s9 + $0xb4] sm:$0xf] }
 0x432   :  { %v4847_v43 = vor.u32 %v6428_v40, %v4844_v41  ;;  %1081 = vmatpush.bf16.msrb.mxu3 %v4775_v54 }
 0x434   :  { %1094 = vmatpush.bf16.msrb.mxu0 %v4847_v43  ;;  %1054 = vmatpush.bf16.msra.mxu1 %v4763_v6 }
 0x435   :  { %1068 = vmatpush.bf16.msra.mxu2 %v4827_v9 }
 0x436   :  { %1082 = vmatpush.bf16.msrb.mxu3 %v4767_v10 }
 0x438   :  { %1095 = vmatpush.bf16.msrb.mxu0 %v4839_v58  ;;  %1055 = vmatpush.bf16.msra.mxu1 %v4755_v17  ;;  %v1108_v17 = vld [vmem:[%s9890_s5 + $0x6] sm:$0x3] }
 0x439   :  { %1069 = vmatpush.bf16.msra.mxu2 %v4819_v4  ;;  %v1110_v57 = vperm.slane %v1108_v17, 0 }
 0x43a   :  { %1083 = vmatpush.bf16.msrb.mxu3 %v4759_v23  ;;  %v1111_v23 = vperm.slane %v1108_v17, 1 }
 0x43c   :  { %1096 = vmatpush.bf16.msrb.mxu0 %v4831_v11 }
 0x440   :  { %1097 = vmatpush.bf16.msrb.mxu0 %v4823_v29 }
 0x49c   :  { %v794_v51 = vpop.xlane.xlu2 %793  ;;  %v797_v53 = vpop.xlane.xlu0 %796 }
 0x49d   :  { %v7472_v44 = vmul.f32 0.00390625, %v794_v51  ;;  %v7492_v2 = vmul.f32 0.00390625, %v797_v53 }
 0x49e   :  { %v800_v59 = vpop.xlane.xlu1 %799 }
 0x49f   :  { %v808_v3 = vmul.f32 %v7472_v44, %v7472_v44  ;;  %v806_v5 = vmul.f32 0.00390625, %v800_v59  ;;  %v809_v31 = vmul.f32 %v7492_v2, %v7492_v2  ;;  %v814_v48 = vsub.f32 %v7310_v34, %v7472_v44 }
 0x4a0   :  { %v815_v49 = vsub.f32 %v7314_v36, %v7472_v44  ;;  %v816_v42 = vsub.f32 %v7308_v33, %v7492_v2  ;;  %v817_v53 = vsub.f32 %v7312_v35, %v7492_v2 }
 0x4a1   :  { %v810_v15 = vsub.f32 %v806_v5, %v808_v3 }
 0x4a3   :  { %v812_v27 = vmax.f32 %v810_v15, 0.0  ;;  %v6438_v15 = vld [vmem:[%s9889_s4] sm:$0xff] }
 0x4a4   :  { %v803_v28 = vpop.xlane.xlu2 %802 }
 0x4a5   :  { %v807_v32 = vmul.f32 0.00390625, %v803_v28  ;;  %v818_v24 = vadd.f32 1e-05, %v812_v27 }
 0x4a7   :  { %v811_v19 = vsub.f32 %v807_v32, %v809_v31  ;;  %6848 = vrsqrt.f32 %v818_v24  ;;  %vm826_vm9 = vweird.f32 %v818_v24 }
 0x4a9   :  { %v813_v25 = vmax.f32 %v811_v19, 0.0 }
 0x4ab   :  { %v819_v20 = vadd.f32 1e-05, %v813_v25 }
 0x4ad   :  { %6850 = vrsqrt.f32 %v819_v20  ;;  %v6849_v37 = vpop.eup %6848  ;;  %vm836_vm12 = vweird.f32 %v819_v20 }
 0x4ae   :  { %v821_v38 = vmul.f32 %v6849_v37, %v818_v24  ;;  %vm827_vm8 = vweird.f32 %v6849_v37 }
 0x4af   :  { %vm828_vm10 = vmor %vm826_vm9, %vm827_vm8 }
 0x4b0   :  { %v822_v39 = vmul.f32 %v6849_v37, %v821_v38 }
 0x4b2   :  { %v823_v41 = vmul.f32 0.5, %v822_v39 }
 0x4b3   :  { %v6851_v40 = vpop.eup %6850 }
 0x4b4   :  { %v831_v43 = vmul.f32 %v6851_v40, %v819_v20  ;;  %v824_v45 = vsub.f32 1.5, %v823_v41  ;;  %vm837_vm11 = vweird.f32 %v6851_v40 }
 0x4b5   :  { %vm838_vm13 = vmor %vm836_vm12, %vm837_vm11 }
 0x4b6   :  { %v832_v30 = vmul.f32 %v6851_v40, %v831_v43  ;;  %v825_v46 = vmul.f32 %v6849_v37, %v824_v45 }
 0x4b8   :  { %v833_v47 = vmul.f32 0.5, %v832_v30  ;;  %v829_v50 = vsel %vm828_vm10, %v6849_v37, %v825_v46 }
 0x4b9   :  { %v840_v52 = vmul.f32 %v829_v50, %v814_v48  ;;  %v841_v54 = vmul.f32 %v829_v50, %v815_v49 }
 0x4ba   :  { %v834_v51 = vsub.f32 1.5, %v833_v47 }
 0x4bb   :  { %v844_v60 = vpack.c.bf16 %v841_v54, %v840_v52 }
 0x4bc   :  { %v835_v55 = vmul.f32 %v6851_v40, %v834_v51 }
 0x4bd   :  { %v880_v36 = vunpack.c.l.b16 %v844_v60  ;;  %v881_v62 = vunpack.c.h.b16 %v844_v60 }
 0x4be   :  { %v839_v58 = vsel %vm838_vm13, %v6851_v40, %v835_v55 }
 0x4bf   :  { %v842_v59 = vmul.f32 %v839_v58, %v816_v42  ;;  %v843_v34 = vmul.f32 %v839_v58, %v817_v53 }
 0x4c1   :  { %v845_v61 = vpack.c.bf16 %v843_v34, %v842_v59 }
 0x4c3   :  { %v882_v44 = vunpack.c.l.b16 %v845_v61  ;;  %v883_v63 = vunpack.c.h.b16 %v845_v61 }
 0x4c5   :  { %v884_v0 = vpack.c.b16 %v882_v44, %v880_v36  ;;  %v885_v1 = vpack.c.b16 %v883_v63, %v881_v62 }
 0x4c7   :  { %1056 = vmatmul.bf16.vlgmr.msra.gmra.mxu1 %v884_v0  ;;  %1070 = vmatmul.bf16.vlgmr.msra.gmra.mxu2 %v885_v1 }
 0x4c8   :  { %1084 = vmatmul.bf16.vlgmr.msrb.gmra.mxu3 %v884_v0  ;;  %1098 = vmatmul.bf16.vlgmr.msrb.gmra.mxu0 %v885_v1 }
 0x4c9   :  { %1340 = vmatpush.bf16.msra.mxu3 %v884_v0  ;;  %1354 = vmatpush.bf16.msra.mxu0 %v885_v1 }
 0x544   :  { %v1057_v33 = vpop.f32.mrf.mxu1 }
 0x545   :  { %v1099_v35 = vpop.f32.mrf.mxu0 }
 0x54a   :  { %v1071_v2 = vpop.f32.mrf.mxu2 }
 0x54b   :  { %v1085_v3 = vpop.f32.mrf.mxu3  ;;  %v1072_v7 = vadd.f32 %v1071_v2, %v1057_v33 }
 0x54c   :  { %v1059_v5 = vpop.f32.mrf.mxu1  ;;  %v1100_v11 = vadd.f32 %v1099_v35, %v1085_v3 }
 0x54d   :  { %v1101_v8 = vpop.f32.mrf.mxu0 }
 0x552   :  { %v1073_v6 = vpop.f32.mrf.mxu2 }
 0x553   :  { %v1074_v9 = vadd.f32 %v1073_v6, %v1059_v5  ;;  %v1087_v10 = vpop.f32.mrf.mxu3 }
 0x554   :  { %v1102_v12 = vadd.f32 %v1101_v8, %v1087_v10 }
 0x555   :  { %v1106_v13 = vpack.c.bf16 %v1074_v9, %v1072_v7 }
 0x556   :  { %v1107_v14 = vpack.c.bf16 %v1102_v12, %v1100_v11 }
 0x557   :  { %1130 = vmatpush.bf16.msrb.mxu1 %v1106_v13 }
 0x558   :  { %1144 = vmatpush.bf16.msrb.mxu2 %v1107_v14 }
 0x55a   :  { %4884 = vmatmul.msk.bf16.vlgmr.msrb.gmra.mxu1 %vm1119_vm14, %v6438_v15 }
 0x55b   :  { %4885 = vmatmul.msk.bf16.vlgmr.msrb.gmra.mxu2 %vm1119_vm14, %v6438_v15 }
 0x5d7   :  { %v1132_v21 = vpop.f32.mrf.mxu1 }
 0x5d8   :  { %v1133_v22 = vadd.f32 %v1132_v21, %v1110_v57 }
 0x5da   :  { %v1155_v4 = vmin.f32 %v1133_v22, 0.0  ;;  %vm1151_vm15 = vcmp.gt.f32.partialorder %v1133_v22, 0.0 }
 0x5dc   :  { %v1159_v16 = vmul.f32 1.442695, %v1155_v4 }
 0x5de   :  { %v1146_v18 = vpop.f32.mrf.mxu2  ;;  %6852 = vpow2.f32 %v1159_v16 }
 0x5df   :  { %v1147_v27 = vadd.f32 %v1146_v18, %v1111_v23  ;;  %v1134_v28 = vpop.f32.mrf.mxu1 }
 0x5e0   :  { %v1135_v29 = vadd.f32 %v1134_v28, %v1110_v57 }
 0x5e1   :  { %v1156_v31 = vmin.f32 %v1147_v27, 0.0  ;;  %vm1152_vm1 = vcmp.gt.f32.partialorder %v1147_v27, 0.0 }
 0x5e2   :  { %v1157_v32 = vmin.f32 %v1135_v29, 0.0  ;;  %vm1153_vm0 = vcmp.gt.f32.partialorder %v1135_v29, 0.0 }
 0x5e3   :  { %v1161_v24 = vmul.f32 1.442695, %v1156_v31 }
 0x5e4   :  { %v1163_v19 = vmul.f32 1.442695, %v1157_v32  ;;  %v6853_v25 = vpop.eup %6852 }
 0x5e5   :  { %v4886_v38 = vadd.f32 -1.0, %v6853_v25 }
 0x5e6   :  { %6854 = vpow2.f32 %v1163_v19  ;;  %v1148_v20 = vpop.f32.mrf.mxu2  ;;  %v6897_v19 = vmov 0  }
 0x5e7   :  { %6856 = vpow2.f32 %v1161_v24  ;;  %v1149_v37 = vadd.f32 %v1148_v20, %v1111_v23  ;;  %v7544_v45 = vsel %vm1151_vm15, %v1133_v22, %v4886_v38  ;;  %6812 = vset.pattern.permute.xlu1 %v6897_v19  ;;  %6813 = vset.pattern.permute.xlu2 %v6897_v19 }
 0x5e8   :  { %v1175_v47 = vmul.f32 %v7544_v45, %v7544_v45  ;;  %6814 = vset.pattern.permute.xlu0 %v6897_v19 }
 0x5e9   :  { %v1158_v39 = vmin.f32 %v1149_v37, 0.0  ;;  %vm1154_vm2 = vcmp.gt.f32.partialorder %v1149_v37, 0.0 }
 0x5eb   :  { %v1165_v40 = vmul.f32 1.442695, %v1158_v39 }
 0x5ec   :  { %v6855_v41 = vpop.eup %6854 }
 0x5ed   :  { %v6857_v43 = vpop.eup %6856  ;;  %v4888_v30 = vadd.f32 -1.0, %v6855_v41  ;;  %6858 = vpow2.f32 %v1165_v40 }
 0x5ee   :  { %v4887_v48 = vadd.f32 -1.0, %v6857_v43 }
 0x5ef   :  { %v7546_v46 = vsel %vm1153_vm0, %v1135_v29, %v4888_v30 }
 0x5f0   :  { %v1177_v49 = vmul.f32 %v7546_v46, %v7546_v46  ;;  %v1179_v50 = vadd.f32 %v7546_v46, %v7544_v45  ;;  %v7554_v55 = vsel %vm1152_vm1, %v1147_v27, %v4887_v48 }
 0x5f1   :  { %v1176_v61 = vmul.f32 %v7554_v55, %v7554_v55 }
 0x5f2   :  { %v1180_v51 = vrot.slane %v1179_v50, 4  ;;  %v1193_v52 = vadd.f32 %v1177_v49, %v1175_v47 }
 0x5f3   :  { %v6859_v54 = vpop.eup %6858 }
 0x5f4   :  { %v1181_v42 = vadd.f32 %v1180_v51, %v1179_v50  ;;  %v1194_v53 = vrot.slane %v1193_v52, 4  ;;  %v4889_v58 = vadd.f32 -1.0, %v6859_v54 }
 0x5f6   :  { %v1182_v59 = vrot.slane %v1181_v42, 2  ;;  %v1195_v34 = vadd.f32 %v1194_v53, %v1193_v52  ;;  %v7556_v60 = vsel %vm1154_vm2, %v1149_v37, %v4889_v58 }
 0x5f7   :  { %v1178_v36 = vmul.f32 %v7556_v60, %v7556_v60  ;;  %v1186_v44 = vadd.f32 %v7556_v60, %v7554_v55 }
 0x5f8   :  { %v1183_v62 = vadd.f32 %v1182_v59, %v1181_v42  ;;  %v1196_v63 = vrot.slane %v1195_v34, 2 }
 0x5f9   :  { %v1187_v0 = vrot.slane %v1186_v44, 4  ;;  %v1200_v1 = vadd.f32 %v1178_v36, %v1176_v61 }
 0x5fa   :  { %v1184_v33 = vrot.slane %v1183_v62, 1  ;;  %v1197_v35 = vadd.f32 %v1196_v63, %v1195_v34  ;;  %v1306_v63 = vld [vmem:[%s9886_s1 + $0x8] sm:$0xff] }
 0x5fb   :  { %v1188_v2 = vadd.f32 %v1187_v0, %v1186_v44  ;;  %v1201_v3 = vrot.slane %v1200_v1, 4 }
 0x5fc   :  { %v1198_v5 = vrot.slane %v1197_v35, 1  ;;  %v1185_v6 = vadd.f32 %v1184_v33, %v1183_v62  ;;  %v1305_v62 = vld [vmem:[%s9886_s1] sm:$0xff] }
 0x5fd   :  { %v1189_v7 = vrot.slane %v1188_v2, 2  ;;  %v1202_v8 = vadd.f32 %v1201_v3, %v1200_v1 }
 0x5fe   :  { %v1199_v9 = vadd.f32 %v1198_v5, %v1197_v35  ;;  %v1207_v10 = vmul.f32 %v1185_v6, %v7298_v56 }
 0x5ff   :  { %v1190_v11 = vadd.f32 %v1189_v7, %v1188_v2  ;;  %v1203_v12 = vrot.slane %v1202_v8, 2 }
 0x600   :  { %v1209_v13 = vmul.f32 %v1199_v9, %v7298_v56  ;;  %v1211_v14 = vmul.f32 %v1207_v10, %v1207_v10  ;;  %v1217_v48 = vsub.f32 %v7544_v45, %v1207_v10  ;;  %v1219_v50 = vsub.f32 %v7546_v46, %v1207_v10 }
 0x601   :  { %v1191_v15 = vrot.slane %v1190_v11, 1  ;;  %v1204_v17 = vadd.f32 %v1203_v12, %v1202_v8 }
 0x602   :  { %v1213_v57 = vsub.f32 %v1209_v13, %v1211_v14  ;;  %v1303_v14 = vlaneseq }
 0x603   :  { %v1205_v21 = vrot.slane %v1204_v17, 1  ;;  %v1192_v22 = vadd.f32 %v1191_v15, %v1190_v11  ;;  %v5232_v15 = vld [vmem:[%s9895_s10 + $0x2a0] sm:$0xf] }
 0x604   :  { %v1215_v4 = vmax.f32 %v1213_v57, 0.0 }
 0x605   :  { %v1206_v23 = vadd.f32 %v1205_v21, %v1204_v17  ;;  %v1208_v16 = vmul.f32 %v1192_v22, %v7298_v56  ;;  %v6529_v17 = vld [vmem:[%s9895_s10 + $0x2cc] sm:$0xf0]  ;;  %v5184_v22 = vld [vmem:[%s9895_s10 + $0x240] sm:$0xf] }
 0x606   :  { %v1221_v18 = vadd.f32 1e-05, %v1215_v4  ;;  %v5233_v21 = vor.u32 %v6529_v17, %v5232_v15  ;;  %v6517_v4 = vld [vmem:[%s9895_s10 + $0x26c] sm:$0xf0] }
 0x607   :  { %v1210_v27 = vmul.f32 %v1206_v23, %v7298_v56  ;;  %v1212_v28 = vmul.f32 %v1208_v16, %v1208_v16  ;;  %v1220_v51 = vsub.f32 %v7556_v60, %v1208_v16  ;;  %v1218_v52 = vsub.f32 %v7554_v55, %v1208_v16 }
 0x608   :  { %6860 = vrsqrt.f32 %v1221_v18  ;;  %vm1229_vm4 = vweird.f32 %v1221_v18  ;;  %v1304_v23 = vand.u32 127, %v1303_v14  ;;  %2571 = vmatpush.bf16.msrb.mxu3 %v5233_v21  ;;  %v5185_v16 = vor.u32 %v6517_v4, %v5184_v22  ;;  %v4944_v22 = vld [vmem:[%s9895_s10 + $0x60] sm:$0xf]  ;;  %v6457_v4 = vld [vmem:[%s9895_s10 + $0x8c] sm:$0xf0] }
 0x609   :  { %v1214_v29 = vsub.f32 %v1210_v27, %v1212_v28  ;;  %v6625_v27 = vld [vmem:[%s9895_s10 + $0x5cc] sm:$0xf0] }
 0x60b   :  { %v1216_v31 = vmax.f32 %v1214_v29, 0.0 }
 0x60c   :  { %2572 = vmatpush.bf16.msrb.mxu3 %v5185_v16  ;;  %v5234_v16 = vld [vmem:[%s9895_s10 + $0x2d0] sm:$0xf0] }
 0x60d   :  { %v1222_v32 = vadd.f32 1e-05, %v1216_v31 }
 0x60e   :  { %v6861_v24 = vpop.eup %6860 }
 0x60f   :  { %v1224_v25 = vmul.f32 %v6861_v24, %v1221_v18  ;;  %6862 = vrsqrt.f32 %v1222_v32  ;;  %vm1230_vm3 = vweird.f32 %v6861_v24  ;;  %vm1239_vm7 = vweird.f32 %v1222_v32  ;;  %v5616_v18 = vld [vmem:[%s9895_s10 + $0x5a0] sm:$0xf] }
 0x610   :  { %vm1231_vm5 = vmor %vm1229_vm4, %vm1230_vm3  ;;  %v5617_v31 = vor.u32 %v6625_v27, %v5616_v18  ;;  %v6619_v18 = vld [vmem:[%s9895_s10 + $0x5a4] sm:$0xf]  ;;  %v5618_v27 = vld [vmem:[%s9895_s10 + $0x5d0] sm:$0xf0] }
 0x611   :  { %v1225_v20 = vmul.f32 %v6861_v24, %v1224_v25  ;;  %v5568_v25 = vld [vmem:[%s9895_s10 + $0x540] sm:$0xf] }
 0x612   :  { %2584 = vmatpush.bf16.msrb.mxu0 %v5617_v31 }
 0x613   :  { %v1226_v37 = vmul.f32 0.5, %v1225_v20  ;;  %v6613_v20 = vld [vmem:[%s9895_s10 + $0x56c] sm:$0xf0] }
 0x615   :  { %v6863_v38 = vpop.eup %6862  ;;  %v1227_v39 = vsub.f32 1.5, %v1226_v37 }
 0x616   :  { %v1234_v40 = vmul.f32 %v6863_v38, %v1222_v32  ;;  %vm1240_vm6 = vweird.f32 %v6863_v38  ;;  %v5136_v32 = vld [vmem:[%s9895_s10 + $0x1e0] sm:$0xf] }
 0x617   :  { %v1228_v41 = vmul.f32 %v6861_v24, %v1227_v39  ;;  %vm1241_vm8 = vmor %vm1239_vm7, %vm1240_vm6  ;;  %v5569_v39 = vor.u32 %v6613_v20, %v5568_v25  ;;  %v6511_v25 = vld [vmem:[%s9895_s10 + $0x244] sm:$0xf]  ;;  %v5186_v20 = vld [vmem:[%s9895_s10 + $0x270] sm:$0xf0] }
 0x618   :  { %v1235_v56 = vmul.f32 %v6863_v38, %v1234_v40 }
 0x619   :  { %v1232_v30 = vsel %vm1231_vm5, %v6861_v24, %v1228_v41  ;;  %v6505_v24 = vld [vmem:[%s9895_s10 + $0x20c] sm:$0xf0]  ;;  %2585 = vmatpush.bf16.msrb.mxu0 %v5569_v39  ;;  %v6607_v39 = vld [vmem:[%s9895_s10 + $0x544] sm:$0xf] }
 0x61a   :  { %v1236_v43 = vmul.f32 0.5, %v1235_v56  ;;  %v7572_v54 = vmul.f32 %v1232_v30, %v1217_v48  ;;  %v7574_v53 = vmul.f32 %v1232_v30, %v1219_v50  ;;  %v5088_v56 = vld [vmem:[%s9895_s10 + $0x180] sm:$0xf]  ;;  %v6898_v48 = vmov 0.0  }
 0x61b   :  { %v5520_v50 = vld [vmem:[%s9895_s10 + $0x4e0] sm:$0xf] }
 0x61c   :  { %v1237_v47 = vsub.f32 1.5, %v1236_v43  ;;  %v1247_v34 = vmul.f32 %v7572_v54, %v7572_v54  ;;  %v1249_v36 = vmul.f32 %v7574_v53, %v7574_v53  ;;  %v6493_v43 = vld [vmem:[%s9895_s10 + $0x1ac] sm:$0xf0] }
 0x61e   :  { %v1238_v49 = vmul.f32 %v6863_v38, %v1237_v47 }
 0x620   :  { %v1242_v42 = vsel %vm1241_vm8, %v6863_v38, %v1238_v49  ;;  %v5137_v38 = vor.u32 %v6505_v24, %v5136_v32 }
 0x621   :  { %v7576_v58 = vmul.f32 %v1242_v42, %v1220_v51  ;;  %v7578_v59 = vmul.f32 %v1242_v42, %v1218_v52  ;;  %v6601_v51 = vld [vmem:[%s9895_s10 + $0x50c] sm:$0xf0] }
 0x622   :  { %2573 = vmatpush.bf16.msrb.mxu3 %v5137_v38  ;;  %v5521_v42 = vor.u32 %v6601_v51, %v5520_v50  ;;  %v5621_v38 = vor.u32 %v6619_v18, %v5618_v27  ;;  %v6530_v50 = vld [vmem:[%s9895_s10 + $0x2d4] sm:$0xf0]  ;;  %v4946_v27 = vld [vmem:[%s9895_s10 + $0x90] sm:$0xf0] }
 0x623   :  { %v1254_v45 = vadd.f32 %v7576_v58, %v7574_v53  ;;  %v1251_v46 = vadd.f32 %v7578_v59, %v7572_v54  ;;  %v1248_v55 = vmul.f32 %v7578_v59, %v7578_v59  ;;  %v1250_v61 = vmul.f32 %v7576_v58, %v7576_v58 }
 0x624   :  { %2586 = vmatpush.bf16.msrb.mxu0 %v5521_v42 }
 0x625   :  { %1255 = vadd.xlane.f32.xlu1 %v1254_v45  ;;  %1252 = vadd.xlane.f32.xlu0 %v1251_v46  ;;  %v1257_v60 = vadd.f32 %v1248_v55, %v1247_v34  ;;  %v1260_v44 = vadd.f32 %v1250_v61, %v1249_v36  ;;  %v5089_v34 = vor.u32 %v6493_v43, %v5088_v56  ;;  %v5040_v61 = vld [vmem:[%s9895_s10 + $0x120] sm:$0xf]  ;;  %v6481_v36 = vld [vmem:[%s9895_s10 + $0x14c] sm:$0xf0] }
 0x627   :  { %1258 = vadd.xlane.f32.xlu2 %v1257_v60  ;;  %2574 = vmatpush.bf16.msrb.mxu3 %v5089_v34 }
 0x62d   :  { %1261 = vadd.xlane.f32.xlu0 %v1260_v44 }
 0x63e   :  { %1308 = vperm.xlu1 %6812, %v1305_v62  }
 0x63f   :  { %1311 = vperm.xlu2 %6813, %v1306_v63   ;;  %v5472_v63 = vld [vmem:[%s9895_s10 + $0x480] sm:$0xf] }
 0x698   :  { %v1253_v0 = vpop.xlane.xlu0 %1252  ;;  %v1256_v33 = vpop.xlane.xlu1 %1255 }
 0x699   :  { %v7598_v1 = vmul.f32 0.00390625, %v1253_v0  ;;  %v7602_v5 = vmul.f32 0.00390625, %v1256_v33  ;;  %v6589_v0 = vld [vmem:[%s9895_s10 + $0x4ac] sm:$0xf0] }
 0x69a   :  { %v1259_v35 = vpop.xlane.xlu2 %1258 }
 0x69b   :  { %v1267_v2 = vmul.f32 %v7598_v1, %v7598_v1  ;;  %v1265_v3 = vmul.f32 0.00390625, %v1259_v35  ;;  %v1268_v9 = vmul.f32 %v7602_v5, %v7602_v5  ;;  %v1273_v44 = vsub.f32 %v7572_v54, %v7598_v1 }
 0x69c   :  { %v1274_v33 = vsub.f32 %v7578_v59, %v7598_v1  ;;  %v5473_v54 = vor.u32 %v6589_v0, %v5472_v63  ;;  %v6469_v59 = vld [vmem:[%s9895_s10 + $0xec] sm:$0xf0]  ;;  %v6518_v0 = vld [vmem:[%s9895_s10 + $0x274] sm:$0xf0] }
 0x69d   :  { %v1269_v6 = vsub.f32 %v1265_v3, %v1267_v2  ;;  %v5041_v3 = vor.u32 %v6481_v36, %v5040_v61  ;;  %v5522_v61 = vld [vmem:[%s9895_s10 + $0x510] sm:$0xf0]  ;;  %v6541_v63 = vld [vmem:[%s9895_s10 + $0x32c] sm:$0xf0] }
 0x69e   :  { %2587 = vmatpush.bf16.msrb.mxu0 %v5473_v54  ;;  %v6626_v54 = vld [vmem:[%s9895_s10 + $0x5d4] sm:$0xf0] }
 0x69f   :  { %v1271_v7 = vmax.f32 %v1269_v6, 0.0  ;;  %2575 = vmatpush.bf16.msrb.mxu3 %v5041_v3 }
 0x6a0   :  { %v1262_v8 = vpop.xlane.xlu0 %1261 }
 0x6a1   :  { %v1266_v10 = vmul.f32 0.00390625, %v1262_v8  ;;  %v1277_v11 = vadd.f32 1e-05, %v1271_v7  ;;  %v4992_v8 = vld [vmem:[%s9895_s10 + $0xc0] sm:$0xf] }
 0x6a2   :  { %v1312_v29 = vpop.permute.xlu2 %1311  ;;  %v4993_v15 = vor.u32 %v6469_v59, %v4992_v8  ;;  %v6583_v8 = vld [vmem:[%s9895_s10 + $0x484] sm:$0xf]  ;;  %v5474_v59 = vld [vmem:[%s9895_s10 + $0x4b0] sm:$0xf0] }
 0x6a3   :  { %v1270_v12 = vsub.f32 %v1266_v10, %v1268_v9  ;;  %6864 = vrsqrt.f32 %v1277_v11  ;;  %vm1314_vm9 = vcmp.eq.s32.totalorder %v1312_v29, %v1304_v23  ;;  %vm1285_vm12 = vweird.f32 %v1277_v11  ;;  %v5424_v9 = vld [vmem:[%s9895_s10 + $0x420] sm:$0xf]  ;;  %v6577_v10 = vld [vmem:[%s9895_s10 + $0x44c] sm:$0xf0] }
 0x6a4   :  { %v1316_v49 = vsel %vm1314_vm9, 1.0, %v6898_v48  ;;  %2576 = vmatpush.bf16.msrb.mxu3 %v4993_v15  ;;  %v4945_v29 = vor.u32 %v6457_v4, %v4944_v22  ;;  %v6571_v15 = vld [vmem:[%s9895_s10 + $0x424] sm:$0xf] }
 0x6a5   :  { %v1272_v13 = vmax.f32 %v1270_v12, 0.0  ;;  %v1276_v12 = vsub.f32 %v7576_v58, %v7602_v5  ;;  %v5376_v58 = vld [vmem:[%s9895_s10 + $0x3c0] sm:$0xf]  ;;  %v6463_v22 = vld [vmem:[%s9895_s10 + $0xc4] sm:$0xf] }
 0x6a7   :  { %v7612_v57 = vadd.f32 1e-05, %v1272_v13  ;;  %v5425_v13 = vor.u32 %v6577_v10, %v5424_v9  ;;  %v5144_v9 = vld [vmem:[%s9895_s10 + $0x1e8] sm:$0xf]  ;;  %v6506_v10 = vld [vmem:[%s9895_s10 + $0x214] sm:$0xf0] }
 0x6a8   :  { %2577 = vmatpush.bf16.msrb.mxu3 %v4945_v29  ;;  %v5330_v29 = vld [vmem:[%s9895_s10 + $0x390] sm:$0xf0] }
 0x6a9   :  { %6866 = vrsqrt.f32 %v7612_v57  ;;  %v6865_v28 = vpop.eup %6864  ;;  %vm1295_vm0 = vweird.f32 %v7612_v57  ;;  %2588 = vmatpush.bf16.msrb.mxu0 %v5425_v13  ;;  %v5477_v13 = vor.u32 %v6583_v8, %v5474_v59  ;;  %v6482_v8 = vld [vmem:[%s9895_s10 + $0x154] sm:$0xf0]  ;;  %v6476_v59 = vld [vmem:[%s9895_s10 + $0x12c] sm:$0xf] }
 0x6aa   :  { %v1280_v19 = vmul.f32 %v6865_v28, %v1277_v11  ;;  %vm1286_vm10 = vweird.f32 %v6865_v28  ;;  %v1275_v11 = vsub.f32 %v7574_v53, %v7602_v5  ;;  %v6523_v53 = vld [vmem:[%s9895_s10 + $0x2a4] sm:$0xf]  ;;  %v6565_v5 = vld [vmem:[%s9895_s10 + $0x3ec] sm:$0xf0] }
 0x6ab   :  { %vm1287_vm13 = vmor %vm1285_vm12, %vm1286_vm10 }
 0x6ac   :  { %v1281_v37 = vmul.f32 %v6865_v28, %v1280_v19 }
 0x6ae   :  { %v1282_v41 = vmul.f32 0.5, %v1281_v37  ;;  %v5237_v37 = vor.u32 %v6523_v53, %v5234_v16  ;;  %v4994_v53 = vld [vmem:[%s9895_s10 + $0xf0] sm:$0xf0]  ;;  %v6451_v16 = vld [vmem:[%s9895_s10 + $0x64] sm:$0xf] }
 0x6af   :  { %v6867_v40 = vpop.eup %6866 }
 0x6b0   :  { %v1290_v30 = vmul.f32 %v6867_v40, %v7612_v57  ;;  %v1309_v47 = vpop.permute.xlu1 %1308  ;;  %v1283_v52 = vsub.f32 1.5, %v1282_v41  ;;  %vm1296_vm15 = vweird.f32 %v6867_v40  ;;  %v6445_v41 = vld [vmem:[%s9895_s10 + $0x2c] sm:$0xf0] }
 0x6b1   :  { %vm1313_vm11 = vcmp.eq.s32.totalorder %v1309_v47, %v1304_v23  ;;  %vm1297_vm1 = vmor %vm1295_vm0, %vm1296_vm15  ;;  %v5328_v47 = vld [vmem:[%s9895_s10 + $0x360] sm:$0xf] }
 0x6b2   :  { %v1291_v45 = vmul.f32 %v6867_v40, %v1290_v30  ;;  %v1315_v46 = vsel %vm1313_vm11, 1.0, %v6898_v48  ;;  %v1284_v55 = vmul.f32 %v6865_v28, %v1283_v52  ;;  %v5570_v30 = vld [vmem:[%s9895_s10 + $0x570] sm:$0xf0]  ;;  %v6553_v48 = vld [vmem:[%s9895_s10 + $0x38c] sm:$0xf0] }
 0x6b3   :  { %v7652_v60 = vpack.c.bf16 %v1316_v49, %v1315_v46  ;;  %v5240_v49 = vld [vmem:[%s9895_s10 + $0x2a8] sm:$0xf]  ;;  %v5329_v51 = vor.u32 %v6553_v48, %v5328_v47  ;;  %v6499_v52 = vld [vmem:[%s9895_s10 + $0x1e4] sm:$0xf]  ;;  %v5138_v46 = vld [vmem:[%s9895_s10 + $0x210] sm:$0xf0]  ;;  %v5573_v34 = vor.u32 %v6607_v39, %v5570_v30 }
 0x6b4   :  { %v1292_v62 = vmul.f32 0.5, %v1291_v45  ;;  %v1288_v35 = vsel %vm1287_vm13, %v6865_v28, %v1284_v55  ;;  %v5377_v28 = vor.u32 %v6565_v5, %v5376_v58  ;;  %v5189_v45 = vor.u32 %v6511_v25, %v5186_v20  ;;  %v6595_v55 = vld [vmem:[%s9895_s10 + $0x4e4] sm:$0xf]  ;;  %v5378_v5 = vld [vmem:[%s9895_s10 + $0x3f0] sm:$0xf0] }
 0x6b5   :  { %4890 = vmatmul.msk.bf16.vlgmr.msra.gmra.mxu3 %vm1119_vm14, %v7652_v60  ;;  %4891 = vmatmul.msk.bf16.vlgmr.msra.gmra.mxu0 %vm1119_vm14, %v7652_v60  ;;  %v1299_v6 = vmul.f32 %v1288_v35, %v1273_v44  ;;  %v1300_v7 = vmul.f32 %v1288_v35, %v1274_v33  ;;  %v5241_v36 = vor.u32 %v6530_v50, %v5240_v49  ;;  %v5192_v44 = vld [vmem:[%s9895_s10 + $0x248] sm:$0xf]  ;;  %v6559_v58 = vld [vmem:[%s9895_s10 + $0x3c4] sm:$0xf]  ;;  %v6524_v25 = vld [vmem:[%s9895_s10 + $0x2ac] sm:$0xf] }
 0x6b6   :  { %v1293_v2 = vsub.f32 1.5, %v1292_v62  ;;  %2589 = vmatpush.bf16.msrb.mxu0 %v5377_v28  ;;  %v5280_v62 = vld [vmem:[%s9895_s10 + $0x300] sm:$0xf]  ;;  %v5624_v35 = vld [vmem:[%s9895_s10 + $0x5a8] sm:$0xf]  ;;  %v5141_v3 = vor.u32 %v6499_v52, %v5138_v46  ;;  %v5381_v18 = vor.u32 %v6559_v58, %v5378_v5 }
 0x6b7   :  { %v1318_v21 = vpack.c.bf16 %v1300_v7, %v1299_v6  ;;  %v5281_v33 = vor.u32 %v6541_v63, %v5280_v62  ;;  %v5525_v6 = vor.u32 %v6595_v55, %v5522_v61  ;;  %v5090_v7 = vld [vmem:[%s9895_s10 + $0x1b0] sm:$0xf0]  ;;  %v6547_v28 = vld [vmem:[%s9895_s10 + $0x364] sm:$0xf]  ;;  %v6620_v39 = vld [vmem:[%s9895_s10 + $0x5ac] sm:$0xf] }
 0x6b8   :  { %v1294_v1 = vmul.f32 %v6867_v40, %v1293_v2  ;;  %v5625_v2 = vor.u32 %v6626_v54, %v5624_v35  ;;  %v6535_v20 = vld [vmem:[%s9895_s10 + $0x304] sm:$0xf]  ;;  %v6512_v47 = vld [vmem:[%s9895_s10 + $0x24c] sm:$0xf]  ;;  %v5194_v48 = vld [vmem:[%s9895_s10 + $0x278] sm:$0xf0] }
 0x6b9   :  { %v1322_v31 = vunpack.c.l.b16 %v1318_v21  ;;  %v1323_v24 = vunpack.c.h.b16 %v1318_v21  ;;  %v5197_v49 = vor.u32 %v6512_v47, %v5194_v48  ;;  %v6500_v50 = vld [vmem:[%s9895_s10 + $0x1ec] sm:$0xf]  ;;  %v5578_v55 = vld [vmem:[%s9895_s10 + $0x578] sm:$0xf0]  ;;  %v5096_v61 = vld [vmem:[%s9895_s10 + $0x188] sm:$0xf] }
 0x6ba   :  { %v1298_v14 = vsel %vm1297_vm1, %v6867_v40, %v1294_v1  ;;  %v4896_v40 = vld [vmem:[%s9895_s10] sm:$0xf]  ;;  %2590 = vmatpush.bf16.msrb.mxu0 %v5329_v51  ;;  %v5193_v1 = vor.u32 %v6518_v0, %v5192_v44  ;;  %v5146_v51 = vld [vmem:[%s9895_s10 + $0x218] sm:$0xf0]  ;;  %v6608_v46 = vld [vmem:[%s9895_s10 + $0x54c] sm:$0xf] }
 0x6bb   :  { %v1301_v17 = vmul.f32 %v1298_v14, %v1275_v11  ;;  %v1302_v57 = vmul.f32 %v1298_v14, %v1276_v12  ;;  %v4897_v42 = vor.u32 %v6445_v41, %v4896_v40  ;;  %v6475_v12 = vld [vmem:[%s9895_s10 + $0x124] sm:$0xf]  ;;  %v5042_v14 = vld [vmem:[%s9895_s10 + $0x150] sm:$0xf0]  ;;  %v5626_v40 = vld [vmem:[%s9895_s10 + $0x5d8] sm:$0xf0]  ;;  %v5149_v52 = vor.u32 %v6500_v50, %v5146_v51 }
 0x6bc   :  { %v5045_v21 = vor.u32 %v6475_v12, %v5042_v14  ;;  %v5629_v30 = vor.u32 %v6620_v39, %v5626_v40  ;;  %v5581_v44 = vor.u32 %v6608_v46, %v5578_v55  ;;  %v6488_v63 = vld [vmem:[%s9895_s10 + $0x18c] sm:$0xf]  ;;  %v5098_v0 = vld [vmem:[%s9895_s10 + $0x1b8] sm:$0xf0]  ;;  %v6602_v54 = vld [vmem:[%s9895_s10 + $0x514] sm:$0xf0] }
 0x6bd   :  { %v1319_v23 = vpack.c.bf16 %v1302_v57, %v1301_v17  ;;  %2578 = vmatpush.bf16.msrb.mxu3 %v4897_v42  ;;  %v5426_v17 = vld [vmem:[%s9895_s10 + $0x450] sm:$0xf0]  ;;  %v5145_v57 = vor.u32 %v6506_v10, %v5144_v9  ;;  %v5576_v42 = vld [vmem:[%s9895_s10 + $0x548] sm:$0xf]  ;;  %v5101_v35 = vor.u32 %v6488_v63, %v5098_v0  ;;  %v5050_v9 = vld [vmem:[%s9895_s10 + $0x158] sm:$0xf0] }
 0x6be   :  { %2591 = vmatpush.bf16.msrb.mxu0 %v5281_v33  ;;  %v5429_v4 = vor.u32 %v6571_v15, %v5426_v17  ;;  %v5528_v33 = vld [vmem:[%s9895_s10 + $0x4e8] sm:$0xf]  ;;  %v5053_v10 = vor.u32 %v6476_v59, %v5050_v9  ;;  %v6590_v12 = vld [vmem:[%s9895_s10 + $0x4b4] sm:$0xf0]  ;;  %v5482_v15 = vld [vmem:[%s9895_s10 + $0x4b8] sm:$0xf0] }
 0x6bf   :  { %v1324_v32 = vunpack.c.l.b16 %v1319_v23  ;;  %v1325_v19 = vunpack.c.h.b16 %v1319_v23  ;;  %v4997_v23 = vor.u32 %v6463_v22, %v4994_v53  ;;  %v6464_v22 = vld [vmem:[%s9895_s10 + $0xcc] sm:$0xf]  ;;  %v5002_v53 = vld [vmem:[%s9895_s10 + $0xf8] sm:$0xf0]  ;;  %v5432_v58 = vld [vmem:[%s9895_s10 + $0x428] sm:$0xf] }
 0x6c0   :  { %v6578_v5 = vld [vmem:[%s9895_s10 + $0x454] sm:$0xf0]  ;;  %v5386_v40 = vld [vmem:[%s9895_s10 + $0x3f8] sm:$0xf0]  ;;  %v5336_v50 = vld [vmem:[%s9895_s10 + $0x368] sm:$0xf] }
 0x6c1   :  { %v1326_v56 = vpack.c.b16 %v1324_v32, %v1322_v31  ;;  %v1327_v43 = vpack.c.b16 %v1325_v19, %v1323_v24  ;;  %2623 = vmatpush.bf16.msra.mxu3 %v5241_v36  ;;  %v4949_v31 = vor.u32 %v6451_v16, %v4946_v27  ;;  %v6439_v32 = vld [vmem:[%s9895_s10 + $0x4] sm:$0xf]  ;;  %v4898_v24 = vld [vmem:[%s9895_s10 + $0x30] sm:$0xf0]  ;;  %v5333_v19 = vor.u32 %v6547_v28, %v5330_v29  ;;  %v6494_v36 = vld [vmem:[%s9895_s10 + $0x1b4] sm:$0xf0] }
 0x6c2   :  { %2636 = vmatpush.bf16.msra.mxu0 %v5625_v2  ;;  %v4901_v41 = vor.u32 %v6439_v32, %v4898_v24  ;;  %v5097_v62 = vor.u32 %v6494_v36, %v5096_v61  ;;  %v6596_v2 = vld [vmem:[%s9895_s10 + $0x4ec] sm:$0xf]  ;;  %v5433_v16 = vor.u32 %v6578_v5, %v5432_v58  ;;  %v5434_v27 = vld [vmem:[%s9895_s10 + $0x458] sm:$0xf0]  ;;  %v4952_v29 = vld [vmem:[%s9895_s10 + $0x68] sm:$0xf] }
 0x6c3   :  { %1368 = vmatpush.bf16.msra.mxu1 %v1326_v56  ;;  %1382 = vmatpush.bf16.msra.mxu2 %v1327_v43  ;;  %v6452_v32 = vld [vmem:[%s9895_s10 + $0x6c] sm:$0xf]  ;;  %v4906_v48 = vld [vmem:[%s9895_s10 + $0x38] sm:$0xf0]  ;;  %v6554_v51 = vld [vmem:[%s9895_s10 + $0x394] sm:$0xf0] }
 0x6c4   :  { %v6542_v55 = vld [vmem:[%s9895_s10 + $0x334] sm:$0xf0]  ;;  %v6536_v36 = vld [vmem:[%s9895_s10 + $0x30c] sm:$0xf]  ;;  %v5248_v0 = vld [vmem:[%s9895_s10 + $0x2b0] sm:$0xf] }
 0x6c5   :  { %2624 = vmatpush.bf16.msra.mxu3 %v5193_v1  ;;  %v6519_v59 = vld [vmem:[%s9895_s10 + $0x27c] sm:$0xf0]  ;;  %v5202_v9 = vld [vmem:[%s9895_s10 + $0x280] sm:$0xf0]  ;;  %v5584_v5 = vld [vmem:[%s9895_s10 + $0x550] sm:$0xf] }
 0x6c6   :  { %4892 = vmatmul.msk.bf16.vlgmr.msra.gmra.mxu1 %vm1119_vm14, %v7652_v60  ;;  %4893 = vmatmul.msk.bf16.vlgmr.msra.gmra.mxu2 %vm1119_vm14, %v7652_v60  ;;  %v6487_v60 = vld [vmem:[%s9895_s10 + $0x184] sm:$0xf] }
 0x6c7   :  { %2597 = vmatpush.bf16.msrb.mxu1 %v5237_v37  ;;  %2610 = vmatpush.bf16.msrb.mxu2 %v5621_v38  ;;  %v5093_v11 = vor.u32 %v6487_v60, %v5090_v7  ;;  %v5282_v37 = vld [vmem:[%s9895_s10 + $0x330] sm:$0xf0]  ;;  %v5242_v38 = vld [vmem:[%s9895_s10 + $0x2d8] sm:$0xf0]  ;;  %v5529_v60 = vor.u32 %v6602_v54, %v5528_v33  ;;  %v5048_v7 = vld [vmem:[%s9895_s10 + $0x128] sm:$0xf] }
 0x6c8   :  { %v5285_v56 = vor.u32 %v6535_v20, %v5282_v37  ;;  %v5245_v43 = vor.u32 %v6524_v25, %v5242_v38  ;;  %v5049_v1 = vor.u32 %v6482_v8, %v5048_v7  ;;  %v5384_v20 = vld [vmem:[%s9895_s10 + $0x3c8] sm:$0xf]  ;;  %v6566_v37 = vld [vmem:[%s9895_s10 + $0x3f4] sm:$0xf0]  ;;  %v6560_v38 = vld [vmem:[%s9895_s10 + $0x3cc] sm:$0xf] }
 0x6c9   :  { %2625 = vmatpush.bf16.msra.mxu3 %v5145_v57  ;;  %v5000_v57 = vld [vmem:[%s9895_s10 + $0xc8] sm:$0xf]  ;;  %v5385_v39 = vor.u32 %v6566_v37, %v5384_v20  ;;  %v6531_v33 = vld [vmem:[%s9895_s10 + $0x2dc] sm:$0xf0]  ;;  %v5250_v54 = vld [vmem:[%s9895_s10 + $0x2e0] sm:$0xf0] }
 0x6ca   :  { %v5200_v7 = vld [vmem:[%s9895_s10 + $0x250] sm:$0xf] }
 0x6cb   :  { %2598 = vmatpush.bf16.msrb.mxu1 %v5189_v45  ;;  %2611 = vmatpush.bf16.msrb.mxu2 %v5573_v34  ;;  %v6614_v45 = vld [vmem:[%s9895_s10 + $0x574] sm:$0xf0]  ;;  %v5536_v37 = vld [vmem:[%s9895_s10 + $0x4f0] sm:$0xf] }
 0x6cc   :  { %v5577_v34 = vor.u32 %v6614_v45, %v5576_v42  ;;  %v5338_v42 = vld [vmem:[%s9895_s10 + $0x398] sm:$0xf0]  ;;  %v5337_v45 = vor.u32 %v6554_v51, %v5336_v50  ;;  %v5488_v51 = vld [vmem:[%s9895_s10 + $0x490] sm:$0xf] }
 0x6cd   :  { %2626 = vmatpush.bf16.msra.mxu3 %v5097_v62 }
 0x6ce   :  { %2637 = vmatpush.bf16.msra.mxu0 %v5577_v34  ;;  %v5288_v34 = vld [vmem:[%s9895_s10 + $0x308] sm:$0xf] }
 0x6cf   :  { %2599 = vmatpush.bf16.msrb.mxu1 %v5141_v3  ;;  %2612 = vmatpush.bf16.msrb.mxu2 %v5525_v6  ;;  %v5530_v3 = vld [vmem:[%s9895_s10 + $0x518] sm:$0xf0]  ;;  %v5289_v61 = vor.u32 %v6542_v55, %v5288_v34  ;;  %v5008_v55 = vld [vmem:[%s9895_s10 + $0xd0] sm:$0xf] }
 0x6d0   :  { %v5533_v6 = vor.u32 %v6596_v2, %v5530_v3 }
 0x6d1   :  { %2627 = vmatpush.bf16.msra.mxu3 %v5049_v1  ;;  %v6513_v1 = vld [vmem:[%s9895_s10 + $0x254] sm:$0xf] }
 0x6d2   :  { %2638 = vmatpush.bf16.msra.mxu0 %v5529_v60  ;;  %v5249_v60 = vor.u32 %v6531_v33, %v5248_v0  ;;  %v5440_v0 = vld [vmem:[%s9895_s10 + $0x430] sm:$0xf]  ;;  %v6579_v33 = vld [vmem:[%s9895_s10 + $0x45c] sm:$0xf0] }
 0x6d3   :  { %2600 = vmatpush.bf16.msrb.mxu1 %v5093_v11  ;;  %2613 = vmatpush.bf16.msrb.mxu2 %v5477_v13  ;;  %v5480_v11 = vld [vmem:[%s9895_s10 + $0x488] sm:$0xf]  ;;  %v6584_v13 = vld [vmem:[%s9895_s10 + $0x48c] sm:$0xf] }
 0x6d4   :  { %v5481_v14 = vor.u32 %v6590_v12, %v5480_v11  ;;  %v5485_v17 = vor.u32 %v6584_v13, %v5482_v15  ;;  %v6627_v11 = vld [vmem:[%s9895_s10 + $0x5dc] sm:$0xf0]  ;;  %v6621_v12 = vld [vmem:[%s9895_s10 + $0x5b4] sm:$0xf]  ;;  %v5634_v13 = vld [vmem:[%s9895_s10 + $0x5e0] sm:$0xf0]  ;;  %v5205_v15 = vor.u32 %v6513_v1, %v5202_v9  ;;  %v5441_v1 = vor.u32 %v6579_v33, %v5440_v0 }
 0x6d5   :  { %v5637_v58 = vor.u32 %v6621_v12, %v5634_v13  ;;  %v6561_v12 = vld [vmem:[%s9895_s10 + $0x3d4] sm:$0xf]  ;;  %v5394_v13 = vld [vmem:[%s9895_s10 + $0x400] sm:$0xf0]  ;;  %v6616_v0 = vld [vmem:[%s9895_s10 + $0x584] sm:$0xf0] }
 0x6d6   :  { %2639 = vmatpush.bf16.msra.mxu0 %v5481_v14  ;;  %v5201_v14 = vor.u32 %v6519_v59, %v5200_v7  ;;  %v6453_v7 = vld [vmem:[%s9895_s10 + $0x74] sm:$0xf]  ;;  %v4962_v59 = vld [vmem:[%s9895_s10 + $0xa0] sm:$0xf0]  ;;  %v6610_v33 = vld [vmem:[%s9895_s10 + $0x55c] sm:$0xf] }
 0x6d7   :  { %2601 = vmatpush.bf16.msrb.mxu1 %v5045_v21  ;;  %2614 = vmatpush.bf16.msrb.mxu2 %v5429_v4  ;;  %v6470_v21 = vld [vmem:[%s9895_s10 + $0xf4] sm:$0xf0] }
 0x6d8   :  { %v5001_v4 = vor.u32 %v6470_v21, %v5000_v57  ;;  %v6507_v57 = vld [vmem:[%s9895_s10 + $0x21c] sm:$0xf0]  ;;  %v6501_v21 = vld [vmem:[%s9895_s10 + $0x1f4] sm:$0xf] }
 0x6da   :  { %2628 = vmatpush.bf16.msra.mxu3 %v5001_v4  ;;  %2640 = vmatpush.bf16.msra.mxu0 %v5433_v16  ;;  %v6615_v16 = vld [vmem:[%s9895_s10 + $0x57c] sm:$0xf0] }
 0x6db   :  { %2602 = vmatpush.bf16.msrb.mxu1 %v4997_v23  ;;  %2615 = vmatpush.bf16.msrb.mxu2 %v5381_v18  ;;  %v5005_v23 = vor.u32 %v6464_v22, %v5002_v53  ;;  %v6572_v18 = vld [vmem:[%s9895_s10 + $0x42c] sm:$0xf]  ;;  %v5154_v22 = vld [vmem:[%s9895_s10 + $0x220] sm:$0xf0] }
 0x6dc   :  { %v5437_v28 = vor.u32 %v6572_v18, %v5434_v27  ;;  %v6609_v18 = vld [vmem:[%s9895_s10 + $0x554] sm:$0xf]  ;;  %v5586_v27 = vld [vmem:[%s9895_s10 + $0x580] sm:$0xf0] }
 0x6dd   :  { %v5589_v20 = vor.u32 %v6609_v18, %v5586_v27  ;;  %v5258_v18 = vld [vmem:[%s9895_s10 + $0x2e8] sm:$0xf0]  ;;  %v5344_v27 = vld [vmem:[%s9895_s10 + $0x370] sm:$0xf] }
 0x6de   :  { %2641 = vmatpush.bf16.msra.mxu0 %v5385_v39  ;;  %v6597_v39 = vld [vmem:[%s9895_s10 + $0x4f4] sm:$0xf] }
 0x6df   :  { %2603 = vmatpush.bf16.msrb.mxu1 %v4949_v31  ;;  %2616 = vmatpush.bf16.msrb.mxu2 %v5333_v19  ;;  %v6458_v31 = vld [vmem:[%s9895_s10 + $0x94] sm:$0xf0]  ;;  %v4954_v19 = vld [vmem:[%s9895_s10 + $0x98] sm:$0xf0] }
 0x6e0   :  { %v4953_v24 = vor.u32 %v6458_v31, %v4952_v29  ;;  %v4957_v25 = vor.u32 %v6452_v32, %v4954_v19  ;;  %v5157_v29 = vor.u32 %v6501_v21, %v5154_v22  ;;  %v5104_v31 = vld [vmem:[%s9895_s10 + $0x190] sm:$0xf]  ;;  %v6495_v32 = vld [vmem:[%s9895_s10 + $0x1bc] sm:$0xf0]  ;;  %v5106_v19 = vld [vmem:[%s9895_s10 + $0x1c0] sm:$0xf0] }
 0x6e1   :  { %v6441_v21 = vld [vmem:[%s9895_s10 + $0x14] sm:$0xf]  ;;  %v4914_v22 = vld [vmem:[%s9895_s10 + $0x40] sm:$0xf0] }
 0x6e2   :  { %2629 = vmatpush.bf16.msra.mxu3 %v4953_v24  ;;  %2642 = vmatpush.bf16.msra.mxu0 %v5337_v45  ;;  %v6489_v24 = vld [vmem:[%s9895_s10 + $0x194] sm:$0xf]  ;;  %v5490_v45 = vld [vmem:[%s9895_s10 + $0x4c0] sm:$0xf0] }
 0x6e3   :  { %2604 = vmatpush.bf16.msrb.mxu1 %v4901_v41  ;;  %2617 = vmatpush.bf16.msrb.mxu2 %v5285_v56  ;;  %v5389_v41 = vor.u32 %v6560_v38, %v5386_v40  ;;  %v4904_v56 = vld [vmem:[%s9895_s10 + $0x8] sm:$0xf]  ;;  %v6603_v38 = vld [vmem:[%s9895_s10 + $0x51c] sm:$0xf0]  ;;  %v5538_v40 = vld [vmem:[%s9895_s10 + $0x520] sm:$0xf0] }
 0x6e4   :  { %v5541_v50 = vor.u32 %v6597_v39, %v5538_v40 }
 0x6e6   :  { %2643 = vmatpush.bf16.msra.mxu0 %v5289_v61  ;;  %v6471_v61 = vld [vmem:[%s9895_s10 + $0xfc] sm:$0xf0] }
 0x6e7   :  { %2649 = vmatpush.bf16.msra.mxu1 %v5245_v43  ;;  %2662 = vmatpush.bf16.msra.mxu2 %v5629_v30  ;;  %v6446_v43 = vld [vmem:[%s9895_s10 + $0x34] sm:$0xf0]  ;;  %v6440_v30 = vld [vmem:[%s9895_s10 + $0xc] sm:$0xf] }
 0x6e8   :  { %v4905_v47 = vor.u32 %v6446_v43, %v4904_v56  ;;  %v5109_v56 = vor.u32 %v6489_v24, %v5106_v19  ;;  %v5056_v43 = vld [vmem:[%s9895_s10 + $0x130] sm:$0xf]  ;;  %v4917_v24 = vor.u32 %v6441_v21, %v4914_v22  ;;  %v5066_v21 = vld [vmem:[%s9895_s10 + $0x168] sm:$0xf0] }
 0x6ea   :  { %2630 = vmatpush.bf16.msra.mxu3 %v4905_v47  ;;  %v6477_v47 = vld [vmem:[%s9895_s10 + $0x134] sm:$0xf] }
 0x6eb   :  { %2650 = vmatpush.bf16.msra.mxu1 %v5197_v49  ;;  %2663 = vmatpush.bf16.msra.mxu2 %v5581_v44  ;;  %v4909_v49 = vor.u32 %v6440_v30, %v4906_v48  ;;  %v5290_v44 = vld [vmem:[%s9895_s10 + $0x338] sm:$0xf0]  ;;  %v6483_v30 = vld [vmem:[%s9895_s10 + $0x15c] sm:$0xf0]  ;;  %v5058_v48 = vld [vmem:[%s9895_s10 + $0x160] sm:$0xf0] }
 0x6ec   :  { %v5293_v62 = vor.u32 %v6536_v36, %v5290_v44  ;;  %v5061_v34 = vor.u32 %v6477_v47, %v5058_v48  ;;  %v6465_v36 = vld [vmem:[%s9895_s10 + $0xd4] sm:$0xf]  ;;  %v5010_v44 = vld [vmem:[%s9895_s10 + $0x100] sm:$0xf0]  ;;  %v5640_v48 = vld [vmem:[%s9895_s10 + $0x5b8] sm:$0xf] }
 0x6ed   :  { %v5298_v47 = vld [vmem:[%s9895_s10 + $0x340] sm:$0xf0] }
 0x6ef   :  { %2651 = vmatpush.bf16.msra.mxu1 %v5149_v52  ;;  %2664 = vmatpush.bf16.msra.mxu2 %v5533_v6  ;;  %v6548_v52 = vld [vmem:[%s9895_s10 + $0x36c] sm:$0xf] }
 0x6f0   :  { %v5341_v46 = vor.u32 %v6548_v52, %v5338_v42  ;;  %v6591_v52 = vld [vmem:[%s9895_s10 + $0x4bc] sm:$0xf0]  ;;  %v6585_v42 = vld [vmem:[%s9895_s10 + $0x494] sm:$0xf] }
 0x6f3   :  { %2652 = vmatpush.bf16.msra.mxu1 %v5101_v35  ;;  %2665 = vmatpush.bf16.msra.mxu2 %v5485_v17  ;;  %v6525_v35 = vld [vmem:[%s9895_s10 + $0x2b4] sm:$0xf]  ;;  %v5152_v17 = vld [vmem:[%s9895_s10 + $0x1f0] sm:$0xf] }
 0x6f4   :  { %v5253_v6 = vor.u32 %v6525_v35, %v5250_v54  ;;  %v6573_v35 = vld [vmem:[%s9895_s10 + $0x434] sm:$0xf]  ;;  %v5442_v54 = vld [vmem:[%s9895_s10 + $0x460] sm:$0xf0] }
 0x6f5   :  { %v5445_v9 = vor.u32 %v6573_v35, %v5442_v54  ;;  %v5594_v35 = vld [vmem:[%s9895_s10 + $0x588] sm:$0xf0] }
 0x6f7   :  { %2653 = vmatpush.bf16.msra.mxu1 %v5053_v10  ;;  %2666 = vmatpush.bf16.msra.mxu2 %v5437_v28  ;;  %v5632_v10 = vld [vmem:[%s9895_s10 + $0x5b0] sm:$0xf]  ;;  %v5153_v28 = vor.u32 %v6507_v57, %v5152_v17  ;;  %v6447_v57 = vld [vmem:[%s9895_s10 + $0x3c] sm:$0xf0] }
 0x6f8   :  { %v5633_v53 = vor.u32 %v6627_v11, %v5632_v10  ;;  %v5392_v10 = vld [vmem:[%s9895_s10 + $0x3d0] sm:$0xf]  ;;  %v6567_v11 = vld [vmem:[%s9895_s10 + $0x3fc] sm:$0xf0] }
 0x6f9   :  { %v4912_v17 = vld [vmem:[%s9895_s10 + $0x10] sm:$0xf] }
 0x6fb   :  { %2654 = vmatpush.bf16.msra.mxu1 %v5005_v23  ;;  %2667 = vmatpush.bf16.msra.mxu2 %v5389_v41  ;;  %v5105_v41 = vor.u32 %v6495_v32, %v5104_v31  ;;  %v5346_v31 = vld [vmem:[%s9895_s10 + $0x3a0] sm:$0xf0]  ;;  %v4913_v32 = vor.u32 %v6447_v57, %v4912_v17  ;;  %v6484_v17 = vld [vmem:[%s9895_s10 + $0x164] sm:$0xf0]  ;;  %v6478_v57 = vld [vmem:[%s9895_s10 + $0x13c] sm:$0xf] }
 0x6ff   :  { %2655 = vmatpush.bf16.msra.mxu1 %v4957_v25  ;;  %2668 = vmatpush.bf16.msra.mxu2 %v5341_v46  ;;  %v5585_v25 = vor.u32 %v6615_v16, %v5584_v5  ;;  %v5057_v46 = vor.u32 %v6483_v30, %v5056_v43  ;;  %v5397_v5 = vor.u32 %v6561_v12, %v5394_v13  ;;  %v6526_v16 = vld [vmem:[%s9895_s10 + $0x2bc] sm:$0xf]  ;;  %v6543_v43 = vld [vmem:[%s9895_s10 + $0x33c] sm:$0xf0]  ;;  %v6537_v30 = vld [vmem:[%s9895_s10 + $0x314] sm:$0xf] }
 0x700   :  { %v5546_v12 = vld [vmem:[%s9895_s10 + $0x528] sm:$0xf0] }
 0x703   :  { %2656 = vmatpush.bf16.msra.mxu1 %v4909_v49  ;;  %2669 = vmatpush.bf16.msra.mxu2 %v5293_v62  ;;  %v5537_v49 = vor.u32 %v6603_v38, %v5536_v37  ;;  %v5489_v62 = vor.u32 %v6591_v52, %v5488_v51  ;;  %v6520_v37 = vld [vmem:[%s9895_s10 + $0x284] sm:$0xf0]  ;;  %v6514_v38 = vld [vmem:[%s9895_s10 + $0x25c] sm:$0xf]  ;;  %v5642_v51 = vld [vmem:[%s9895_s10 + $0x5e8] sm:$0xf0] }
 0x743   :  { %v1370_v63 = vpop.f32.mrf.mxu1 }
 0x749   :  { %v1384_v2 = vpop.f32.mrf.mxu2 }
 0x74b   :  { %v1372_v3 = vpop.f32.mrf.mxu1 }
 0x74c   :  { %v8028_v8 = vpack.c.bf16 %v1372_v3, %v1370_v63  ;;  %v5493_v63 = vor.u32 %v6585_v42, %v5490_v45  ;;  %v5013_v3 = vor.u32 %v6465_v36, %v5010_v44  ;;  %v5160_v45 = vld [vmem:[%s9895_s10 + $0x1f8] sm:$0xf]  ;;  %v5162_v36 = vld [vmem:[%s9895_s10 + $0x228] sm:$0xf0] }
 0x74e   :  { %2579 = vmatmul.bf16.vlgmr.msrb.gmra.mxu3 %v8028_v8  ;;  %2605 = vmatmul.bf16.vlgmr.msrb.gmra.mxu1 %v8028_v8 }
 0x74f   :  { %2675 = vmatpush.bf16.msrb.mxu3 %v5249_v60  ;;  %2701 = vmatpush.bf16.msrb.mxu1 %v5253_v6  ;;  %v4960_v60 = vld [vmem:[%s9895_s10 + $0x70] sm:$0xf]  ;;  %v6459_v6 = vld [vmem:[%s9895_s10 + $0x9c] sm:$0xf0] }
 0x751   :  { %v1386_v4 = vpop.f32.mrf.mxu2 }
 0x752   :  { %v8068_v23 = vpack.c.bf16 %v1386_v4, %v1384_v2  ;;  %v5009_v2 = vor.u32 %v6471_v61, %v5008_v55  ;;  %v5256_v4 = vld [vmem:[%s9895_s10 + $0x2b8] sm:$0xf]  ;;  %v6508_v55 = vld [vmem:[%s9895_s10 + $0x224] sm:$0xf0]  ;;  %v6502_v61 = vld [vmem:[%s9895_s10 + $0x1fc] sm:$0xf] }
 0x753   :  { %2676 = vmatpush.bf16.msrb.mxu3 %v5201_v14  ;;  %2702 = vmatpush.bf16.msrb.mxu1 %v5205_v15  ;;  %v4961_v14 = vor.u32 %v6459_v6, %v4960_v60  ;;  %v4965_v15 = vor.u32 %v6453_v7, %v4962_v59  ;;  %v5161_v54 = vor.u32 %v6508_v55, %v5160_v45  ;;  %v6496_v60 = vld [vmem:[%s9895_s10 + $0x1c4] sm:$0xf0]  ;;  %v6490_v6 = vld [vmem:[%s9895_s10 + $0x19c] sm:$0xf]  ;;  %v5114_v7 = vld [vmem:[%s9895_s10 + $0x1c8] sm:$0xf0] }
 0x754   :  { %2592 = vmatmul.bf16.vlgmr.msrb.gmra.mxu0 %v8068_v23  ;;  %2618 = vmatmul.bf16.vlgmr.msrb.gmra.mxu2 %v8068_v23  ;;  %v6442_v55 = vld [vmem:[%s9895_s10 + $0x1c] sm:$0xf] }
 0x755   :  { %2688 = vmatpush.bf16.msrb.mxu0 %v5633_v53  ;;  %2714 = vmatpush.bf16.msrb.mxu2 %v5637_v58  ;;  %v6532_v53 = vld [vmem:[%s9895_s10 + $0x2e4] sm:$0xf0]  ;;  %v5393_v58 = vor.u32 %v6567_v11, %v5392_v10  ;;  %v6598_v11 = vld [vmem:[%s9895_s10 + $0x4fc] sm:$0xf] }
 0x756   :  { %v5257_v19 = vor.u32 %v6532_v53, %v5256_v4  ;;  %v6604_v10 = vld [vmem:[%s9895_s10 + $0x524] sm:$0xf0]  ;;  %v5549_v4 = vor.u32 %v6598_v11, %v5546_v12  ;;  %v5496_v53 = vld [vmem:[%s9895_s10 + $0x498] sm:$0xf] }
 0x757   :  { %2677 = vmatpush.bf16.msrb.mxu3 %v5153_v28  ;;  %2703 = vmatpush.bf16.msrb.mxu1 %v5157_v29  ;;  %v6555_v28 = vld [vmem:[%s9895_s10 + $0x39c] sm:$0xf0]  ;;  %v6549_v29 = vld [vmem:[%s9895_s10 + $0x374] sm:$0xf] }
 0x758   :  { %v5345_v39 = vor.u32 %v6555_v28, %v5344_v27  ;;  %v5349_v40 = vor.u32 %v6549_v29, %v5346_v31  ;;  %v5069_v27 = vor.u32 %v6478_v57, %v5066_v21  ;;  %v5016_v28 = vld [vmem:[%s9895_s10 + $0xd8] sm:$0xf]  ;;  %v6472_v29 = vld [vmem:[%s9895_s10 + $0x104] sm:$0xf0]  ;;  %v6466_v31 = vld [vmem:[%s9895_s10 + $0xdc] sm:$0xf] }
 0x759   :  { %2689 = vmatpush.bf16.msrb.mxu0 %v5585_v25  ;;  %2715 = vmatpush.bf16.msrb.mxu2 %v5589_v20  ;;  %v5261_v25 = vor.u32 %v6526_v16, %v5258_v18  ;;  %v5208_v20 = vld [vmem:[%s9895_s10 + $0x258] sm:$0xf]  ;;  %v5498_v16 = vld [vmem:[%s9895_s10 + $0x4c8] sm:$0xf0]  ;;  %v5648_v21 = vld [vmem:[%s9895_s10 + $0x5c0] sm:$0xf] }
 0x75a   :  { %v5209_v52 = vor.u32 %v6520_v37, %v5208_v20  ;;  %v6580_v20 = vld [vmem:[%s9895_s10 + $0x464] sm:$0xf0]  ;;  %v6574_v37 = vld [vmem:[%s9895_s10 + $0x43c] sm:$0xf]  ;;  %v5306_v57 = vld [vmem:[%s9895_s10 + $0x348] sm:$0xf0] }
 0x75b   :  { %2678 = vmatpush.bf16.msrb.mxu3 %v5105_v41  ;;  %2704 = vmatpush.bf16.msrb.mxu1 %v5109_v56  ;;  %v5210_v41 = vld [vmem:[%s9895_s10 + $0x288] sm:$0xf0]  ;;  %v5296_v56 = vld [vmem:[%s9895_s10 + $0x310] sm:$0xf] }
 0x75c   :  { %v5213_v42 = vor.u32 %v6514_v38, %v5210_v41  ;;  %v5450_v38 = vld [vmem:[%s9895_s10 + $0x468] sm:$0xf0]  ;;  %v4968_v41 = vld [vmem:[%s9895_s10 + $0x78] sm:$0xf] }
 0x75d   :  { %2690 = vmatpush.bf16.msrb.mxu0 %v5537_v49  ;;  %2716 = vmatpush.bf16.msrb.mxu2 %v5541_v50  ;;  %v6628_v49 = vld [vmem:[%s9895_s10 + $0x5e4] sm:$0xf0]  ;;  %v6622_v50 = vld [vmem:[%s9895_s10 + $0x5bc] sm:$0xf] }
 0x75e   :  { %2631 = vmatmul.bf16.vlgmr.msra.gmra.mxu3 %v8028_v8  ;;  %2657 = vmatmul.bf16.vlgmr.msra.gmra.mxu1 %v8028_v8  ;;  %v5641_v44 = vor.u32 %v6628_v49, %v5640_v48  ;;  %v5453_v48 = vor.u32 %v6574_v37, %v5450_v38  ;;  %v5400_v49 = vld [vmem:[%s9895_s10 + $0x3d8] sm:$0xf]  ;;  %v5602_v37 = vld [vmem:[%s9895_s10 + $0x590] sm:$0xf0] }
 0x75f   :  { %2679 = vmatpush.bf16.msrb.mxu3 %v5057_v46  ;;  %2705 = vmatpush.bf16.msrb.mxu1 %v5061_v34  ;;  %v5297_v46 = vor.u32 %v6543_v43, %v5296_v56  ;;  %v5301_v34 = vor.u32 %v6537_v30, %v5298_v47  ;;  %v6460_v56 = vld [vmem:[%s9895_s10 + $0xa4] sm:$0xf0]  ;;  %v6454_v43 = vld [vmem:[%s9895_s10 + $0x7c] sm:$0xf]  ;;  %v4970_v30 = vld [vmem:[%s9895_s10 + $0xa8] sm:$0xf0] }
 0x760   :  { %v4973_v45 = vor.u32 %v6454_v43, %v4970_v30  ;;  %v6491_v30 = vld [vmem:[%s9895_s10 + $0x1a4] sm:$0xf] }
 0x761   :  { %2691 = vmatpush.bf16.msrb.mxu0 %v5489_v62  ;;  %2717 = vmatpush.bf16.msrb.mxu2 %v5493_v63  ;;  %v5645_v62 = vor.u32 %v6622_v50, %v5642_v51  ;;  %v5592_v63 = vld [vmem:[%s9895_s10 + $0x558] sm:$0xf]  ;;  %v6568_v50 = vld [vmem:[%s9895_s10 + $0x404] sm:$0xf0]  ;;  %v6562_v51 = vld [vmem:[%s9895_s10 + $0x3dc] sm:$0xf] }
 0x762   :  { %v5593_v59 = vor.u32 %v6616_v0, %v5592_v63  ;;  %v6527_v0 = vld [vmem:[%s9895_s10 + $0x2c4] sm:$0xf] }
 0x763   :  { %2680 = vmatpush.bf16.msrb.mxu3 %v5009_v2  ;;  %2706 = vmatpush.bf16.msrb.mxu1 %v5013_v3  ;;  %v5165_v2 = vor.u32 %v6502_v61, %v5162_v36  ;;  %v5112_v3 = vld [vmem:[%s9895_s10 + $0x198] sm:$0xf]  ;;  %v4922_v61 = vld [vmem:[%s9895_s10 + $0x48] sm:$0xf0]  ;;  %v5264_v36 = vld [vmem:[%s9895_s10 + $0x2c0] sm:$0xf] }
 0x764   :  { %2644 = vmatmul.bf16.vlgmr.msra.gmra.mxu0 %v8068_v23  ;;  %2670 = vmatmul.bf16.vlgmr.msra.gmra.mxu2 %v8068_v23  ;;  %v5113_v13 = vor.u32 %v6496_v60, %v5112_v3  ;;  %v5354_v3 = vld [vmem:[%s9895_s10 + $0x3a8] sm:$0xf0] }
 0x765   :  { %2692 = vmatpush.bf16.msrb.mxu0 %v5441_v1  ;;  %2718 = vmatpush.bf16.msrb.mxu2 %v5445_v9  ;;  %v5597_v1 = vor.u32 %v6610_v33, %v5594_v35  ;;  %v5544_v9 = vld [vmem:[%s9895_s10 + $0x4f8] sm:$0xf]  ;;  %v5266_v33 = vld [vmem:[%s9895_s10 + $0x2f0] sm:$0xf0] }
 0x766   :  { %v5545_v22 = vor.u32 %v6604_v10, %v5544_v9  ;;  %v5352_v35 = vld [vmem:[%s9895_s10 + $0x378] sm:$0xf]  ;;  %v6521_v9 = vld [vmem:[%s9895_s10 + $0x28c] sm:$0xf0]  ;;  %v6515_v10 = vld [vmem:[%s9895_s10 + $0x264] sm:$0xf] }
 0x767   :  { %2681 = vmatpush.bf16.msrb.mxu3 %v4961_v14  ;;  %2707 = vmatpush.bf16.msrb.mxu1 %v4965_v15  ;;  %v5117_v14 = vor.u32 %v6490_v6, %v5114_v7  ;;  %v5064_v15 = vld [vmem:[%s9895_s10 + $0x138] sm:$0xf]  ;;  %v4925_v6 = vor.u32 %v6442_v55, %v4922_v61  ;;  %v6479_v61 = vld [vmem:[%s9895_s10 + $0x144] sm:$0xf] }
 0x768   :  { %v5065_v18 = vor.u32 %v6484_v17, %v5064_v15  ;;  %v6544_v15 = vld [vmem:[%s9895_s10 + $0x344] sm:$0xf0]  ;;  %v6538_v17 = vld [vmem:[%s9895_s10 + $0x31c] sm:$0xf] }
 0x769   :  { %2693 = vmatpush.bf16.msrb.mxu0 %v5393_v58  ;;  %2719 = vmatpush.bf16.msrb.mxu2 %v5397_v5  ;;  %v6592_v58 = vld [vmem:[%s9895_s10 + $0x4c4] sm:$0xf0]  ;;  %v6586_v5 = vld [vmem:[%s9895_s10 + $0x49c] sm:$0xf] }
 0x76b   :  { %2682 = vmatpush.bf16.msrb.mxu3 %v4913_v32  ;;  %2708 = vmatpush.bf16.msrb.mxu1 %v4917_v24  ;;  %v5018_v32 = vld [vmem:[%s9895_s10 + $0x108] sm:$0xf0]  ;;  %v5497_v24 = vor.u32 %v6592_v58, %v5496_v53  ;;  %v5650_v53 = vld [vmem:[%s9895_s10 + $0x5f0] sm:$0xf0] }
 0x76d   :  { %2694 = vmatpush.bf16.msrb.mxu0 %v5345_v39  ;;  %2720 = vmatpush.bf16.msrb.mxu2 %v5349_v40  ;;  %v5017_v39 = vor.u32 %v6472_v29, %v5016_v28  ;;  %v5021_v40 = vor.u32 %v6466_v31, %v5018_v32  ;;  %v6509_v28 = vld [vmem:[%s9895_s10 + $0x22c] sm:$0xf0]  ;;  %v6503_v32 = vld [vmem:[%s9895_s10 + $0x204] sm:$0xf] }
 0x76e   :  { %2683 = vmatmul.bf16.vlgmr.msrb.gmra.mxu3 %v8028_v8  ;;  %2709 = vmatmul.bf16.vlgmr.msrb.gmra.mxu1 %v8028_v8 }
 0x76f   :  { %2727 = vmatpush.bf16.msra.mxu3 %v5257_v19  ;;  %2753 = vmatpush.bf16.msra.mxu1 %v5261_v25  ;;  %v5501_v19 = vor.u32 %v6586_v5, %v5498_v16  ;;  %v5448_v25 = vld [vmem:[%s9895_s10 + $0x438] sm:$0xf] }
 0x770   :  { %v5449_v47 = vor.u32 %v6580_v20, %v5448_v25  ;;  %v6617_v25 = vld [vmem:[%s9895_s10 + $0x58c] sm:$0xf0]  ;;  %v6611_v20 = vld [vmem:[%s9895_s10 + $0x564] sm:$0xf] }
 0x771   :  { %2695 = vmatpush.bf16.msrb.mxu0 %v5297_v46  ;;  %2721 = vmatpush.bf16.msrb.mxu2 %v5301_v34  ;;  %v4920_v46 = vld [vmem:[%s9895_s10 + $0x18] sm:$0xf]  ;;  %v6448_v34 = vld [vmem:[%s9895_s10 + $0x44] sm:$0xf0]  ;;  %v5605_v43 = vor.u32 %v6611_v20, %v5602_v37  ;;  %v5274_v20 = vld [vmem:[%s9895_s10 + $0x2f8] sm:$0xf0] }
 0x772   :  { %v4921_v60 = vor.u32 %v6448_v34, %v4920_v46  ;;  %v6485_v46 = vld [vmem:[%s9895_s10 + $0x16c] sm:$0xf0]  ;;  %v5360_v37 = vld [vmem:[%s9895_s10 + $0x380] sm:$0xf] }
 0x773   :  { %2728 = vmatpush.bf16.msra.mxu3 %v5209_v52  ;;  %2754 = vmatpush.bf16.msra.mxu1 %v5213_v42  ;;  %v5402_v52 = vld [vmem:[%s9895_s10 + $0x408] sm:$0xf0]  ;;  %v4969_v42 = vor.u32 %v6460_v56, %v4968_v41  ;;  %v6497_v41 = vld [vmem:[%s9895_s10 + $0x1cc] sm:$0xf0] }
 0x774   :  { %2696 = vmatmul.bf16.vlgmr.msrb.gmra.mxu0 %v8068_v23  ;;  %2722 = vmatmul.bf16.vlgmr.msrb.gmra.mxu2 %v8068_v23  ;;  %v5405_v63 = vor.u32 %v6562_v51, %v5402_v52  ;;  %v5554_v51 = vld [vmem:[%s9895_s10 + $0x530] sm:$0xf0] }
 0x775   :  { %2740 = vmatpush.bf16.msra.mxu0 %v5641_v44  ;;  %2766 = vmatpush.bf16.msra.mxu2 %v5645_v62  ;;  %v6533_v44 = vld [vmem:[%s9895_s10 + $0x2ec] sm:$0xf0]  ;;  %v5401_v62 = vor.u32 %v6568_v50, %v5400_v49  ;;  %v6599_v50 = vld [vmem:[%s9895_s10 + $0x504] sm:$0xf] }
 0x776   :  { %v5265_v7 = vor.u32 %v6533_v44, %v5264_v36  ;;  %v6605_v49 = vld [vmem:[%s9895_s10 + $0x52c] sm:$0xf0]  ;;  %v5557_v55 = vor.u32 %v6599_v50, %v5554_v51  ;;  %v5074_v36 = vld [vmem:[%s9895_s10 + $0x170] sm:$0xf0]  ;;  %v5504_v44 = vld [vmem:[%s9895_s10 + $0x4a0] sm:$0xf] }
 0x777   :  { %2729 = vmatpush.bf16.msra.mxu3 %v5161_v54  ;;  %2755 = vmatpush.bf16.msra.mxu1 %v5165_v2  ;;  %v6556_v54 = vld [vmem:[%s9895_s10 + $0x3a4] sm:$0xf0]  ;;  %v6550_v2 = vld [vmem:[%s9895_s10 + $0x37c] sm:$0xf] }
 0x778   :  { %v5353_v11 = vor.u32 %v6556_v54, %v5352_v35  ;;  %v5357_v12 = vor.u32 %v6550_v2, %v5354_v3  ;;  %v5077_v35 = vor.u32 %v6479_v61, %v5074_v36  ;;  %v5024_v54 = vld [vmem:[%s9895_s10 + $0xe0] sm:$0xf]  ;;  %v6473_v2 = vld [vmem:[%s9895_s10 + $0x10c] sm:$0xf0]  ;;  %v6630_v61 = vld [vmem:[%s9895_s10 + $0x5f4] sm:$0xf0] }
 0x779   :  { %2741 = vmatpush.bf16.msra.mxu0 %v5593_v59  ;;  %2767 = vmatpush.bf16.msra.mxu2 %v5597_v1  ;;  %v5269_v59 = vor.u32 %v6527_v0, %v5266_v33  ;;  %v5216_v1 = vld [vmem:[%s9895_s10 + $0x260] sm:$0xf]  ;;  %v5506_v0 = vld [vmem:[%s9895_s10 + $0x4d0] sm:$0xf0]  ;;  %v6624_v36 = vld [vmem:[%s9895_s10 + $0x5cc] sm:$0xf] }
 0x77a   :  { %v5217_v58 = vor.u32 %v6521_v9, %v5216_v1  ;;  %v6581_v1 = vld [vmem:[%s9895_s10 + $0x46c] sm:$0xf0]  ;;  %v6575_v9 = vld [vmem:[%s9895_s10 + $0x444] sm:$0xf] }
 0x77b   :  { %2730 = vmatpush.bf16.msra.mxu3 %v5113_v13  ;;  %2756 = vmatpush.bf16.msra.mxu1 %v5117_v14  ;;  %v5218_v13 = vld [vmem:[%s9895_s10 + $0x290] sm:$0xf0]  ;;  %v5304_v14 = vld [vmem:[%s9895_s10 + $0x318] sm:$0xf] }
 0x77c   :  { %v5221_v5 = vor.u32 %v6515_v10, %v5218_v13  ;;  %v5305_v16 = vor.u32 %v6544_v15, %v5304_v14  ;;  %v5458_v10 = vld [vmem:[%s9895_s10 + $0x470] sm:$0xf0]  ;;  %v4976_v13 = vld [vmem:[%s9895_s10 + $0x80] sm:$0xf]  ;;  %v6461_v14 = vld [vmem:[%s9895_s10 + $0xac] sm:$0xf0] }
 0x77d   :  { %2742 = vmatpush.bf16.msra.mxu0 %v5545_v22  ;;  %2768 = vmatpush.bf16.msra.mxu2 %v5549_v4  ;;  %v6629_v22 = vld [vmem:[%s9895_s10 + $0x5ec] sm:$0xf0]  ;;  %v6623_v4 = vld [vmem:[%s9895_s10 + $0x5c4] sm:$0xf] }
 0x77e   :  { %v5649_v29 = vor.u32 %v6629_v22, %v5648_v21  ;;  %v5653_v31 = vor.u32 %v6623_v4, %v5650_v53  ;;  %v4978_v21 = vld [vmem:[%s9895_s10 + $0xb0] sm:$0xf0]  ;;  %v5408_v22 = vld [vmem:[%s9895_s10 + $0x3e0] sm:$0xf]  ;;  %v6569_v4 = vld [vmem:[%s9895_s10 + $0x40c] sm:$0xf0] }
 0x77f   :  { %2731 = vmatpush.bf16.msra.mxu3 %v5065_v18  ;;  %2757 = vmatpush.bf16.msra.mxu1 %v5069_v27  ;;  %v5309_v18 = vor.u32 %v6538_v17, %v5306_v57  ;;  %v5168_v27 = vld [vmem:[%s9895_s10 + $0x200] sm:$0xf]  ;;  %v5461_v17 = vor.u32 %v6575_v9, %v5458_v10  ;;  %v6455_v57 = vld [vmem:[%s9895_s10 + $0x84] sm:$0xf]  ;;  %v5610_v9 = vld [vmem:[%s9895_s10 + $0x598] sm:$0xf0] }
 0x780   :  { %v5169_v38 = vor.u32 %v6509_v28, %v5168_v27  ;;  %v6563_v53 = vld [vmem:[%s9895_s10 + $0x3e4] sm:$0xf]  ;;  %v6449_v27 = vld [vmem:[%s9895_s10 + $0x4c] sm:$0xf0] }
 0x781   :  { %2743 = vmatpush.bf16.msra.mxu0 %v5497_v24  ;;  %2769 = vmatpush.bf16.msra.mxu2 %v5501_v19  ;;  %v5170_v24 = vld [vmem:[%s9895_s10 + $0x230] sm:$0xf0]  ;;  %v5600_v19 = vld [vmem:[%s9895_s10 + $0x560] sm:$0xf]  ;;  %v6443_v28 = vld [vmem:[%s9895_s10 + $0x24] sm:$0xf] }
 0x782   :  { %v5601_v56 = vor.u32 %v6617_v25, %v5600_v19  ;;  %v6534_v19 = vld [vmem:[%s9895_s10 + $0x2f4] sm:$0xf0]  ;;  %v6528_v25 = vld [vmem:[%s9895_s10 + $0x2cc] sm:$0xf] }
 0x783   :  { %2732 = vmatpush.bf16.msra.mxu3 %v5017_v39  ;;  %2758 = vmatpush.bf16.msra.mxu1 %v5021_v40  ;;  %v5173_v39 = vor.u32 %v6503_v32, %v5170_v24  ;;  %v5120_v40 = vld [vmem:[%s9895_s10 + $0x1a0] sm:$0xf]  ;;  %v4930_v32 = vld [vmem:[%s9895_s10 + $0x50] sm:$0xf0]  ;;  %v5272_v24 = vld [vmem:[%s9895_s10 + $0x2c8] sm:$0xf] }
 0x784   :  { %v5121_v52 = vor.u32 %v6497_v41, %v5120_v40  ;;  %v5362_v40 = vld [vmem:[%s9895_s10 + $0x3b0] sm:$0xf0] }
 0x785   :  { %2744 = vmatpush.bf16.msra.mxu0 %v5449_v47  ;;  %2770 = vmatpush.bf16.msra.mxu2 %v5453_v48  ;;  %v5122_v47 = vld [vmem:[%s9895_s10 + $0x1d0] sm:$0xf0]  ;;  %v5552_v48 = vld [vmem:[%s9895_s10 + $0x500] sm:$0xf] }
 0x786   :  { %v5553_v34 = vor.u32 %v6605_v49, %v5552_v48  ;;  %v6522_v48 = vld [vmem:[%s9895_s10 + $0x294] sm:$0xf0]  ;;  %v6516_v49 = vld [vmem:[%s9895_s10 + $0x26c] sm:$0xf] }
 0x787   :  { %2733 = vmatpush.bf16.msra.mxu3 %v4969_v42  ;;  %2759 = vmatpush.bf16.msra.mxu1 %v4973_v45  ;;  %v5125_v42 = vor.u32 %v6491_v30, %v5122_v47  ;;  %v5072_v45 = vld [vmem:[%s9895_s10 + $0x140] sm:$0xf]  ;;  %v5277_v30 = vor.u32 %v6528_v25, %v5274_v20  ;;  %v5224_v47 = vld [vmem:[%s9895_s10 + $0x268] sm:$0xf]  ;;  %v5514_v25 = vld [vmem:[%s9895_s10 + $0x4d8] sm:$0xf0] }
 0x788   :  { %v5073_v33 = vor.u32 %v6485_v46, %v5072_v45  ;;  %v6545_v45 = vld [vmem:[%s9895_s10 + $0x34c] sm:$0xf0]  ;;  %v6539_v46 = vld [vmem:[%s9895_s10 + $0x324] sm:$0xf] }
 0x789   :  { %2745 = vmatpush.bf16.msra.mxu0 %v5401_v62  ;;  %2771 = vmatpush.bf16.msra.mxu2 %v5405_v63  ;;  %v6593_v62 = vld [vmem:[%s9895_s10 + $0x4cc] sm:$0xf0]  ;;  %v6587_v63 = vld [vmem:[%s9895_s10 + $0x4a4] sm:$0xf] }
 0x78a   :  { %v5505_v3 = vor.u32 %v6593_v62, %v5504_v44  ;;  %v5658_v44 = vld [vmem:[%s9895_s10 + $0x5f8] sm:$0xf0]  ;;  %v5225_v62 = vor.u32 %v6522_v48, %v5224_v47  ;;  %v6582_v47 = vld [vmem:[%s9895_s10 + $0x474] sm:$0xf0]  ;;  %v6576_v48 = vld [vmem:[%s9895_s10 + $0x44c] sm:$0xf] }
 0x78b   :  { %2734 = vmatpush.bf16.msra.mxu3 %v4921_v60  ;;  %2760 = vmatpush.bf16.msra.mxu1 %v4925_v6  ;;  %v5509_v60 = vor.u32 %v6587_v63, %v5506_v0  ;;  %v6467_v6 = vld [vmem:[%s9895_s10 + $0xe4] sm:$0xf] }
 0x78d   :  { %2746 = vmatpush.bf16.msra.mxu0 %v5353_v11  ;;  %2772 = vmatpush.bf16.msra.mxu2 %v5357_v12  ;;  %v5025_v11 = vor.u32 %v6473_v2, %v5024_v54  ;;  %v6510_v54 = vld [vmem:[%s9895_s10 + $0x234] sm:$0xf0] }
 0x78e   :  { %2735 = vmatmul.bf16.vlgmr.msra.gmra.mxu3 %v8028_v8  ;;  %2761 = vmatmul.bf16.vlgmr.msra.gmra.mxu1 %v8028_v8 }
 0x78f   :  { %2779 = vmatpush.bf16.msrb.mxu3 %v5265_v7  ;;  %2805 = vmatpush.bf16.msrb.mxu1 %v5269_v59  ;;  %v5026_v7 = vld [vmem:[%s9895_s10 + $0x110] sm:$0xf0]  ;;  %v5456_v59 = vld [vmem:[%s9895_s10 + $0x440] sm:$0xf] }
 0x790   :  { %v5029_v12 = vor.u32 %v6467_v6, %v5026_v7  ;;  %v5457_v15 = vor.u32 %v6581_v1, %v5456_v59  ;;  %v5178_v6 = vld [vmem:[%s9895_s10 + $0x238] sm:$0xf0]  ;;  %v5608_v7 = vld [vmem:[%s9895_s10 + $0x568] sm:$0xf]  ;;  %v6618_v59 = vld [vmem:[%s9895_s10 + $0x594] sm:$0xf0] }
 0x791   :  { %2747 = vmatpush.bf16.msra.mxu0 %v5305_v16  ;;  %2773 = vmatpush.bf16.msra.mxu2 %v5309_v18  ;;  %v4981_v16 = vor.u32 %v6455_v57, %v4978_v21  ;;  %v4928_v18 = vld [vmem:[%s9895_s10 + $0x20] sm:$0xf]  ;;  %v6612_v1 = vld [vmem:[%s9895_s10 + $0x56c] sm:$0xf]  ;;  %v5130_v57 = vld [vmem:[%s9895_s10 + $0x1d8] sm:$0xf0] }
 0x792   :  { %v4929_v41 = vor.u32 %v6449_v27, %v4928_v18  ;;  %v5560_v21 = vld [vmem:[%s9895_s10 + $0x508] sm:$0xf]  ;;  %v6486_v18 = vld [vmem:[%s9895_s10 + $0x174] sm:$0xf0] }
 0x793   :  { %2780 = vmatpush.bf16.msrb.mxu3 %v5217_v58  ;;  %2806 = vmatpush.bf16.msrb.mxu1 %v5221_v5  ;;  %v5410_v58 = vld [vmem:[%s9895_s10 + $0x410] sm:$0xf0]  ;;  %v4977_v5 = vor.u32 %v6461_v14, %v4976_v13  ;;  %v6498_v13 = vld [vmem:[%s9895_s10 + $0x1d4] sm:$0xf0]  ;;  %v5609_v14 = vor.u32 %v6618_v59, %v5608_v7  ;;  %v6552_v59 = vld [vmem:[%s9895_s10 + $0x38c] sm:$0xf] }
 0x794   :  { %2748 = vmatmul.bf16.vlgmr.msra.gmra.mxu0 %v8068_v23  ;;  %2774 = vmatmul.bf16.vlgmr.msra.gmra.mxu2 %v8068_v23  ;;  %v6558_v7 = vld [vmem:[%s9895_s10 + $0x3b4] sm:$0xf0] }
 0x795   :  { %2792 = vmatpush.bf16.msrb.mxu0 %v5649_v29  ;;  %2818 = vmatpush.bf16.msrb.mxu2 %v5653_v31  ;;  %v5409_v29 = vor.u32 %v6569_v4, %v5408_v22  ;;  %v5413_v31 = vor.u32 %v6563_v53, %v5410_v58  ;;  %v6606_v22 = vld [vmem:[%s9895_s10 + $0x534] sm:$0xf0]  ;;  %v6600_v4 = vld [vmem:[%s9895_s10 + $0x50c] sm:$0xf]  ;;  %v5562_v53 = vld [vmem:[%s9895_s10 + $0x538] sm:$0xf0] }
 0x796   :  { %v5561_v27 = vor.u32 %v6606_v22, %v5560_v21  ;;  %v5322_v21 = vld [vmem:[%s9895_s10 + $0x358] sm:$0xf0] }
 0x797   :  { %2781 = vmatpush.bf16.msrb.mxu3 %v5169_v38  ;;  %2807 = vmatpush.bf16.msrb.mxu1 %v5173_v39  ;;  %v6557_v38 = vld [vmem:[%s9895_s10 + $0x3ac] sm:$0xf0]  ;;  %v6551_v39 = vld [vmem:[%s9895_s10 + $0x384] sm:$0xf] }
 0x798   :  { %v5361_v50 = vor.u32 %v6557_v38, %v5360_v37  ;;  %v5365_v51 = vor.u32 %v6551_v39, %v5362_v40  ;;  %v5032_v38 = vld [vmem:[%s9895_s10 + $0xe8] sm:$0xf]  ;;  %v6474_v39 = vld [vmem:[%s9895_s10 + $0x114] sm:$0xf0] }
 0x799   :  { %2793 = vmatpush.bf16.msrb.mxu0 %v5601_v56  ;;  %2819 = vmatpush.bf16.msrb.mxu2 %v5605_v43  ;;  %v4933_v56 = vor.u32 %v6443_v28, %v4930_v32  ;;  %v5273_v43 = vor.u32 %v6534_v19, %v5272_v24  ;;  %v5565_v28 = vor.u32 %v6600_v4, %v5562_v53  ;;  %v5512_v32 = vld [vmem:[%s9895_s10 + $0x4a8] sm:$0xf]  ;;  %v6594_v24 = vld [vmem:[%s9895_s10 + $0x4d4] sm:$0xf0]  ;;  %v6588_v19 = vld [vmem:[%s9895_s10 + $0x4ac] sm:$0xf] }
 0x79a   :  { %v5513_v40 = vor.u32 %v6594_v24, %v5512_v32 }
 0x79b   :  { %2782 = vmatpush.bf16.msrb.mxu3 %v5121_v52  ;;  %2808 = vmatpush.bf16.msrb.mxu1 %v5125_v42  ;;  %v5226_v52 = vld [vmem:[%s9895_s10 + $0x298] sm:$0xf0]  ;;  %v5312_v42 = vld [vmem:[%s9895_s10 + $0x320] sm:$0xf] }
 0x79c   :  { %v5229_v63 = vor.u32 %v6516_v49, %v5226_v52  ;;  %v5313_v0 = vor.u32 %v6545_v45, %v5312_v42  ;;  %v5466_v49 = vld [vmem:[%s9895_s10 + $0x478] sm:$0xf0]  ;;  %v4984_v52 = vld [vmem:[%s9895_s10 + $0x88] sm:$0xf]  ;;  %v6462_v42 = vld [vmem:[%s9895_s10 + $0xb4] sm:$0xf0] }
 0x79d   :  { %2794 = vmatpush.bf16.msrb.mxu0 %v5553_v34  ;;  %2820 = vmatpush.bf16.msrb.mxu2 %v5557_v55  ;;  %v5314_v34 = vld [vmem:[%s9895_s10 + $0x350] sm:$0xf0]  ;;  %v5656_v55 = vld [vmem:[%s9895_s10 + $0x5c8] sm:$0xf] }
 0x79e   :  { %v5657_v2 = vor.u32 %v6630_v61, %v5656_v55  ;;  %v4986_v55 = vld [vmem:[%s9895_s10 + $0xb8] sm:$0xf0]  ;;  %v5416_v61 = vld [vmem:[%s9895_s10 + $0x3e8] sm:$0xf] }
 0x79f   :  { %2783 = vmatpush.bf16.msrb.mxu3 %v5073_v33  ;;  %2809 = vmatpush.bf16.msrb.mxu1 %v5077_v35  ;;  %v5317_v33 = vor.u32 %v6539_v46, %v5314_v34  ;;  %v5176_v35 = vld [vmem:[%s9895_s10 + $0x208] sm:$0xf]  ;;  %v5469_v46 = vor.u32 %v6576_v48, %v5466_v49  ;;  %v6456_v34 = vld [vmem:[%s9895_s10 + $0x8c] sm:$0xf]  ;;  %v6701_v48 = vld [vmem:[%s9896_s11 + $0x230] sm:$0xf0] }
 0x7a0   :  { %v5177_v10 = vor.u32 %v6510_v54, %v5176_v35  ;;  %v6450_v35 = vld [vmem:[%s9895_s10 + $0x54] sm:$0xf0]  ;;  %v5736_v49 = vld [vmem:[%s9896_s11 + $0x90] sm:$0xf] }
 0x7a1   :  { %2795 = vmatpush.bf16.msrb.mxu0 %v5505_v3  ;;  %2821 = vmatpush.bf16.msrb.mxu2 %v5509_v60  ;;  %v5661_v3 = vor.u32 %v6624_v36, %v5658_v44  ;;  %v6504_v60 = vld [vmem:[%s9895_s10 + $0x20c] sm:$0xf]  ;;  %v6570_v36 = vld [vmem:[%s9895_s10 + $0x414] sm:$0xf0] }
 0x7a2   :  { %v6564_v44 = vld [vmem:[%s9895_s10 + $0x3ec] sm:$0xf]  ;;  %v5417_v54 = vor.u32 %v6570_v36, %v5416_v61 }
 0x7a3   :  { %2784 = vmatpush.bf16.msrb.mxu3 %v5025_v11  ;;  %2810 = vmatpush.bf16.msrb.mxu1 %v5029_v12  ;;  %v5181_v11 = vor.u32 %v6504_v60, %v5178_v6  ;;  %v5128_v12 = vld [vmem:[%s9895_s10 + $0x1a8] sm:$0xf]  ;;  %v4938_v60 = vld [vmem:[%s9895_s10 + $0x58] sm:$0xf0] }
 0x7a4   :  { %v5129_v58 = vor.u32 %v6498_v13, %v5128_v12  ;;  %v5368_v6 = vld [vmem:[%s9895_s10 + $0x388] sm:$0xf] }
 0x7a5   :  { %2796 = vmatpush.bf16.msrb.mxu0 %v5457_v15  ;;  %2822 = vmatpush.bf16.msrb.mxu2 %v5461_v17  ;;  %v5613_v15 = vor.u32 %v6612_v1, %v5610_v9  ;;  %v6492_v17 = vld [vmem:[%s9895_s10 + $0x1ac] sm:$0xf]  ;;  %v5370_v1 = vld [vmem:[%s9895_s10 + $0x3b8] sm:$0xf0]  ;;  %v8793_v9 = vpop.f32.mrf.mxu0  ;;  %v5369_v13 = vor.u32 %v6558_v7, %v5368_v6 }
 0x7a7   :  { %2785 = vmatpush.bf16.msrb.mxu3 %v4977_v5  ;;  %2811 = vmatpush.bf16.msrb.mxu1 %v4981_v16  ;;  %v5133_v5 = vor.u32 %v6492_v17, %v5130_v57  ;;  %v5080_v16 = vld [vmem:[%s9895_s10 + $0x148] sm:$0xf]  ;;  %v6546_v17 = vld [vmem:[%s9895_s10 + $0x354] sm:$0xf0]  ;;  %v6540_v57 = vld [vmem:[%s9895_s10 + $0x32c] sm:$0xf] }
 0x7a8   :  { %v5081_v20 = vor.u32 %v6486_v18, %v5080_v16  ;;  %v5325_v4 = vor.u32 %v6540_v57, %v5322_v21  ;;  %v8820_v16 = vld [vmem:[%s9890_s5 + $0x8] sm:$0xff] }
 0x7a9   :  { %2797 = vmatpush.bf16.msrb.mxu0 %v5409_v29  ;;  %2823 = vmatpush.bf16.msrb.mxu2 %v5413_v31  ;;  %v6480_v29 = vld [vmem:[%s9895_s10 + $0x14c] sm:$0xf]  ;;  %v5082_v31 = vld [vmem:[%s9895_s10 + $0x178] sm:$0xf0]  ;;  %v1587_v18 = vperm.slane %v8820_v16, 0 }
 0x7aa   :  { %v5085_v37 = vor.u32 %v6480_v29, %v5082_v31 }
 0x7ab   :  { %2786 = vmatpush.bf16.msrb.mxu3 %v4929_v41  ;;  %2812 = vmatpush.bf16.msrb.mxu1 %v4933_v56  ;;  %v5517_v41 = vor.u32 %v6588_v19, %v5514_v25  ;;  %v6468_v56 = vld [vmem:[%s9895_s10 + $0xec] sm:$0xf] }
 0x7ad   :  { %2798 = vmatpush.bf16.msrb.mxu0 %v5361_v50  ;;  %2824 = vmatpush.bf16.msrb.mxu2 %v5365_v51  ;;  %v5033_v50 = vor.u32 %v6474_v39, %v5032_v38  ;;  %v8811_v53 = vpop.f32.mrf.mxu0  ;;  %v1589_v38 = vperm.slane %v8820_v16, 2 }
 0x7ae   :  { %2787 = vmatmul.bf16.vlgmr.msrb.gmra.mxu3 %v8028_v8  ;;  %2813 = vmatmul.bf16.vlgmr.msrb.gmra.mxu1 %v8028_v8 }
 0x7af   :  { %2831 = vmatpush.bf16.msra.mxu3 %v5273_v43  ;;  %2857 = vmatpush.bf16.msra.mxu1 %v5277_v30  ;;  %v5034_v43 = vld [vmem:[%s9895_s10 + $0x118] sm:$0xf0]  ;;  %v5464_v30 = vld [vmem:[%s9895_s10 + $0x448] sm:$0xf] }
 0x7b0   :  { %v5037_v51 = vor.u32 %v6468_v56, %v5034_v43  ;;  %v5465_v45 = vor.u32 %v6582_v47, %v5464_v30  ;;  %v5940_v56 = vld [vmem:[%s9896_s11 + $0x228] sm:$0xf] }
 0x7b1   :  { %2799 = vmatpush.bf16.msrb.mxu0 %v5313_v0  ;;  %2825 = vmatpush.bf16.msrb.mxu2 %v5317_v33  ;;  %v4989_v0 = vor.u32 %v6456_v34, %v4986_v55  ;;  %v4936_v33 = vld [vmem:[%s9895_s10 + $0x28] sm:$0xf] }
 0x7b3   :  { %2832 = vmatpush.bf16.msra.mxu3 %v5225_v62  ;;  %2858 = vmatpush.bf16.msra.mxu1 %v5229_v63  ;;  %v5418_v62 = vld [vmem:[%s9895_s10 + $0x418] sm:$0xf0]  ;;  %v4985_v63 = vor.u32 %v6462_v42, %v4984_v52  ;;  %v5941_v42 = vor.u32 %v6701_v48, %v5940_v56  ;;  %v6641_v56 = vld [vmem:[%s9896_s11 + $0x50] sm:$0xf0] }
 0x7b4   :  { %2800 = vmatmul.bf16.vlgmr.msrb.gmra.mxu0 %v8068_v23  ;;  %2826 = vmatmul.bf16.vlgmr.msrb.gmra.mxu2 %v8068_v23 }
 0x7b5   :  { %2844 = vmatpush.bf16.msra.mxu0 %v5657_v2  ;;  %2870 = vmatpush.bf16.msra.mxu2 %v5661_v3  ;;  %v5421_v2 = vor.u32 %v6564_v44, %v5418_v62  ;;  %v6444_v3 = vld [vmem:[%s9895_s10 + $0x2c] sm:$0xf] }
 0x7b6   :  { %v4941_v12 = vor.u32 %v6444_v3, %v4938_v60  ;;  %v5724_v3 = vld [vmem:[%s9896_s11 + $0x78] sm:$0xf]  ;;  %v6647_v60 = vld [vmem:[%s9896_s11 + $0x80] sm:$0xf0] }
 0x7b7   :  { %2833 = vmatpush.bf16.msra.mxu3 %v5177_v10  ;;  %2859 = vmatpush.bf16.msra.mxu1 %v5181_v11  ;;  %v8795_v10 = vpop.f32.mrf.mxu3  ;;  %v4937_v11 = vor.u32 %v6450_v35, %v4936_v33  ;;  %v6036_v33 = vld [vmem:[%s9896_s11 + $0x2e8] sm:$0xf] }
 0x7b9   :  { %2845 = vmatpush.bf16.msra.mxu0 %v5609_v14  ;;  %2871 = vmatpush.bf16.msra.mxu2 %v5613_v15  ;;  %v5373_v14 = vor.u32 %v6552_v59, %v5370_v1  ;;  %v5320_v15 = vld [vmem:[%s9895_s10 + $0x328] sm:$0xf]  ;;  %v5725_v1 = vor.u32 %v6647_v60, %v5724_v3  ;;  %v5880_v60 = vld [vmem:[%s9896_s11 + $0x1b0] sm:$0xf] }
 0x7ba   :  { %v5321_v22 = vor.u32 %v6546_v17, %v5320_v15  ;;  %v6695_v15 = vld [vmem:[%s9896_s11 + $0x200] sm:$0xf0]  ;;  %v6024_v17 = vld [vmem:[%s9896_s11 + $0x2d0] sm:$0xf] }
 0x7bb   :  { %2834 = vmatpush.bf16.msra.mxu3 %v5129_v58  ;;  %2860 = vmatpush.bf16.msra.mxu1 %v5133_v5 }
 0x7bd   :  { %2846 = vmatpush.bf16.msra.mxu0 %v5561_v27  ;;  %2872 = vmatpush.bf16.msra.mxu2 %v5565_v28  ;;  %v1588_v28 = vperm.slane %v8820_v16, 1 }
 0x7bf   :  { %2835 = vmatpush.bf16.msra.mxu3 %v5081_v20  ;;  %2861 = vmatpush.bf16.msra.mxu1 %v5085_v37  ;;  %v8813_v58 = vpop.f32.mrf.mxu3 }
 0x7c1   :  { %2847 = vmatpush.bf16.msra.mxu0 %v5513_v40  ;;  %2873 = vmatpush.bf16.msra.mxu2 %v5517_v41  ;;  %v5748_v40 = vld [vmem:[%s9896_s11 + $0xa8] sm:$0xf]  ;;  %v6653_v41 = vld [vmem:[%s9896_s11 + $0xb0] sm:$0xf0] }
 0x7c2   :  { %v5749_v47 = vor.u32 %v6653_v41, %v5748_v40  ;;  %v5700_v41 = vld [vmem:[%s9896_s11 + $0x48] sm:$0xf] }
 0x7c3   :  { %2836 = vmatpush.bf16.msra.mxu3 %v5033_v50  ;;  %2862 = vmatpush.bf16.msra.mxu1 %v5037_v51  ;;  %v6650_v50 = vld [vmem:[%s9896_s11 + $0x98] sm:$0xf0]  ;;  %v1590_v51 = vperm.slane %v8820_v16, 3 }
 0x7c4   :  { %v5737_v55 = vor.u32 %v6650_v50, %v5736_v49  ;;  %v5701_v49 = vor.u32 %v6641_v56, %v5700_v41  ;;  %v6668_v50 = vld [vmem:[%s9896_s11 + $0x128] sm:$0xf0]  ;;  %v5964_v41 = vld [vmem:[%s9896_s11 + $0x258] sm:$0xf] }
 0x7c5   :  { %2848 = vmatpush.bf16.msra.mxu0 %v5465_v45  ;;  %2874 = vmatpush.bf16.msra.mxu2 %v5469_v46  ;;  %v5844_v45 = vld [vmem:[%s9896_s11 + $0x168] sm:$0xf]  ;;  %v6677_v46 = vld [vmem:[%s9896_s11 + $0x170] sm:$0xf0] }
 0x7c6   :  { %v5845_v61 = vor.u32 %v6677_v46, %v5844_v45  ;;  %v6689_v45 = vld [vmem:[%s9896_s11 + $0x1d0] sm:$0xf0]  ;;  %v6000_v46 = vld [vmem:[%s9896_s11 + $0x2a0] sm:$0xf] }
 0x7c7   :  { %2837 = vmatpush.bf16.msra.mxu3 %v4985_v63  ;;  %2863 = vmatpush.bf16.msra.mxu1 %v4989_v0  ;;  %v5928_v63 = vld [vmem:[%s9896_s11 + $0x210] sm:$0xf]  ;;  %v6698_v0 = vld [vmem:[%s9896_s11 + $0x218] sm:$0xf0] }
 0x7c9   :  { %2849 = vmatpush.bf16.msra.mxu0 %v5417_v54  ;;  %2875 = vmatpush.bf16.msra.mxu2 %v5421_v2  ;;  %v5929_v54 = vor.u32 %v6698_v0, %v5928_v63  ;;  %v6725_v2 = vld [vmem:[%s9896_s11 + $0x2f0] sm:$0xf0]  ;;  %v6638_v63 = vld [vmem:[%s9896_s11 + $0x38] sm:$0xf0]  ;;  %v5796_v0 = vld [vmem:[%s9896_s11 + $0x108] sm:$0xf] }
 0x7ca   :  { %v6037_v59 = vor.u32 %v6725_v2, %v6036_v33 }
 0x7cb   :  { %2838 = vmatpush.bf16.msra.mxu3 %v4937_v11  ;;  %2864 = vmatpush.bf16.msra.mxu1 %v4941_v12  ;;  %v2606_v5 = vpop.f32.mrf.mxu1  ;;  %v5832_v11 = vld [vmem:[%s9896_s11 + $0x150] sm:$0xf]  ;;  %v6674_v12 = vld [vmem:[%s9896_s11 + $0x158] sm:$0xf0] }
 0x7cc   :  { %v2607_v24 = vadd.f32 %v2606_v5, %v1588_v28  ;;  %v5712_v5 = vld [vmem:[%s9896_s11 + $0x60] sm:$0xf] }
 0x7cd   :  { %2850 = vmatpush.bf16.msra.mxu0 %v5369_v13  ;;  %2876 = vmatpush.bf16.msra.mxu2 %v5373_v14  ;;  %v5916_v13 = vld [vmem:[%s9896_s11 + $0x1f8] sm:$0xf]  ;;  %v5833_v14 = vor.u32 %v6674_v12, %v5832_v11  ;;  %v6713_v11 = vld [vmem:[%s9896_s11 + $0x290] sm:$0xf0] }
 0x7ce   :  { %2839 = vmatmul.bf16.vlgmr.msra.gmra.mxu3 %v8028_v8  ;;  %2865 = vmatmul.bf16.vlgmr.msra.gmra.mxu1 %v8028_v8  ;;  %v5917_v21 = vor.u32 %v6695_v15, %v5916_v13  ;;  %v5676_v15 = vld [vmem:[%s9896_s11 + $0x18] sm:$0xf] }
 0x7cf   :  { %3867 = vmatpush.bf16.msrb.mxu3 %v5749_v47  ;;  %3893 = vmatpush.bf16.msrb.mxu1 %v5941_v42  ;;  %v5892_v42 = vld [vmem:[%s9896_s11 + $0x1c8] sm:$0xf] }
 0x7d1   :  { %2851 = vmatpush.bf16.msra.mxu0 %v5321_v22  ;;  %2877 = vmatpush.bf16.msra.mxu2 %v5325_v4  ;;  %v2580_v27 = vpop.f32.mrf.mxu3  ;;  %v2593_v8 = vpop.f32.mrf.mxu0  ;;  %v6722_v22 = vld [vmem:[%s9896_s11 + $0x2d8] sm:$0xf0] }
 0x7d2   :  { %v2581_v29 = vadd.f32 %v2580_v27, %v1587_v18  ;;  %v6025_v4 = vor.u32 %v6722_v22, %v6024_v17  ;;  %v6644_v18 = vld [vmem:[%s9896_s11 + $0x68] sm:$0xf0]  ;;  %v5820_v27 = vld [vmem:[%s9896_s11 + $0x138] sm:$0xf]  ;;  %v6635_v17 = vld [vmem:[%s9896_s11 + $0x20] sm:$0xf0] }
 0x7d3   :  { %v2608_v31 = vpop.f32.mrf.mxu1  ;;  %3868 = vmatpush.bf16.msrb.mxu3 %v5737_v55  ;;  %3894 = vmatpush.bf16.msrb.mxu1 %v5929_v54  ;;  %v5713_v28 = vor.u32 %v6644_v18, %v5712_v5  ;;  %v5893_v55 = vor.u32 %v6689_v45, %v5892_v42  ;;  %v6665_v54 = vld [vmem:[%s9896_s11 + $0x110] sm:$0xf0]  ;;  %v5677_v22 = vor.u32 %v6635_v17, %v5676_v15  ;;  %v5868_v18 = vld [vmem:[%s9896_s11 + $0x198] sm:$0xf]  ;;  %v5760_v42 = vld [vmem:[%s9896_s11 + $0xc0] sm:$0xf] }
 0x7d4   :  { %2852 = vmatmul.bf16.vlgmr.msra.gmra.mxu0 %v8068_v23  ;;  %2878 = vmatmul.bf16.vlgmr.msra.gmra.mxu2 %v8068_v23  ;;  %v8824_v32 = vadd.f32 %v2593_v8, %v2581_v29  ;;  %v1591_v8 = vperm.slane %v8820_v16, 4  ;;  %v6671_v29 = vld [vmem:[%s9896_s11 + $0x140] sm:$0xf0]  ;;  %v5797_v3 = vor.u32 %v6665_v54, %v5796_v0  ;;  %v6746_v0 = vld [vmem:[%s9896_s11 + $0x398] sm:$0xf0] }
 0x7d5   :  { %3880 = vmatpush.bf16.msrb.mxu0 %v5845_v61  ;;  %3906 = vmatpush.bf16.msrb.mxu2 %v6037_v59  ;;  %v6716_v61 = vld [vmem:[%s9896_s11 + $0x2a8] sm:$0xf0]  ;;  %v6216_v15 = vld [vmem:[%s9896_s11 + $0x450] sm:$0xf]  ;;  %v6770_v17 = vld [vmem:[%s9896_s11 + $0x458] sm:$0xf0] }
 0x7d7   :  { %v2619_v19 = vpop.f32.mrf.mxu2  ;;  %3869 = vmatpush.bf16.msrb.mxu3 %v5725_v1  ;;  %3895 = vmatpush.bf16.msrb.mxu1 %v5917_v21 }
 0x7d8   :  { %v8826_v25 = vadd.f32 %v2619_v19, %v2607_v24  ;;  %v5821_v24 = vor.u32 %v6671_v29, %v5820_v27  ;;  %v5904_v19 = vld [vmem:[%s9896_s11 + $0x1e0] sm:$0xf]  ;;  %v6683_v27 = vld [vmem:[%s9896_s11 + $0x1a0] sm:$0xf0]  ;;  %v6710_v29 = vld [vmem:[%s9896_s11 + $0x278] sm:$0xf0] }
 0x7d9   :  { %v2582_v23 = vpop.f32.mrf.mxu3  ;;  %v2595_v20 = vpop.f32.mrf.mxu0  ;;  %3881 = vmatpush.bf16.msrb.mxu0 %v5833_v14  ;;  %3907 = vmatpush.bf16.msrb.mxu2 %v6025_v4  ;;  %v6662_v4 = vld [vmem:[%s9896_s11 + $0xf8] sm:$0xf0] }
 0x7da   :  { %v6692_v23 = vld [vmem:[%s9896_s11 + $0x1e8] sm:$0xf0]  ;;  %v6012_v20 = vld [vmem:[%s9896_s11 + $0x2b8] sm:$0xf] }
 0x7db   :  { %v2658_v37 = vpop.f32.mrf.mxu1  ;;  %3870 = vmatpush.bf16.msrb.mxu3 %v5713_v28  ;;  %v5976_v28 = vld [vmem:[%s9896_s11 + $0x270] sm:$0xf] }
 0x7dc   :  { %v2659_v44 = vadd.f32 %v2658_v37, %v1590_v51  ;;  %v5905_v37 = vor.u32 %v6692_v23, %v5904_v19  ;;  %v6632_v19 = vld [vmem:[%s9896_s11 + $0x8] sm:$0xf0]  ;;  %v5772_v23 = vld [vmem:[%s9896_s11 + $0xd8] sm:$0xf] }
 0x7dd   :  { %3882 = vmatpush.bf16.msrb.mxu0 %v5821_v24  ;;  %v5664_v24 = vld [vmem:[%s9896_s11] sm:$0xf] }
 0x7de   :  { %3896 = vmatpush.bf16.msrb.mxu1 %v5905_v37  ;;  %v6659_v37 = vld [vmem:[%s9896_s11 + $0xe0] sm:$0xf0] }
 0x7df   :  { %v2621_v39 = vpop.f32.mrf.mxu2  ;;  %3871 = vmatpush.bf16.msrb.mxu3 %v5701_v49 }
 0x7e1   :  { %v2632_v43 = vpop.f32.mrf.mxu3  ;;  %v2645_v30 = vpop.f32.mrf.mxu0 }
 0x7e2   :  { %v2633_v52 = vadd.f32 %v2632_v43, %v1589_v38  ;;  %v6719_v38 = vld [vmem:[%s9896_s11 + $0x2c0] sm:$0xf0]  ;;  %v5808_v43 = vld [vmem:[%s9896_s11 + $0x120] sm:$0xf]  ;;  %3897 = vmatpush.bf16.msrb.mxu1 %v5893_v55 }
 0x7e3   :  { %v2660_v34 = vpop.f32.mrf.mxu1  ;;  %v6013_v40 = vor.u32 %v6719_v38, %v6012_v20  ;;  %v5665_v20 = vor.u32 %v6632_v19, %v5664_v24  ;;  %v5773_v38 = vor.u32 %v6659_v37, %v5772_v23  ;;  %v6204_v19 = vld [vmem:[%s9896_s11 + $0x438] sm:$0xf]  ;;  %v6767_v23 = vld [vmem:[%s9896_s11 + $0x440] sm:$0xf0] }
 0x7e4   :  { %v8854_v36 = vadd.f32 %v2645_v30, %v2633_v52  ;;  %v1592_v30 = vperm.slane %v8820_v16, 5  ;;  %v5809_v52 = vor.u32 %v6668_v50, %v5808_v43 }
 0x7e5   :  { %3908 = vmatpush.bf16.msrb.mxu2 %v6013_v40  ;;  %v6680_v40 = vld [vmem:[%s9896_s11 + $0x188] sm:$0xf0] }
 0x7e6   :  { %3883 = vmatpush.bf16.msrb.mxu0 %v5809_v52  ;;  %v5750_v52 = vld [vmem:[%s9896_s11 + $0xb4] sm:$0xf0] }
 0x7e7   :  { %v2671_v62 = vpop.f32.mrf.mxu2 }
 0x7e8   :  { %v8865_v35 = vadd.f32 %v2671_v62, %v2659_v44  ;;  %v6001_v44 = vor.u32 %v6716_v61, %v6000_v46  ;;  %v5688_v62 = vld [vmem:[%s9896_s11 + $0x30] sm:$0xf]  ;;  %v6656_v46 = vld [vmem:[%s9896_s11 + $0xc8] sm:$0xf0]  ;;  %v5952_v61 = vld [vmem:[%s9896_s11 + $0x240] sm:$0xf] }
 0x7e9   :  { %v2634_v6 = vpop.f32.mrf.mxu3  ;;  %v2647_v7 = vpop.f32.mrf.mxu0  ;;  %v5689_v33 = vor.u32 %v6638_v63, %v5688_v62  ;;  %v5761_v55 = vor.u32 %v6656_v46, %v5760_v42  ;;  %v6120_v63 = vld [vmem:[%s9896_s11 + $0x390] sm:$0xf]  ;;  %v5702_v42 = vld [vmem:[%s9896_s11 + $0x54] sm:$0xf0] }
 0x7ea   :  { %3909 = vmatpush.bf16.msrb.mxu2 %v6001_v44  ;;  %v6686_v6 = vld [vmem:[%s9896_s11 + $0x1b8] sm:$0xf0]  ;;  %v5988_v7 = vld [vmem:[%s9896_s11 + $0x288] sm:$0xf]  ;;  %3884 = vmatpush.bf16.msrb.mxu0 %v5797_v3  ;;  %v6704_v44 = vld [vmem:[%s9896_s11 + $0x248] sm:$0xf0]  ;;  %v6121_v54 = vor.u32 %v6746_v0, %v6120_v63 }
 0x7eb   :  { %v2710_v57 = vpop.f32.mrf.mxu1  ;;  %3872 = vmatpush.bf16.msrb.mxu3 %v5689_v33  ;;  %v5881_v1 = vor.u32 %v6686_v6, %v5880_v60  ;;  %v5989_v14 = vor.u32 %v6713_v11, %v5988_v7  ;;  %v5953_v62 = vor.u32 %v6704_v44, %v5952_v61  ;;  %v6228_v33 = vld [vmem:[%s9896_s11 + $0x468] sm:$0xf]  ;;  %v6649_v3 = vld [vmem:[%s9896_s11 + $0x94] sm:$0xf]  ;;  %v5738_v60 = vld [vmem:[%s9896_s11 + $0x9c] sm:$0xf0] }
 0x7ec   :  { %v2711_v2 = vadd.f32 %v2710_v57, %v1592_v30  ;;  %v5784_v57 = vld [vmem:[%s9896_s11 + $0xf0] sm:$0xf]  ;;  %v6707_v30 = vld [vmem:[%s9896_s11 + $0x260] sm:$0xf0]  ;;  %v5741_v7 = vor.u32 %v6649_v3, %v5738_v60  ;;  %v6108_v11 = vld [vmem:[%s9896_s11 + $0x378] sm:$0xf] }
 0x7ed   :  { %3898 = vmatpush.bf16.msrb.mxu1 %v5881_v1  ;;  %v5785_v5 = vor.u32 %v6662_v4, %v5784_v57  ;;  %v5965_v49 = vor.u32 %v6707_v30, %v5964_v41  ;;  %v5846_v1 = vld [vmem:[%s9896_s11 + $0x174] sm:$0xf0]  ;;  %v6646_v4 = vld [vmem:[%s9896_s11 + $0x7c] sm:$0xf]  ;;  %v5810_v61 = vld [vmem:[%s9896_s11 + $0x12c] sm:$0xf0] }
 0x7ee   :  { %3910 = vmatpush.bf16.msrb.mxu2 %v5989_v14  ;;  %v6743_v14 = vld [vmem:[%s9896_s11 + $0x380] sm:$0xf0]  ;;  %v6670_v41 = vld [vmem:[%s9896_s11 + $0x13c] sm:$0xf]  ;;  %v1593_v44 = vperm.slane %v8820_v16, 6 }
 0x7ef   :  { %v2673_v31 = vpop.f32.mrf.mxu2  ;;  %3873 = vmatpush.bf16.msrb.mxu3 %v5677_v22  ;;  %3885 = vmatpush.bf16.msrb.mxu0 %v5785_v5  ;;  %v6217_v22 = vor.u32 %v6770_v17, %v6216_v15  ;;  %v5726_v5 = vld [vmem:[%s9896_s11 + $0x84] sm:$0xf0]  ;;  %v6072_v0 = vld [vmem:[%s9896_s11 + $0x330] sm:$0xf]  ;;  %v6761_v3 = vld [vmem:[%s9896_s11 + $0x410] sm:$0xf0] }
 0x7f0   :  { %v5977_v31 = vor.u32 %v6710_v29, %v5976_v28  ;;  %v6096_v29 = vld [vmem:[%s9896_s11 + $0x360] sm:$0xf]  ;;  %v6637_v60 = vld [vmem:[%s9896_s11 + $0x34] sm:$0xf] }
 0x7f1   :  { %v2684_v39 = vpop.f32.mrf.mxu3  ;;  %v2697_v48 = vpop.f32.mrf.mxu0 }
 0x7f2   :  { %v2685_v47 = vadd.f32 %v2684_v39, %v1591_v8  ;;  %v5869_v8 = vor.u32 %v6683_v27, %v5868_v18  ;;  %3911 = vmatpush.bf16.msrb.mxu2 %v5977_v31  ;;  %v5856_v39 = vld [vmem:[%s9896_s11 + $0x180] sm:$0xf]  ;;  %v6673_v18 = vld [vmem:[%s9896_s11 + $0x154] sm:$0xf]  ;;  %v5729_v27 = vor.u32 %v6646_v4, %v5726_v5  ;;  %v6740_v31 = vld [vmem:[%s9896_s11 + $0x368] sm:$0xf0] }
 0x7f3   :  { %v2712_v51 = vpop.f32.mrf.mxu1  ;;  %3874 = vmatpush.bf16.msrb.mxu3 %v5665_v20  ;;  %v5857_v43 = vor.u32 %v6680_v40, %v5856_v39  ;;  %3886 = vmatpush.bf16.msrb.mxu0 %v5773_v38  ;;  %v6097_v24 = vor.u32 %v6740_v31, %v6096_v29  ;;  %v6205_v38 = vor.u32 %v6767_v23, %v6204_v19  ;;  %v6643_v39 = vld [vmem:[%s9896_s11 + $0x64] sm:$0xf]  ;;  %v5714_v40 = vld [vmem:[%s9896_s11 + $0x6c] sm:$0xf0]  ;;  %v5786_v19 = vld [vmem:[%s9896_s11 + $0xfc] sm:$0xf0] }
 0x7f4   :  { %v8941_v34 = vadd.f32 %v2697_v48, %v2685_v47  ;;  %3899 = vmatpush.bf16.msrb.mxu1 %v5869_v8  ;;  %v6132_v47 = vld [vmem:[%s9896_s11 + $0x3a8] sm:$0xf]  ;;  %v6749_v48 = vld [vmem:[%s9896_s11 + $0x3b0] sm:$0xf0]  ;;  %v6652_v51 = vld [vmem:[%s9896_s11 + $0xac] sm:$0xf] }
 0x7f5   :  { %v6133_v50 = vor.u32 %v6749_v48, %v6132_v47  ;;  %v5753_v45 = vor.u32 %v6652_v51, %v5750_v52  ;;  %v5834_v8 = vld [vmem:[%s9896_s11 + $0x15c] sm:$0xf0]  ;;  %v6084_v47 = vld [vmem:[%s9896_s11 + $0x348] sm:$0xf]  ;;  %v6737_v48 = vld [vmem:[%s9896_s11 + $0x350] sm:$0xf0] }
 0x7f6   :  { %3912 = vmatpush.bf16.msrb.mxu2 %v5965_v49  ;;  %v5837_v28 = vor.u32 %v6673_v18, %v5834_v8  ;;  %v6192_v49 = vld [vmem:[%s9896_s11 + $0x420] sm:$0xf]  ;;  %v6764_v51 = vld [vmem:[%s9896_s11 + $0x428] sm:$0xf0]  ;;  %v6731_v4 = vld [vmem:[%s9896_s11 + $0x320] sm:$0xf0] }
 0x7f7   :  { %v2723_v59 = vpop.f32.mrf.mxu2  ;;  %3919 = vmatpush.bf16.msra.mxu3 %v6133_v50  ;;  %3887 = vmatpush.bf16.msrb.mxu0 %v5761_v55  ;;  %v6085_v50 = vor.u32 %v6737_v48, %v6084_v47  ;;  %v6640_v52 = vld [vmem:[%s9896_s11 + $0x4c] sm:$0xf]  ;;  %v6667_v55 = vld [vmem:[%s9896_s11 + $0x124] sm:$0xf]  ;;  %v6168_v5 = vld [vmem:[%s9896_s11 + $0x3f0] sm:$0xf] }
 0x7f8   :  { %v8970_v12 = vadd.f32 %v2723_v59, %v2711_v2  ;;  %3900 = vmatpush.bf16.msrb.mxu1 %v5857_v43  ;;  %v6773_v2 = vld [vmem:[%s9896_s11 + $0x470] sm:$0xf0]  ;;  %v6676_v59 = vld [vmem:[%s9896_s11 + $0x16c] sm:$0xf]  ;;  %v5822_v43 = vld [vmem:[%s9896_s11 + $0x144] sm:$0xf0]  ;;  %v5705_v46 = vor.u32 %v6640_v52, %v5702_v42 }
 0x7f9   :  { %v2686_v13 = vpop.f32.mrf.mxu3  ;;  %v2699_v21 = vpop.f32.mrf.mxu0  ;;  %v6229_v6 = vor.u32 %v6773_v2, %v6228_v33  ;;  %v5825_v30 = vor.u32 %v6670_v41, %v5822_v43  ;;  %v6734_v33 = vld [vmem:[%s9896_s11 + $0x338] sm:$0xf0]  ;;  %v2883_v23 = vmax.f32 %v8824_v32, 0.0  ;;  %v6728_v41 = vld [vmem:[%s9896_s11 + $0x308] sm:$0xf0] }
 0x7fa   :  { %3913 = vmatpush.bf16.msrb.mxu2 %v5953_v62  ;;  %v5849_v13 = vor.u32 %v6676_v59, %v5846_v1  ;;  %v6109_v21 = vor.u32 %v6743_v14, %v6108_v11  ;;  %v5813_v62 = vor.u32 %v6667_v55, %v5810_v61  ;;  %v6073_v2 = vor.u32 %v6734_v33, %v6072_v0  ;;  %v6664_v11 = vld [vmem:[%s9896_s11 + $0x10c] sm:$0xf]  ;;  %v6634_v8 = vld [vmem:[%s9896_s11 + $0x1c] sm:$0xf]  ;;  %v6755_v47 = vld [vmem:[%s9896_s11 + $0x3e0] sm:$0xf0] }
 0x7fb   :  { %3920 = vmatpush.bf16.msra.mxu3 %v6121_v54  ;;  %3932 = vmatpush.bf16.msra.mxu0 %v6229_v6  ;;  %v6180_v54 = vld [vmem:[%s9896_s11 + $0x408] sm:$0xf]  ;;  %v5690_v6 = vld [vmem:[%s9896_s11 + $0x3c] sm:$0xf0]  ;;  %v1594_v14 = vperm.slane %v8820_v16, 7 }
 0x7fc   :  { %3945 = vmatpush.bf16.msra.mxu1 %v5753_v45  ;;  %v6193_v45 = vor.u32 %v6764_v51, %v6192_v49  ;;  %v6181_v59 = vor.u32 %v6761_v3, %v6180_v54  ;;  %v5693_v1 = vor.u32 %v6637_v60, %v5690_v6  ;;  %v6631_v48 = vld [vmem:[%s9896_s11 + $0x4] sm:$0xf]  ;;  %v5666_v49 = vld [vmem:[%s9896_s11 + $0xc] sm:$0xf0]  ;;  %v6658_v52 = vld [vmem:[%s9896_s11 + $0xdc] sm:$0xf] }
 0x7fd   :  { %v5669_v51 = vor.u32 %v6631_v48, %v5666_v49  ;;  %v5774_v42 = vld [vmem:[%s9896_s11 + $0xe4] sm:$0xf0]  ;;  %v6144_v0 = vld [vmem:[%s9896_s11 + $0x3c0] sm:$0xf]  ;;  %v6752_v33 = vld [vmem:[%s9896_s11 + $0x3c8] sm:$0xf0] }
 0x7fe   :  { %3958 = vmatpush.bf16.msra.mxu2 %v5849_v13  ;;  %v5798_v13 = vld [vmem:[%s9896_s11 + $0x114] sm:$0xf0]  ;;  %v6145_v54 = vor.u32 %v6752_v33, %v6144_v0  ;;  %v5762_v3 = vld [vmem:[%s9896_s11 + $0xcc] sm:$0xf0]  ;;  %v6697_v60 = vld [vmem:[%s9896_s11 + $0x214] sm:$0xf] }
 0x7ff   :  { %v2725_v56 = vpop.f32.mrf.mxu2  ;;  %3921 = vmatpush.bf16.msra.mxu3 %v6109_v21  ;;  %3933 = vmatpush.bf16.msra.mxu0 %v6217_v22  ;;  %v5801_v17 = vor.u32 %v6664_v11, %v5798_v13  ;;  %v6060_v22 = vld [vmem:[%s9896_s11 + $0x318] sm:$0xf] }
 0x800   :  { %3946 = vmatpush.bf16.msra.mxu1 %v5741_v7  ;;  %v5717_v56 = vor.u32 %v6643_v39, %v5714_v40  ;;  %v6061_v16 = vor.u32 %v6731_v4, %v6060_v22  ;;  %v6048_v40 = vld [vmem:[%s9896_s11 + $0x300] sm:$0xf]  ;;  %v5990_v48 = vld [vmem:[%s9896_s11 + $0x294] sm:$0xf0] }
 0x802   :  { %3959 = vmatpush.bf16.msra.mxu2 %v5837_v28  ;;  %v5678_v28 = vld [vmem:[%s9896_s11 + $0x24] sm:$0xf0] }
 0x803   :  { %3922 = vmatpush.bf16.msra.mxu3 %v6097_v24  ;;  %3934 = vmatpush.bf16.msra.mxu0 %v6205_v38  ;;  %v5681_v31 = vor.u32 %v6634_v8, %v5678_v28  ;;  %v6661_v24 = vld [vmem:[%s9896_s11 + $0xf4] sm:$0xf]  ;;  %v6014_v28 = vld [vmem:[%s9896_s11 + $0x2c4] sm:$0xf0] }
 0x804   :  { %3947 = vmatpush.bf16.msra.mxu1 %v5729_v27  ;;  %v6758_v27 = vld [vmem:[%s9896_s11 + $0x3f8] sm:$0xf0]  ;;  %v5789_v38 = vor.u32 %v6661_v24, %v5786_v19  ;;  %v6688_v19 = vld [vmem:[%s9896_s11 + $0x1cc] sm:$0xf] }
 0x805   :  { %v6169_v29 = vor.u32 %v6758_v27, %v6168_v5  ;;  %v6718_v27 = vld [vmem:[%s9896_s11 + $0x2bc] sm:$0xf] }
 0x806   :  { %3960 = vmatpush.bf16.msra.mxu2 %v5825_v30  ;;  %v6049_v30 = vor.u32 %v6728_v41, %v6048_v40 }
 0x807   :  { %3923 = vmatpush.bf16.msra.mxu3 %v6085_v50  ;;  %3935 = vmatpush.bf16.msra.mxu0 %v6193_v45  ;;  %v6700_v45 = vld [vmem:[%s9896_s11 + $0x22c] sm:$0xf] }
 0x808   :  { %3948 = vmatpush.bf16.msra.mxu1 %v5717_v56  ;;  %v6156_v56 = vld [vmem:[%s9896_s11 + $0x3d8] sm:$0xf] }
 0x809   :  { %v6157_v50 = vor.u32 %v6755_v47, %v6156_v56  ;;  %v6685_v56 = vld [vmem:[%s9896_s11 + $0x1b4] sm:$0xf] }
 0x80a   :  { %3961 = vmatpush.bf16.msra.mxu2 %v5813_v62  ;;  %v5942_v62 = vld [vmem:[%s9896_s11 + $0x234] sm:$0xf0] }
 0x80b   :  { %v2762_v57 = vpop.f32.mrf.mxu1  ;;  %3924 = vmatpush.bf16.msra.mxu3 %v6073_v2  ;;  %3936 = vmatpush.bf16.msra.mxu0 %v6181_v59  ;;  %v6655_v2 = vld [vmem:[%s9896_s11 + $0xc4] sm:$0xf]  ;;  %v6724_v59 = vld [vmem:[%s9896_s11 + $0x2ec] sm:$0xf] }
 0x80c   :  { %3949 = vmatpush.bf16.msra.mxu1 %v5705_v46  ;;  %v2884_v46 = vmax.f32 %v8826_v25, 0.0  ;;  %v5765_v6 = vor.u32 %v6655_v2, %v5762_v3  ;;  %v2885_v2 = vmax.f32 %v8854_v36, 0.0  ;;  %v5966_v36 = vld [vmem:[%s9896_s11 + $0x264] sm:$0xf0] }
 0x80e   :  { %3962 = vmatpush.bf16.msra.mxu2 %v5801_v17  ;;  %v5918_v17 = vld [vmem:[%s9896_s11 + $0x204] sm:$0xf0] }
 0x80f   :  { %3925 = vmatpush.bf16.msra.mxu3 %v6061_v16  ;;  %3937 = vmatpush.bf16.msra.mxu0 %v6169_v29  ;;  %v5906_v16 = vld [vmem:[%s9896_s11 + $0x1ec] sm:$0xf0]  ;;  %v6017_v29 = vor.u32 %v6718_v27, %v6014_v28  ;;  %v6230_v27 = vld [vmem:[%s9896_s11 + $0x474] sm:$0xf0] }
 0x810   :  { %3950 = vmatpush.bf16.msra.mxu1 %v5693_v1  ;;  %v6038_v1 = vld [vmem:[%s9896_s11 + $0x2f4] sm:$0xf0] }
 0x811   :  { %v2736_v20 = vpop.f32.mrf.mxu3  ;;  %v2749_v37 = vpop.f32.mrf.mxu0 }
 0x812   :  { %3963 = vmatpush.bf16.msra.mxu2 %v5789_v38  ;;  %v6002_v38 = vld [vmem:[%s9896_s11 + $0x2ac] sm:$0xf0] }
 0x813   :  { %v2763_v57 = vpop.f32.mrf.mxu1  ;;  %3926 = vmatpush.bf16.msra.mxu3 %v6049_v30  ;;  %3938 = vmatpush.bf16.msra.mxu0 %v6157_v50 }
 0x814   :  { %v2764_v20 = vadd.f32 %v2763_v57, %v1594_v14  ;;  %3951 = vmatpush.bf16.msra.mxu1 %v5681_v31  ;;  %v6041_v14 = vor.u32 %v6724_v59, %v6038_v1  ;;  %v6721_v57 = vld [vmem:[%s9896_s11 + $0x2d4] sm:$0xf] }
 0x817   :  { %v2775_v63 = vpop.f32.mrf.mxu2  ;;  %3939 = vmatpush.bf16.msra.mxu0 %v6145_v54  ;;  %v6134_v54 = vld [vmem:[%s9896_s11 + $0x3b4] sm:$0xf0] }
 0x818   :  { %v5945_v63 = vor.u32 %v6700_v45, %v5942_v62  ;;  %3952 = vmatpush.bf16.msra.mxu1 %v5669_v51  ;;  %v5870_v45 = vld [vmem:[%s9896_s11 + $0x1a4] sm:$0xf0] }
 0x819   :  { %v2737_v7 = vpop.f32.mrf.mxu3  ;;  %v2750_v21 = vpop.f32.mrf.mxu0 }
 0x81a   :  { %v2738_v15 = vadd.f32 %v2737_v7, %v1593_v44  ;;  %v5777_v44 = vor.u32 %v6658_v52, %v5774_v42  ;;  %v5930_v7 = vld [vmem:[%s9896_s11 + $0x21c] sm:$0xf0]  ;;  %v6682_v42 = vld [vmem:[%s9896_s11 + $0x19c] sm:$0xf] }
 0x81b   :  { %v5933_v13 = vor.u32 %v6697_v60, %v5930_v7  ;;  %v5873_v62 = vor.u32 %v6682_v42, %v5870_v45  ;;  %v5858_v7 = vld [vmem:[%s9896_s11 + $0x18c] sm:$0xf0]  ;;  %v6763_v42 = vld [vmem:[%s9896_s11 + $0x424] sm:$0xf] }
 0x81c   :  { %v2751_v18 = vadd.f32 %v2750_v21, %v2738_v15  ;;  %3964 = vmatpush.bf16.msra.mxu2 %v5777_v44  ;;  %v6694_v15 = vld [vmem:[%s9896_s11 + $0x1fc] sm:$0xf]  ;;  %v6026_v21 = vld [vmem:[%s9896_s11 + $0x2dc] sm:$0xf0]  ;;  %v6194_v45 = vld [vmem:[%s9896_s11 + $0x42c] sm:$0xf0] }
 0x81d   :  { %v5921_v4 = vor.u32 %v6694_v15, %v5918_v17  ;;  %v6029_v5 = vor.u32 %v6721_v57, %v6026_v21  ;;  %v6745_v21 = vld [vmem:[%s9896_s11 + $0x394] sm:$0xf] }
 0x81e   :  { %v2889_v37 = vmax.f32 %v2751_v18, 0.0  ;;  %v6691_v18 = vld [vmem:[%s9896_s11 + $0x1e4] sm:$0xf] }
 0x81f   :  { %v2776_v39 = vpop.f32.mrf.mxu2  ;;  %v5909_v8 = vor.u32 %v6691_v18, %v5906_v16  ;;  %v6772_v16 = vld [vmem:[%s9896_s11 + $0x46c] sm:$0xf] }
 0x820   :  { %v2895_v43 = vmul.f32 %v2889_v37, %v2883_v23  ;;  %v2777_v32 = vadd.f32 %v2776_v39, %v2764_v20  ;;  %3965 = vmatpush.bf16.msra.mxu2 %v5765_v6  ;;  %v5894_v23 = vld [vmem:[%s9896_s11 + $0x1d4] sm:$0xf0]  ;;  %v6715_v20 = vld [vmem:[%s9896_s11 + $0x2a4] sm:$0xf]  ;;  %v9291_v39 = vld [vmem:[%s9890_s5 + $0x10] sm:$0xf] }
 0x821   :  { %v5897_v37 = vor.u32 %v6688_v19, %v5894_v23  ;;  %v6005_v40 = vor.u32 %v6715_v20, %v6002_v38  ;;  %v1595_v41 = vperm.slane %v9291_v39, 0  ;;  %v1596_v50 = vperm.slane %v9291_v39, 1  ;;  %v6679_v6 = vld [vmem:[%s9896_s11 + $0x184] sm:$0xf]  ;;  %v6742_v19 = vld [vmem:[%s9896_s11 + $0x37c] sm:$0xf] }
 0x822   :  { %v9219_v55 = vpack.c.bf16 %v2895_v43, %v2895_v43  ;;  %v2890_v61 = vmax.f32 %v2777_v32, 0.0  ;;  %v5882_v43 = vld [vmem:[%s9896_s11 + $0x1bc] sm:$0xf0]  ;;  %v6712_v32 = vld [vmem:[%s9896_s11 + $0x28c] sm:$0xf]  ;;  %v5861_v1 = vor.u32 %v6679_v6, %v5858_v7 }
 0x823   :  { %v5885_v47 = vor.u32 %v6685_v56, %v5882_v43  ;;  %v5993_v49 = vor.u32 %v6712_v32, %v5990_v48  ;;  %v6110_v20 = vld [vmem:[%s9896_s11 + $0x384] sm:$0xf0]  ;;  %v6218_v38 = vld [vmem:[%s9896_s11 + $0x45c] sm:$0xf0]  ;;  %v6739_v43 = vld [vmem:[%s9896_s11 + $0x364] sm:$0xf] }
 0x824   :  { %v2896_v25 = vmul.f32 %v2890_v61, %v2884_v46  ;;  %3875 = vmatmul.bf16.vlgmr.msrb.gmra.mxu3 %v9219_v55  ;;  %v6709_v46 = vld [vmem:[%s9896_s11 + $0x274] sm:$0xf]  ;;  %v6098_v32 = vld [vmem:[%s9896_s11 + $0x36c] sm:$0xf0]  ;;  %v6062_v6 = vld [vmem:[%s9896_s11 + $0x324] sm:$0xf0] }
 0x825   :  { %3971 = vmatpush.bf16.msrb.mxu3 %v5945_v63  ;;  %v5978_v63 = vld [vmem:[%s9896_s11 + $0x27c] sm:$0xf0]  ;;  %v6101_v48 = vor.u32 %v6739_v43, %v6098_v32  ;;  %v6757_v7 = vld [vmem:[%s9896_s11 + $0x3f4] sm:$0xf]  ;;  %v5852_v43 = vld [vmem:[%s9896_s11 + $0x170] sm:$0xf] }
 0x826   :  { %v9249_v11 = vpack.c.bf16 %v2896_v25, %v2896_v25  ;;  %v5981_v33 = vor.u32 %v6709_v46, %v5978_v63  ;;  %v6748_v25 = vld [vmem:[%s9896_s11 + $0x3ac] sm:$0xf]  ;;  %v6074_v63 = vld [vmem:[%s9896_s11 + $0x33c] sm:$0xf0]  ;;  %v6678_v32 = vld [vmem:[%s9896_s11 + $0x178] sm:$0xf0] }
 0x827   :  { %v6137_v57 = vor.u32 %v6748_v25, %v6134_v54  ;;  %v1597_v54 = vperm.slane %v9291_v39, 2 }
 0x828   :  { %3888 = vmatmul.bf16.vlgmr.msrb.gmra.mxu0 %v9249_v11 }
 0x829   :  { %3972 = vmatpush.bf16.msrb.mxu3 %v5933_v13  ;;  %3984 = vmatpush.bf16.msrb.mxu0 %v6041_v14  ;;  %v6706_v13 = vld [vmem:[%s9896_s11 + $0x25c] sm:$0xf] }
 0x82a   :  { %v5969_v17 = vor.u32 %v6706_v13, %v5966_v36 }
 0x82b   :  { %v2814_v22 = vpop.f32.mrf.mxu1 }
 0x82c   :  { %v6122_v22 = vld [vmem:[%s9896_s11 + $0x39c] sm:$0xf0] }
 0x82d   :  { %3973 = vmatpush.bf16.msrb.mxu3 %v5921_v4  ;;  %3985 = vmatpush.bf16.msrb.mxu0 %v6029_v5  ;;  %v2886_v4 = vmax.f32 %v8865_v35, 0.0  ;;  %v5954_v35 = vld [vmem:[%s9896_s11 + $0x24c] sm:$0xf0] }
 0x831   :  { %v2788_v31 = vpop.f32.mrf.mxu3  ;;  %v2801_v24 = vpop.f32.mrf.mxu0  ;;  %3974 = vmatpush.bf16.msrb.mxu3 %v5909_v8  ;;  %3986 = vmatpush.bf16.msrb.mxu0 %v6017_v29  ;;  %v6703_v8 = vld [vmem:[%s9896_s11 + $0x244] sm:$0xf] }
 0x832   :  { %v5957_v29 = vor.u32 %v6703_v8, %v5954_v35  ;;  %v6125_v31 = vor.u32 %v6745_v21, %v6122_v22  ;;  %v6233_v24 = vor.u32 %v6772_v16, %v6230_v27  ;;  %v6727_v21 = vld [vmem:[%s9896_s11 + $0x304] sm:$0xf]  ;;  %v5948_v27 = vld [vmem:[%s9896_s11 + $0x230] sm:$0xf]  ;;  %v6702_v8 = vld [vmem:[%s9896_s11 + $0x238] sm:$0xf0] }
 0x833   :  { %v2815_v61 = vpop.f32.mrf.mxu1  ;;  %v2887_v35 = vmax.f32 %v8941_v34, 0.0  ;;  %v6146_v34 = vld [vmem:[%s9896_s11 + $0x3cc] sm:$0xf0] }
 0x834   :  { %v2816_v3 = vadd.f32 %v2815_v61, %v1596_v50  ;;  %v6736_v50 = vld [vmem:[%s9896_s11 + $0x34c] sm:$0xf] }
 0x835   :  { %3975 = vmatpush.bf16.msrb.mxu3 %v5897_v37  ;;  %3987 = vmatpush.bf16.msrb.mxu0 %v6005_v40  ;;  %v6769_v37 = vld [vmem:[%s9896_s11 + $0x454] sm:$0xf] }
 0x836   :  { %v6221_v56 = vor.u32 %v6769_v37, %v6218_v38  ;;  %v6751_v38 = vld [vmem:[%s9896_s11 + $0x3c4] sm:$0xf] }
 0x837   :  { %v2827_v30 = vpop.f32.mrf.mxu2 }
 0x838   :  { %v6766_v30 = vld [vmem:[%s9896_s11 + $0x43c] sm:$0xf] }
 0x839   :  { %v2789_v51 = vpop.f32.mrf.mxu3  ;;  %v2802_v44 = vpop.f32.mrf.mxu0  ;;  %3976 = vmatpush.bf16.msrb.mxu3 %v5885_v47  ;;  %3988 = vmatpush.bf16.msrb.mxu0 %v5993_v49  ;;  %v6206_v47 = vld [vmem:[%s9896_s11 + $0x444] sm:$0xf0] }
 0x83a   :  { %v2790_v52 = vadd.f32 %v2789_v51, %v1595_v41  ;;  %v6113_v41 = vor.u32 %v6742_v19, %v6110_v20  ;;  %v6209_v49 = vor.u32 %v6766_v30, %v6206_v47  ;;  %v2888_v30 = vmax.f32 %v8970_v12, 0.0  ;;  %v6044_v12 = vld [vmem:[%s9896_s11 + $0x2f0] sm:$0xf] }
 0x83c   :  { %v2803_v0 = vadd.f32 %v2802_v44, %v2790_v52  ;;  %v6086_v52 = vld [vmem:[%s9896_s11 + $0x354] sm:$0xf0]  ;;  %v6197_v44 = vor.u32 %v6763_v42, %v6194_v45  ;;  %v6726_v42 = vld [vmem:[%s9896_s11 + $0x2f8] sm:$0xf0] }
 0x83d   :  { %3977 = vmatpush.bf16.msrb.mxu3 %v5873_v62  ;;  %3989 = vmatpush.bf16.msrb.mxu0 %v5981_v33  ;;  %v6089_v61 = vor.u32 %v6736_v50, %v6086_v52  ;;  %v6733_v62 = vld [vmem:[%s9896_s11 + $0x334] sm:$0xf]  ;;  %v6182_v33 = vld [vmem:[%s9896_s11 + $0x414] sm:$0xf0]  ;;  %v6699_v50 = vld [vmem:[%s9896_s11 + $0x220] sm:$0xf0] }
 0x83e   :  { %v2891_v60 = vmax.f32 %v2803_v0, 0.0  ;;  %v6760_v0 = vld [vmem:[%s9896_s11 + $0x40c] sm:$0xf]  ;;  %v6651_v52 = vld [vmem:[%s9896_s11 + $0xa0] sm:$0xf0] }
 0x83f   :  { %v2828_v59 = vpop.f32.mrf.mxu2 }
 0x840   :  { %v2897_v14 = vmul.f32 %v2891_v60, %v2885_v2  ;;  %v2829_v15 = vadd.f32 %v2828_v59, %v2816_v3  ;;  %v6077_v2 = vor.u32 %v6733_v62, %v6074_v63  ;;  %v6185_v3 = vor.u32 %v6760_v0, %v6182_v33  ;;  %v6730_v60 = vld [vmem:[%s9896_s11 + $0x31c] sm:$0xf]  ;;  %v6170_v59 = vld [vmem:[%s9896_s11 + $0x3fc] sm:$0xf0]  ;;  %v5840_v63 = vld [vmem:[%s9896_s11 + $0x158] sm:$0xf] }
 0x841   :  { %3978 = vmatpush.bf16.msrb.mxu3 %v5861_v1  ;;  %3990 = vmatpush.bf16.msrb.mxu0 %v5969_v17  ;;  %v1598_v1 = vperm.slane %v9291_v39, 3  ;;  %v6065_v17 = vor.u32 %v6730_v60, %v6062_v6  ;;  %v6754_v39 = vld [vmem:[%s9896_s11 + $0x3dc] sm:$0xf]  ;;  %v5732_v62 = vld [vmem:[%s9896_s11 + $0x80] sm:$0xf] }
 0x842   :  { %v9345_v5 = vpack.c.bf16 %v2897_v14, %v2897_v14  ;;  %v2892_v18 = vmax.f32 %v2829_v15, 0.0  ;;  %v6648_v60 = vld [vmem:[%s9896_s11 + $0x88] sm:$0xf0]  ;;  %v6032_v6 = vld [vmem:[%s9896_s11 + $0x2d8] sm:$0xf] }
 0x844   :  { %v2898_v28 = vmul.f32 %v2892_v18, %v2886_v4  ;;  %3901 = vmatmul.bf16.vlgmr.msrb.gmra.mxu1 %v9345_v5  ;;  %v6050_v4 = vld [vmem:[%s9896_s11 + $0x30c] sm:$0xf0]  ;;  %v6158_v18 = vld [vmem:[%s9896_s11 + $0x3e4] sm:$0xf0] }
 0x845   :  { %3997 = vmatpush.bf16.msrb.mxu1 %v6137_v57  ;;  %3991 = vmatpush.bf16.msrb.mxu0 %v5957_v29  ;;  %v6173_v57 = vor.u32 %v6757_v7, %v6170_v59  ;;  %v6053_v20 = vor.u32 %v6727_v21, %v6050_v4  ;;  %v6161_v37 = vor.u32 %v6754_v39, %v6158_v18  ;;  %v6723_v7 = vld [vmem:[%s9896_s11 + $0x2e0] sm:$0xf0]  ;;  %v6693_v21 = vld [vmem:[%s9896_s11 + $0x1f0] sm:$0xf0]  ;;  %v6020_v4 = vld [vmem:[%s9896_s11 + $0x2c0] sm:$0xf] }
 0x846   :  { %v9363_v23 = vpack.c.bf16 %v2898_v28, %v2898_v28  ;;  %v6720_v39 = vld [vmem:[%s9896_s11 + $0x2c8] sm:$0xf0] }
 0x848   :  { %3914 = vmatmul.bf16.vlgmr.msrb.gmra.mxu2 %v9363_v23 }
 0x849   :  { %3998 = vmatpush.bf16.msrb.mxu1 %v6125_v31  ;;  %4010 = vmatpush.bf16.msrb.mxu2 %v6233_v24  ;;  %v5756_v31 = vld [vmem:[%s9896_s11 + $0xb0] sm:$0xf]  ;;  %v6654_v24 = vld [vmem:[%s9896_s11 + $0xb8] sm:$0xf0] }
 0x84b   :  { %v2866_v40 = vpop.f32.mrf.mxu1 }
 0x84d   :  { %3999 = vmatpush.bf16.msrb.mxu1 %v6113_v41  ;;  %4011 = vmatpush.bf16.msrb.mxu2 %v6221_v56  ;;  %v5949_v41 = vor.u32 %v6702_v8, %v5948_v27  ;;  %v5744_v56 = vld [vmem:[%s9896_s11 + $0x98] sm:$0xf]  ;;  %v6021_v8 = vor.u32 %v6720_v39, %v6020_v4 }
 0x84e   :  { %v5745_v33 = vor.u32 %v6651_v52, %v5744_v56  ;;  %v5804_v56 = vld [vmem:[%s9896_s11 + $0x110] sm:$0xf] }
 0x851   :  { %v2853_v51 = vpop.f32.mrf.mxu0  ;;  %v2840_v46 = vpop.f32.mrf.mxu3  ;;  %4000 = vmatpush.bf16.msrb.mxu1 %v6101_v48  ;;  %4012 = vmatpush.bf16.msrb.mxu2 %v6209_v49  ;;  %v5757_v48 = vor.u32 %v6654_v24, %v5756_v31  ;;  %v5936_v49 = vld [vmem:[%s9896_s11 + $0x218] sm:$0xf]  ;;  %v6642_v31 = vld [vmem:[%s9896_s11 + $0x58] sm:$0xf0]  ;;  %v5900_v24 = vld [vmem:[%s9896_s11 + $0x1d0] sm:$0xf] }
 0x852   :  { %v6149_v46 = vor.u32 %v6751_v38, %v6146_v34 }
 0x853   :  { %v2867_v36 = vpop.f32.mrf.mxu1 }
 0x854   :  { %3953 = vmatmul.bf16.vlgmr.msra.gmra.mxu1 %v9219_v55  ;;  %v2868_v16 = vadd.f32 %v2867_v36, %v1598_v1  ;;  %v5828_v36 = vld [vmem:[%s9896_s11 + $0x140] sm:$0xf] }
 0x855   :  { %4001 = vmatpush.bf16.msrb.mxu1 %v6089_v61  ;;  %4013 = vmatpush.bf16.msrb.mxu2 %v6197_v44  ;;  %v5853_v61 = vor.u32 %v6678_v32, %v5852_v43  ;;  %v5937_v44 = vor.u32 %v6699_v50, %v5936_v49  ;;  %v6666_v43 = vld [vmem:[%s9896_s11 + $0x118] sm:$0xf0]  ;;  %v5996_v49 = vld [vmem:[%s9896_s11 + $0x290] sm:$0xf] }
 0x856   :  { %v6714_v50 = vld [vmem:[%s9896_s11 + $0x298] sm:$0xf0]  ;;  %v5805_v52 = vor.u32 %v6666_v43, %v5804_v56  ;;  %v6224_v56 = vld [vmem:[%s9896_s11 + $0x458] sm:$0xf]  ;;  %v6771_v43 = vld [vmem:[%s9896_s11 + $0x460] sm:$0xf0] }
 0x857   :  { %v2879_v25 = vpop.f32.mrf.mxu2 }
 0x858   :  { %3966 = vmatmul.bf16.vlgmr.msra.gmra.mxu2 %v9249_v11  ;;  %v6045_v25 = vor.u32 %v6726_v42, %v6044_v12 }
 0x859   :  { %v2841_v13 = vpop.f32.mrf.mxu3  ;;  %v2854_v15 = vpop.f32.mrf.mxu0  ;;  %4002 = vmatpush.bf16.msrb.mxu1 %v6077_v2  ;;  %4014 = vmatpush.bf16.msrb.mxu2 %v6185_v3  ;;  %v5924_v2 = vld [vmem:[%s9896_s11 + $0x200] sm:$0xf]  ;;  %v6696_v3 = vld [vmem:[%s9896_s11 + $0x208] sm:$0xf0] }
 0x85a   :  { %v2842_v14 = vadd.f32 %v2841_v13, %v1597_v54  ;;  %v6675_v54 = vld [vmem:[%s9896_s11 + $0x160] sm:$0xf0]  ;;  %v5925_v1 = vor.u32 %v6696_v3, %v5924_v2  ;;  %v5720_v13 = vld [vmem:[%s9896_s11 + $0x68] sm:$0xf] }
 0x85b   :  { %v5841_v59 = vor.u32 %v6675_v54, %v5840_v63  ;;  %v5876_v63 = vld [vmem:[%s9896_s11 + $0x1a0] sm:$0xf]  ;;  %v6711_v54 = vld [vmem:[%s9896_s11 + $0x280] sm:$0xf0]  ;;  %v5672_v3 = vld [vmem:[%s9896_s11 + $0x8] sm:$0xf] }
 0x85c   :  { %v2855_v22 = vadd.f32 %v2854_v15, %v2842_v14  ;;  %v5733_v14 = vor.u32 %v6648_v60, %v5732_v62  ;;  %v6033_v15 = vor.u32 %v6723_v7, %v6032_v6  ;;  %v6636_v62 = vld [vmem:[%s9896_s11 + $0x28] sm:$0xf0]  ;;  %v6633_v7 = vld [vmem:[%s9896_s11 + $0x10] sm:$0xf0] }
 0x85d   :  { %4003 = vmatpush.bf16.msrb.mxu1 %v6065_v17  ;;  %4015 = vmatpush.bf16.msrb.mxu2 %v6173_v57  ;;  %v6672_v17 = vld [vmem:[%s9896_s11 + $0x148] sm:$0xf0]  ;;  %v5912_v57 = vld [vmem:[%s9896_s11 + $0x1e8] sm:$0xf]  ;;  %v5673_v4 = vor.u32 %v6633_v7, %v5672_v3  ;;  %v6759_v3 = vld [vmem:[%s9896_s11 + $0x400] sm:$0xf0] }
 0x85e   :  { %v2893_v28 = vmax.f32 %v2855_v22, 0.0  ;;  %v6645_v22 = vld [vmem:[%s9896_s11 + $0x70] sm:$0xf0]  ;;  %v5829_v18 = vor.u32 %v6672_v17, %v5828_v36  ;;  %v5864_v36 = vld [vmem:[%s9896_s11 + $0x188] sm:$0xf] }
 0x85f   :  { %v2880_v29 = vpop.f32.mrf.mxu2  ;;  %v5721_v27 = vor.u32 %v6645_v22, %v5720_v13  ;;  %v6708_v17 = vld [vmem:[%s9896_s11 + $0x268] sm:$0xf0]  ;;  %v6056_v7 = vld [vmem:[%s9896_s11 + $0x308] sm:$0xf] }
 0x860   :  { %v2881_v19 = vadd.f32 %v2880_v29, %v2868_v16  ;;  %v2899_v40 = vmul.f32 %v2893_v28, %v2887_v35  ;;  %v5913_v16 = vor.u32 %v6693_v21, %v5912_v57  ;;  %v5708_v35 = vld [vmem:[%s9896_s11 + $0x50] sm:$0xf]  ;;  %v5816_v28 = vld [vmem:[%s9896_s11 + $0x128] sm:$0xf]  ;;  %v6669_v29 = vld [vmem:[%s9896_s11 + $0x130] sm:$0xf0] }
 0x861   :  { %4004 = vmatpush.bf16.msrb.mxu1 %v6053_v20  ;;  %4016 = vmatpush.bf16.msrb.mxu2 %v6161_v37  ;;  %v6008_v20 = vld [vmem:[%s9896_s11 + $0x2a8] sm:$0xf]  ;;  %v6717_v37 = vld [vmem:[%s9896_s11 + $0x2b0] sm:$0xf0]  ;;  %v5817_v38 = vor.u32 %v6669_v29, %v5816_v28  ;;  %v5709_v34 = vor.u32 %v6642_v31, %v5708_v35  ;;  %v6140_v57 = vld [vmem:[%s9896_s11 + $0x3b0] sm:$0xf] }
 0x862   :  { %v2894_v47 = vmax.f32 %v2881_v19, 0.0  ;;  %v9474_v51 = vpack.c.bf16 %v2899_v40, %v2899_v40  ;;  %v6690_v19 = vld [vmem:[%s9896_s11 + $0x1d8] sm:$0xf0]  ;;  %v6009_v32 = vor.u32 %v6717_v37, %v6008_v20  ;;  %v5960_v35 = vld [vmem:[%s9896_s11 + $0x248] sm:$0xf] }
 0x863   :  { %v5901_v40 = vor.u32 %v6690_v19, %v5900_v24  ;;  %v6750_v21 = vld [vmem:[%s9896_s11 + $0x3b8] sm:$0xf0]  ;;  %v6705_v28 = vld [vmem:[%s9896_s11 + $0x250] sm:$0xf0]  ;;  %v6128_v29 = vld [vmem:[%s9896_s11 + $0x398] sm:$0xf] }
 0x864   :  { %v2900_v45 = vmul.f32 %v2894_v47, %v2888_v30  ;;  %3927 = vmatmul.bf16.vlgmr.msra.gmra.mxu3 %v9474_v51  ;;  %4005 = vmatmul.bf16.vlgmr.msrb.gmra.mxu1 %v9474_v51  ;;  %v6639_v30 = vld [vmem:[%s9896_s11 + $0x40] sm:$0xf0]  ;;  %v5888_v47 = vld [vmem:[%s9896_s11 + $0x1b8] sm:$0xf]  ;;  %v6236_v24 = vld [vmem:[%s9896_s11 + $0x470] sm:$0xf]  ;;  %v5961_v37 = vor.u32 %v6705_v28, %v5960_v35 }
 0x865   :  { %4049 = vmatpush.bf16.msra.mxu1 %v5949_v41  ;;  %4023 = vmatpush.bf16.msra.mxu3 %v5757_v48  ;;  %v5696_v41 = vld [vmem:[%s9896_s11 + $0x38] sm:$0xf]  ;;  %v6687_v48 = vld [vmem:[%s9896_s11 + $0x1c0] sm:$0xf0]  ;;  %v6774_v19 = vld [vmem:[%s9896_s11 + $0x478] sm:$0xf0] }
 0x866   :  { %v9492_v0 = vpack.c.bf16 %v2900_v45, %v2900_v45  ;;  %4017 = vmatpush.bf16.msrb.mxu2 %v6149_v46  ;;  %v5697_v12 = vor.u32 %v6639_v30, %v5696_v41  ;;  %v5889_v42 = vor.u32 %v6687_v48, %v5888_v47  ;;  %v5684_v45 = vld [vmem:[%s9896_s11 + $0x20] sm:$0xf]  ;;  %v5792_v46 = vld [vmem:[%s9896_s11 + $0xf8] sm:$0xf]  ;;  %v6747_v31 = vld [vmem:[%s9896_s11 + $0x3a0] sm:$0xf0]  ;;  %v6225_v30 = vor.u32 %v6771_v43, %v6224_v56 }
 0x867   :  { %v5685_v60 = vor.u32 %v6636_v62, %v5684_v45  ;;  %v6744_v41 = vld [vmem:[%s9896_s11 + $0x388] sm:$0xf0]  ;;  %v6212_v47 = vld [vmem:[%s9896_s11 + $0x440] sm:$0xf]  ;;  %v6762_v62 = vld [vmem:[%s9896_s11 + $0x418] sm:$0xf0] }
 0x868   :  { %3940 = vmatmul.bf16.vlgmr.msra.gmra.mxu0 %v9492_v0  ;;  %v6768_v48 = vld [vmem:[%s9896_s11 + $0x448] sm:$0xf0] }
 0x869   :  { %4036 = vmatpush.bf16.msra.mxu0 %v5853_v61  ;;  %4050 = vmatpush.bf16.msra.mxu1 %v5937_v44  ;;  %v6663_v61 = vld [vmem:[%s9896_s11 + $0x100] sm:$0xf0]  ;;  %v5997_v44 = vor.u32 %v6714_v50, %v5996_v49  ;;  %v6213_v50 = vor.u32 %v6768_v48, %v6212_v47 }
 0x86a   :  { %4024 = vmatpush.bf16.msra.mxu3 %v5745_v33  ;;  %4062 = vmatpush.bf16.msra.mxu2 %v6045_v25  ;;  %v6684_v33 = vld [vmem:[%s9896_s11 + $0x1a8] sm:$0xf0]  ;;  %v5984_v25 = vld [vmem:[%s9896_s11 + $0x278] sm:$0xf]  ;;  %v5793_v2 = vor.u32 %v6663_v61, %v5792_v46  ;;  %v6735_v61 = vld [vmem:[%s9896_s11 + $0x340] sm:$0xf0] }
 0x86b   :  { %4018 = vmatmul.bf16.vlgmr.msrb.gmra.mxu2 %v9492_v0  ;;  %v5877_v6 = vor.u32 %v6684_v33, %v5876_v63  ;;  %v5985_v13 = vor.u32 %v6711_v54, %v5984_v25  ;;  %v6080_v46 = vld [vmem:[%s9896_s11 + $0x338] sm:$0xf]  ;;  %v6068_v25 = vld [vmem:[%s9896_s11 + $0x320] sm:$0xf]  ;;  %v6732_v54 = vld [vmem:[%s9896_s11 + $0x328] sm:$0xf0] }
 0x86c   :  { %v6081_v63 = vor.u32 %v6735_v61, %v6080_v46 }
 0x86d   :  { %4037 = vmatpush.bf16.msra.mxu0 %v5841_v59  ;;  %4051 = vmatpush.bf16.msra.mxu1 %v5925_v1  ;;  %v5780_v59 = vld [vmem:[%s9896_s11 + $0xe0] sm:$0xf]  ;;  %v6660_v1 = vld [vmem:[%s9896_s11 + $0xe8] sm:$0xf0] }
 0x86e   :  { %4025 = vmatpush.bf16.msra.mxu3 %v5733_v14  ;;  %4063 = vmatpush.bf16.msra.mxu2 %v6033_v15  ;;  %v6681_v14 = vld [vmem:[%s9896_s11 + $0x190] sm:$0xf0]  ;;  %v5972_v15 = vld [vmem:[%s9896_s11 + $0x260] sm:$0xf]  ;;  %v5781_v22 = vor.u32 %v6660_v1, %v5780_v59 }
 0x86f   :  { %v5865_v39 = vor.u32 %v6681_v14, %v5864_v36  ;;  %v6729_v59 = vld [vmem:[%s9896_s11 + $0x310] sm:$0xf0]  ;;  %v6164_v1 = vld [vmem:[%s9896_s11 + $0x3e0] sm:$0xf] }
 0x870   :  { %v6057_v36 = vor.u32 %v6729_v59, %v6056_v7 }
 0x871   :  { %4038 = vmatpush.bf16.msra.mxu0 %v5829_v18  ;;  %4052 = vmatpush.bf16.msra.mxu1 %v5913_v16  ;;  %v5973_v18 = vor.u32 %v6708_v17, %v5972_v15  ;;  %v6141_v16 = vor.u32 %v6750_v21, %v6140_v57  ;;  %v6152_v15 = vld [vmem:[%s9896_s11 + $0x3c8] sm:$0xf]  ;;  %v6753_v17 = vld [vmem:[%s9896_s11 + $0x3d0] sm:$0xf0] }
 0x872   :  { %4026 = vmatpush.bf16.msra.mxu3 %v5721_v27  ;;  %4064 = vmatpush.bf16.msra.mxu2 %v6021_v8  ;;  %v5768_v27 = vld [vmem:[%s9896_s11 + $0xc8] sm:$0xf]  ;;  %v6657_v8 = vld [vmem:[%s9896_s11 + $0xd0] sm:$0xf0]  ;;  %v6153_v57 = vor.u32 %v6753_v17, %v6152_v15 }
 0x873   :  { %v5769_v20 = vor.u32 %v6657_v8, %v5768_v27  ;;  %v6789_v15 = vld [vmem:[%s9897_s12 + $0x70] sm:$0xff]  ;;  %v6780_v17 = vld [vmem:[%s9897_s12 + $0x28] sm:$0xff] }
 0x874   :  { %3979 = vmatmul.bf16.vlgmr.msrb.gmra.mxu3 %v9345_v5 }
 0x875   :  { %4039 = vmatpush.bf16.msra.mxu0 %v5817_v38  ;;  %4053 = vmatpush.bf16.msra.mxu1 %v5901_v40  ;;  %v6129_v38 = vor.u32 %v6747_v31, %v6128_v29  ;;  %v6116_v40 = vld [vmem:[%s9896_s11 + $0x380] sm:$0xf] }
 0x876   :  { %4027 = vmatpush.bf16.msra.mxu3 %v5709_v34  ;;  %4065 = vmatpush.bf16.msra.mxu2 %v6009_v32  ;;  %v6237_v34 = vor.u32 %v6774_v19, %v6236_v24  ;;  %v6117_v32 = vor.u32 %v6744_v41, %v6116_v40 }
 0x878   :  { %3992 = vmatmul.bf16.vlgmr.msrb.gmra.mxu0 %v9363_v23 }
 0x879   :  { %4040 = vmatpush.bf16.msra.mxu0 %v5805_v52  ;;  %4054 = vmatpush.bf16.msra.mxu1 %v5889_v42  ;;  %v6092_v52 = vld [vmem:[%s9896_s11 + $0x350] sm:$0xf] }
 0x87a   :  { %4028 = vmatpush.bf16.msra.mxu3 %v5697_v12  ;;  %4066 = vmatpush.bf16.msra.mxu2 %v5997_v44  ;;  %v6200_v12 = vld [vmem:[%s9896_s11 + $0x428] sm:$0xf]  ;;  %v6188_v44 = vld [vmem:[%s9896_s11 + $0x410] sm:$0xf] }
 0x87b   :  { %v6189_v33 = vor.u32 %v6762_v62, %v6188_v44 }
 0x87d   :  { %4041 = vmatpush.bf16.msra.mxu0 %v5793_v2  ;;  %4055 = vmatpush.bf16.msra.mxu1 %v5877_v6  ;;  %v6176_v2 = vld [vmem:[%s9896_s11 + $0x3f8] sm:$0xf] }
 0x87e   :  { %4029 = vmatpush.bf16.msra.mxu3 %v5685_v60  ;;  %4067 = vmatpush.bf16.msra.mxu2 %v5985_v13  ;;  %v6069_v60 = vor.u32 %v6732_v54, %v6068_v25  ;;  %v6177_v6 = vor.u32 %v6759_v3, %v6176_v2  ;;  %v6756_v13 = vld [vmem:[%s9896_s11 + $0x3e8] sm:$0xf0] }
 0x87f   :  { %v6165_v14 = vor.u32 %v6756_v13, %v6164_v1  ;;  %v6782_v13 = vld [vmem:[%s9897_s12 + $0x38] sm:$0xff] }
 0x881   :  { %4042 = vmatpush.bf16.msra.mxu0 %v5781_v22  ;;  %4056 = vmatpush.bf16.msra.mxu1 %v5865_v39 }
 0x882   :  { %4030 = vmatpush.bf16.msra.mxu3 %v5673_v4  ;;  %4068 = vmatpush.bf16.msra.mxu2 %v5973_v18 }
 0x884   :  { %4057 = vmatmul.bf16.vlgmr.msra.gmra.mxu1 %v9345_v5  ;;  %v6104_v5 = vld [vmem:[%s9896_s11 + $0x368] sm:$0xf] }
 0x885   :  { %4031 = vmatmul.bf16.vlgmr.msra.gmra.mxu3 %v9219_v55  ;;  %4043 = vmatpush.bf16.msra.mxu0 %v5769_v20  ;;  %v6741_v55 = vld [vmem:[%s9896_s11 + $0x370] sm:$0xf0] }
 0x886   :  { %4075 = vmatpush.bf16.msrb.mxu3 %v6141_v16  ;;  %4069 = vmatpush.bf16.msra.mxu2 %v5961_v37  ;;  %v6105_v49 = vor.u32 %v6741_v55, %v6104_v5 }
 0x887   :  { %4323 = vmatpush.bf16.msrb.mxu1 %v6782_v13 }
 0x888   :  { %4044 = vmatmul.bf16.vlgmr.msra.gmra.mxu0 %v9249_v11  ;;  %v6738_v11 = vld [vmem:[%s9896_s11 + $0x358] sm:$0xf0] }
 0x889   :  { %4088 = vmatpush.bf16.msrb.mxu0 %v6237_v34  ;;  %4070 = vmatmul.bf16.vlgmr.msra.gmra.mxu2 %v9363_v23  ;;  %v6765_v23 = vld [vmem:[%s9896_s11 + $0x430] sm:$0xf0]  ;;  %v6093_v42 = vor.u32 %v6738_v11, %v6092_v52  ;;  %s6238_s11 = sld [smem:[#allocation2 + $0x3]] }
 0x88a   :  { %4076 = vmatpush.bf16.msrb.mxu3 %v6129_v38  ;;  %v6201_v45 = vor.u32 %v6765_v23, %v6200_v12 }
 0x88d   :  { %4089 = vmatpush.bf16.msrb.mxu0 %v6225_v30 }
 0x88e   :  { %4077 = vmatpush.bf16.msrb.mxu3 %v6117_v32 }
 0x891   :  { %4090 = vmatpush.bf16.msrb.mxu0 %v6213_v50 }
 0x892   :  { %4078 = vmatpush.bf16.msrb.mxu3 %v6105_v49 }
 0x895   :  { %4091 = vmatpush.bf16.msrb.mxu0 %v6201_v45 }
 0x896   :  { %4079 = vmatpush.bf16.msrb.mxu3 %v6093_v42 }
 0x899   :  { %4092 = vmatpush.bf16.msrb.mxu0 %v6189_v33 }
 0x89a   :  { %4080 = vmatpush.bf16.msrb.mxu3 %v6081_v63 }
 0x89d   :  { %4093 = vmatpush.bf16.msrb.mxu0 %v6177_v6 }
 0x89e   :  { %4081 = vmatpush.bf16.msrb.mxu3 %v6069_v60  ;;  %v4102_v60 = vstv %s6238_s11 }
 0x8a1   :  { %4094 = vmatpush.bf16.msrb.mxu0 %v6165_v14  ;;  %v6781_v14 = vld [vmem:[%s9897_s12 + $0x30] sm:$0xff] }
 0x8a2   :  { %4082 = vmatpush.bf16.msrb.mxu3 %v6057_v36  ;;  %v6790_v36 = vld [vmem:[%s9897_s12 + $0x78] sm:$0xff]  ;;  %4324 = vmatpush.bf16.msrb.mxu1 %v6781_v14 }
 0x8a3   :  { %4336 = vmatpush.bf16.msrb.mxu2 %v6790_v36 }
 0x8a5   :  { %4083 = vmatmul.bf16.vlgmr.msrb.gmra.mxu3 %v9474_v51  ;;  %4095 = vmatpush.bf16.msrb.mxu0 %v6153_v57  ;;  %v3889_v21 = vpop.f32.mrf.mxu0  ;;  %v6788_v57 = vld [vmem:[%s9897_s12 + $0x68] sm:$0xff] }
 0x8a6   :  { %4325 = vmatpush.bf16.msrb.mxu1 %v6780_v17 }
 0x8a7   :  { %v3876_v22 = vpop.f32.mrf.mxu3  ;;  %4337 = vmatpush.bf16.msrb.mxu2 %v6789_v15 }
 0x8a8   :  { %4096 = vmatmul.bf16.vlgmr.msrb.gmra.mxu0 %v9492_v0  ;;  %v3890_v4 = vadd.f32 %v3889_v21, %v3876_v22 }
 0x8ab   :  { %4338 = vmatpush.bf16.msrb.mxu2 %v6788_v57 }
 0x8ad   :  { %v3891_v39 = vpop.f32.mrf.mxu0 }
 0x8ae   :  { %v6779_v39 = vld [vmem:[%s9897_s12 + $0x20] sm:$0xff] }
 0x8af   :  { %v3878_v18 = vpop.f32.mrf.mxu3  ;;  %4326 = vmatpush.bf16.msrb.mxu1 %v6779_v39 }
 0x8b0   :  { %v6787_v18 = vld [vmem:[%s9897_s12 + $0x60] sm:$0xff] }
 0x8b1   :  { %4339 = vmatpush.bf16.msrb.mxu2 %v6787_v18 }
 0x8c1   :  { %v3902_v16 = vpop.f32.mrf.mxu1 }
 0x8c2   :  { %v3903_v27 = vadd.f32 %v3902_v16, %v3890_v4 }
 0x8c9   :  { %v3904_v8 = vpop.f32.mrf.mxu1 }
 0x8cb   :  { %v3915_v35 = vpop.f32.mrf.mxu2 }
 0x8cc   :  { %v3916_v28 = vadd.f32 %v3915_v35, %v3903_v27 }
 0x8d1   :  { %v3954_v29 = vpop.f32.mrf.mxu1 }
 0x8d3   :  { %v3917_v31 = vpop.f32.mrf.mxu2 }
 0x8d9   :  { %v3956_v24 = vpop.f32.mrf.mxu1 }
 0x8db   :  { %v3967_v19 = vpop.f32.mrf.mxu2 }
 0x8dc   :  { %v3968_v20 = vadd.f32 %v3967_v19, %v3954_v29  ;;  %v6778_v19 = vld [vmem:[%s9897_s12 + $0x18] sm:$0xff] }
 0x8dd   :  { %4327 = vmatpush.bf16.msrb.mxu1 %v6778_v19 }
 0x8e1   :  { %v4006_v37 = vpop.f32.mrf.mxu1 }
 0x8e3   :  { %v3969_v38 = vpop.f32.mrf.mxu2 }
 0x8e5   :  { %v3941_v51 = vpop.f32.mrf.mxu0 }
 0x8e7   :  { %v3928_v34 = vpop.f32.mrf.mxu3 }
 0x8e8   :  { %v3929_v0 = vadd.f32 %v3928_v34, %v3916_v28 }
 0x8e9   :  { %v4008_v41 = vpop.f32.mrf.mxu1 }
 0x8ea   :  { %v3942_v40 = vadd.f32 %v3941_v51, %v3929_v0 }
 0x8ed   :  { %v3943_v56 = vpop.f32.mrf.mxu0 }
 0x8ee   :  { %v4019_v43 = vpop.f32.mrf.mxu2 }
 0x8ef   :  { %v3930_v32 = vpop.f32.mrf.mxu3 }
 0x8f0   :  { %v6785_v32 = vld [vmem:[%s9897_s12 + $0x50] sm:$0xff] }
 0x8f5   :  { %v3993_v30 = vpop.f32.mrf.mxu0 }
 0x8f6   :  { %v4021_v5 = vpop.f32.mrf.mxu2 }
 0x8f7   :  { %v3980_v55 = vpop.f32.mrf.mxu3 }
 0x8f8   :  { %v3981_v47 = vadd.f32 %v3980_v55, %v3968_v20  ;;  %v6786_v20 = vld [vmem:[%s9897_s12 + $0x58] sm:$0xff] }
 0x8f9   :  { %4340 = vmatpush.bf16.msrb.mxu2 %v6786_v20 }
 0x8fa   :  { %v3994_v48 = vadd.f32 %v3993_v30, %v3981_v47 }
 0x8fc   :  { %v4007_v50 = vadd.f32 %v4006_v37, %v3994_v48 }
 0x8fd   :  { %v3995_v49 = vpop.f32.mrf.mxu0  ;;  %4341 = vmatpush.bf16.msrb.mxu2 %v6785_v32 }
 0x8fe   :  { %v4020_v52 = vadd.f32 %v4019_v43, %v4007_v50  ;;  %v6777_v43 = vld [vmem:[%s9897_s12 + $0x10] sm:$0xff] }
 0x8ff   :  { %v3982_v11 = vpop.f32.mrf.mxu3  ;;  %4328 = vmatpush.bf16.msrb.mxu1 %v6777_v43 }
 0x900   :  { %v6776_v11 = vld [vmem:[%s9897_s12 + $0x8] sm:$0xff] }
 0x901   :  { %v4058_v12 = vpop.f32.mrf.mxu1 }
 0x903   :  { %4329 = vmatpush.bf16.msrb.mxu1 %v6776_v11  ;;  %v6793_v11 = vld [vmem:[%s9898_s13 + $0x10] sm:$0xff] }
 0x905   :  { %v4045_v23 = vpop.f32.mrf.mxu0 }
 0x908   :  { %v4032_v42 = vpop.f32.mrf.mxu3 }
 0x909   :  { %v4060_v45 = vpop.f32.mrf.mxu1  ;;  %v4046_v63 = vadd.f32 %v4045_v23, %v4032_v42 }
 0x90b   :  { %v4059_v33 = vadd.f32 %v4058_v12, %v4046_v63  ;;  %v6784_v12 = vld [vmem:[%s9897_s12 + $0x48] sm:$0xff] }
 0x90c   :  { %v4071_v46 = vpop.f32.mrf.mxu2  ;;  %4342 = vmatpush.bf16.msrb.mxu2 %v6784_v12 }
 0x90d   :  { %v4047_v61 = vpop.f32.mrf.mxu0  ;;  %v4072_v25 = vadd.f32 %v4071_v46, %v4059_v33 }
 0x90e   :  { %v6775_v61 = vld [vmem:[%s9897_s12] sm:$0xff] }
 0x90f   :  { %4330 = vmatpush.bf16.msrb.mxu1 %v6775_v61  ;;  %v6792_v61 = vld [vmem:[%s9898_s13 + $0x8] sm:$0xff] }
 0x910   :  { %v4034_v44 = vpop.f32.mrf.mxu3 }
 0x911   :  { %v6783_v44 = vld [vmem:[%s9897_s12 + $0x40] sm:$0xff]  ;;  %s4173_s12 = sld [smem:[#allocation2]] }
 0x912   :  { %4343 = vmatpush.bf16.msrb.mxu2 %v6783_v44 }
 0x914   :  { %v4073_v62 = vpop.f32.mrf.mxu2 }
 0x925   :  { %v4097_v54 = vpop.f32.mrf.mxu0 }
 0x928   :  { %v4084_v2 = vpop.f32.mrf.mxu3 }
 0x929   :  { %v4085_v3 = vadd.f32 %v4084_v2, %v4072_v25 }
 0x92b   :  { %v4098_v6 = vadd.f32 %v4097_v54, %v4085_v3 }
 0x92d   :  { %v4103_v7 = vadd.f32 %v4102_v60, %v4098_v6  ;;  %v4099_v59 = vpop.f32.mrf.mxu0 }
 0x92f   :  { %4106 = vperm.xlu0 %6814, %v4103_v7  }
 0x930   :  { %v4086_v1 = vpop.f32.mrf.mxu3 }
 0x9a1   :  { %v4107_v21 = vpop.permute.xlu0 %4106 }
 0x9a2   :  { %v9769_v22 = vmul.f32 %v4107_v21, %v3942_v40  ;;  %v9771_v4 = vmul.f32 %v4107_v21, %v4020_v52 }
 0x9a4   :  { %v4111_v16 = vmul.f32 %v9769_v22, %v9769_v22  ;;  %v4112_v27 = vmul.f32 %v9771_v4, %v9771_v4  ;;  %v4113_v8 = vrot.slane %v9769_v22, 4  ;;  %v4119_v35 = vrot.slane %v9771_v4, 4 }
 0x9a6   :  { %v4114_v28 = vadd.f32 %v4113_v8, %v9769_v22  ;;  %v4120_v29 = vadd.f32 %v4119_v35, %v9771_v4  ;;  %v4125_v31 = vrot.slane %v4111_v16, 4  ;;  %v4131_v24 = vrot.slane %v4112_v27, 4 }
 0x9a7   :  { %v4174_v8 = vstv %s4173_s12 }
 0x9a8   :  { %v4115_v37 = vrot.slane %v4114_v28, 2  ;;  %v4121_v51 = vrot.slane %v4120_v29, 2  ;;  %v4126_v38 = vadd.f32 %v4125_v31, %v4111_v16  ;;  %v4132_v34 = vadd.f32 %v4131_v24, %v4112_v27 }
 0x9aa   :  { %v4116_v0 = vadd.f32 %v4115_v37, %v4114_v28  ;;  %v4122_v40 = vadd.f32 %v4121_v51, %v4120_v29  ;;  %v4127_v41 = vrot.slane %v4126_v38, 2  ;;  %v4133_v56 = vrot.slane %v4132_v34, 2 }
 0x9ab   :  { %v4178_v29 = vstv %s6239_s16  ;;  %v4184_v37 = vstv %s6240_s17 }
 0x9ac   :  { %v4117_v30 = vrot.slane %v4116_v0, 1  ;;  %v4123_v5 = vrot.slane %v4122_v40, 1  ;;  %v4128_v55 = vadd.f32 %v4127_v41, %v4126_v38  ;;  %v4134_v47 = vadd.f32 %v4133_v56, %v4132_v34 }
 0x9ad   :  { %v4179_v20 = vmul.f32 %v4178_v29, %v8795_v10  ;;  %v4180_v38 = vmul.f32 %v4178_v29, %v8793_v9  ;;  %v6798_v10 = vld [vmem:[%s9898_s13 + $0x38] sm:$0xff]  ;;  %v6797_v9 = vld [vmem:[%s9898_s13 + $0x30] sm:$0xff] }
 0x9ae   :  { %v4118_v48 = vadd.f32 %v4117_v30, %v4116_v0  ;;  %v4124_v49 = vadd.f32 %v4123_v5, %v4122_v40  ;;  %v4129_v50 = vrot.slane %v4128_v55, 1  ;;  %v4135_v52 = vrot.slane %v4134_v47, 1  ;;  %4450 = vmatpush.bf16.msra.mxu3 %v6798_v10  ;;  %v6817_v30 = vld [vmem:[%s9890_s5 + $0x14] ss:$0 sm:$0xff]  ;;  %v6795_v5 = vld [vmem:[%s9898_s13 + $0x20] sm:$0xff] }
 0x9af   :  { %v4186_v40 = vmul.f32 %v4184_v37, %v8811_v53  ;;  %v6796_v53 = vld [vmem:[%s9898_s13 + $0x28] sm:$0xff]  ;;  %v6805_v29 = vld [vmem:[%s9899_s14 + $0x30] sm:$0xff] }
 0x9b0   :  { %v4130_v23 = vadd.f32 %v4129_v50, %v4128_v55  ;;  %v4136_v42 = vadd.f32 %v4135_v52, %v4134_v47  ;;  %v4137_v45 = vmul.f32 %v4118_v48, %v6997_v26  ;;  %v4138_v46 = vmul.f32 %v4124_v49, %v6997_v26  ;;  %v6794_v48 = vld [vmem:[%s9898_s13 + $0x18] sm:$0xff] }
 0x9b2   :  { %v4139_v62 = vmul.f32 %v4130_v23, %v6997_v26  ;;  %v4140_v63 = vmul.f32 %v4136_v42, %v6997_v26  ;;  %v4141_v33 = vmul.f32 %v4137_v45, %v4137_v45  ;;  %v4142_v25 = vmul.f32 %v4138_v46, %v4138_v46  ;;  %4451 = vmatpush.bf16.msra.mxu3 %v6797_v9 }
 0x9b3   :  { %v4147_v16 = vsub.f32 %v9769_v22, %v4137_v45  ;;  %v4148_v35 = vsub.f32 %v9771_v4, %v4138_v46  ;;  %v4185_v22 = vmul.f32 %v4184_v37, %v8813_v58  ;;  %v6802_v37 = vld [vmem:[%s9899_s14 + $0x18] sm:$0xff] }
 0x9b4   :  { %v4143_v54 = vsub.f32 %v4139_v62, %v4141_v33  ;;  %v4144_v2 = vsub.f32 %v4140_v63, %v4142_v25  ;;  %v6791_v25 = vld [vmem:[%s9898_s13] sm:$0xff] }
 0x9b6   :  { %v4145_v3 = vmax.f32 %v4143_v54, 0.0  ;;  %v4146_v60 = vmax.f32 %v4144_v2, 0.0  ;;  %4452 = vmatpush.bf16.msra.mxu3 %v6796_v53  ;;  %v6799_v53 = vld [vmem:[%s9899_s14] sm:$0xff] }
 0x9b8   :  { %v4149_v6 = vadd.f32 1e-05, %v4145_v3  ;;  %v4150_v7 = vadd.f32 1e-05, %v4146_v60 }
 0x9ba   :  { %6868 = vrsqrt.f32 %v4149_v6  ;;  %vm4157_vm3 = vweird.f32 %v4149_v6  ;;  %vm4167_vm5 = vweird.f32 %v4150_v7  ;;  %4453 = vmatpush.bf16.msra.mxu3 %v6795_v5 }
 0x9bb   :  { %6870 = vrsqrt.f32 %v4150_v7 }
 0x9be   :  { %4454 = vmatpush.bf16.msra.mxu3 %v6794_v48 }
 0x9c0   :  { %v6869_v59 = vpop.eup %6868 }
 0x9c1   :  { %v6871_v1 = vpop.eup %6870  ;;  %v4152_v13 = vmul.f32 %v6869_v59, %v4149_v6  ;;  %vm4158_vm14 = vweird.f32 %v6869_v59 }
 0x9c2   :  { %v4162_v36 = vmul.f32 %v6871_v1, %v4150_v7  ;;  %vm4168_vm2 = vweird.f32 %v6871_v1  ;;  %vm4159_vm4 = vmor %vm4157_vm3, %vm4158_vm14  ;;  %4455 = vmatpush.bf16.msra.mxu3 %v6793_v11 }
 0x9c3   :  { %v4153_v14 = vmul.f32 %v6869_v59, %v4152_v13  ;;  %vm4169_vm6 = vmor %vm4167_vm5, %vm4168_vm2 }
 0x9c4   :  { %v4163_v15 = vmul.f32 %v6871_v1, %v4162_v36 }
 0x9c5   :  { %v4154_v17 = vmul.f32 0.5, %v4153_v14 }
 0x9c6   :  { %v4164_v57 = vmul.f32 0.5, %v4163_v15  ;;  %4456 = vmatpush.bf16.msra.mxu3 %v6792_v61 }
 0x9c7   :  { %v4155_v21 = vsub.f32 1.5, %v4154_v17 }
 0x9c8   :  { %v4165_v39 = vsub.f32 1.5, %v4164_v57 }
 0x9c9   :  { %v4156_v18 = vmul.f32 %v6869_v59, %v4155_v21 }
 0x9ca   :  { %v4166_v27 = vmul.f32 %v6871_v1, %v4165_v39  ;;  %4457 = vmatpush.bf16.msra.mxu3 %v6791_v25 }
 0x9cb   :  { %v4160_v28 = vsel %vm4159_vm4, %v6869_v59, %v4156_v18 }
 0x9cc   :  { %v4170_v31 = vsel %vm4169_vm6, %v6871_v1, %v4166_v27  ;;  %v4171_v24 = vmul.f32 %v4160_v28, %v4147_v16  ;;  %v6806_v28 = vld [vmem:[%s9899_s14 + $0x38] sm:$0xff] }
 0x9cd   :  { %v4172_v19 = vmul.f32 %v4170_v31, %v4148_v35  ;;  %4564 = vmatpush.bf16.msra.mxu0 %v6806_v28  ;;  %v6804_v31 = vld [vmem:[%s9899_s14 + $0x28] sm:$0xff] }
 0x9ce   :  { %v4175_v51 = vmul.f32 %v4174_v8, %v4171_v24  ;;  %v6803_v24 = vld [vmem:[%s9899_s14 + $0x20] sm:$0xff] }
 0x9cf   :  { %v4176_v34 = vmul.f32 %v4174_v8, %v4172_v19  ;;  %v6818_v19 = vld [vmem:[%s9890_s5 + $0x15] ss:$0 sm:$0xff] }
 0x9d0   :  { %v4181_v0 = vadd.f32 %v4179_v20, %v4175_v51 }
 0x9d1   :  { %v4182_v41 = vadd.f32 %v4180_v38, %v4176_v34  ;;  %4565 = vmatpush.bf16.msra.mxu0 %v6805_v29  ;;  %v6801_v34 = vld [vmem:[%s9899_s14 + $0x10] sm:$0xff] }
 0x9d2   :  { %v4187_v4 = vadd.f32 %v4185_v22, %v4181_v0 }
 0x9d3   :  { %v4188_v56 = vadd.f32 %v4186_v40, %v4182_v41 }
 0x9d4   :  { %v4221_v43 = vpack.c.bf16 %v4187_v4, %v4187_v4 }
 0x9d5   :  { %v4222_v32 = vpack.c.bf16 %v4188_v56, %v4188_v56  ;;  %4566 = vmatpush.bf16.msra.mxu0 %v6804_v31  ;;  %v6800_v56 = vld [vmem:[%s9899_s14 + $0x8] sm:$0xff] }
 0x9d6   :  { %4331 = vmatmul.bf16.vlgmr.msrb.gmra.mxu1 %v4221_v43 }
 0x9d7   :  { %4344 = vmatmul.bf16.vlgmr.msrb.gmra.mxu2 %v4222_v32 }
 0x9d9   :  { %4567 = vmatpush.bf16.msra.mxu0 %v6803_v24 }
 0x9dd   :  { %4568 = vmatpush.bf16.msra.mxu0 %v6802_v37 }
 0x9e1   :  { %4569 = vmatpush.bf16.msra.mxu0 %v6801_v34 }
 0x9e5   :  { %4570 = vmatpush.bf16.msra.mxu0 %v6800_v56 }
 0x9e9   :  { %4571 = vmatpush.bf16.msra.mxu0 %v6799_v53 }
 0xa53   :  { %v4332_v58 = vpop.f32.mrf.mxu1 }
 0xa54   :  { %v4333_v55 = vadd.f32 %v6817_v30, %v4332_v58 }
 0xa5a   :  { %v4345_v47 = vpop.f32.mrf.mxu2 }
 0xa5b   :  { %v4346_v49 = vadd.f32 %v4345_v47, %v4333_v55  ;;  %v4334_v50 = vpop.f32.mrf.mxu1 }
 0xa5d   :  { %v4349_v52 = vmax.f32 %v4346_v49, 0.0 }
 0xa5f   :  { %v4350_v12 = vmul.f32 %v4349_v52, %v4349_v52  ;;  %v4351_v23 = vrot.slane %v4349_v52, 4 }
 0xa61   :  { %v4352_v42 = vadd.f32 %v4351_v23, %v4349_v52  ;;  %v4357_v45 = vrot.slane %v4350_v12, 4 }
 0xa62   :  { %v4347_v46 = vpop.f32.mrf.mxu2 }
 0xa63   :  { %v4353_v44 = vrot.slane %v4352_v42, 2  ;;  %v4358_v62 = vadd.f32 %v4357_v45, %v4350_v12 }
 0xa65   :  { %v4354_v63 = vadd.f32 %v4353_v44, %v4352_v42  ;;  %v4359_v33 = vrot.slane %v4358_v62, 2 }
 0xa67   :  { %v4355_v54 = vrot.slane %v4354_v63, 1  ;;  %v4360_v2 = vadd.f32 %v4359_v33, %v4358_v62 }
 0xa69   :  { %v4356_v3 = vadd.f32 %v4355_v54, %v4354_v63  ;;  %v4361_v60 = vrot.slane %v4360_v2, 1 }
 0xa6b   :  { %v4362_v6 = vadd.f32 %v4361_v60, %v4360_v2  ;;  %v4363_v7 = vmul.f32 %v4356_v3, %v6997_v26 }
 0xa6d   :  { %v4364_v59 = vmul.f32 %v4362_v6, %v6997_v26  ;;  %v4365_v1 = vmul.f32 %v4363_v7, %v4363_v7  ;;  %v4368_v16 = vsub.f32 %v4349_v52, %v4363_v7 }
 0xa6f   :  { %v4366_v13 = vsub.f32 %v4364_v59, %v4365_v1 }
 0xa71   :  { %v4367_v36 = vmax.f32 %v4366_v13, 0.0 }
 0xa73   :  { %v4369_v14 = vadd.f32 1e-05, %v4367_v36 }
 0xa75   :  { %6872 = vrsqrt.f32 %v4369_v14  ;;  %vm4376_vm8 = vweird.f32 %v4369_v14 }
 0xa7b   :  { %v6873_v15 = vpop.eup %6872 }
 0xa7c   :  { %v4371_v17 = vmul.f32 %v6873_v15, %v4369_v14  ;;  %vm4377_vm7 = vweird.f32 %v6873_v15 }
 0xa7d   :  { %vm4378_vm9 = vmor %vm4376_vm8, %vm4377_vm7 }
 0xa7e   :  { %v4372_v57 = vmul.f32 %v6873_v15, %v4371_v17 }
 0xa80   :  { %v4373_v21 = vmul.f32 0.5, %v4372_v57 }
 0xa82   :  { %v4374_v39 = vsub.f32 1.5, %v4373_v21 }
 0xa84   :  { %v4375_v18 = vmul.f32 %v6873_v15, %v4374_v39 }
 0xa86   :  { %v4379_v27 = vsel %vm4378_vm9, %v6873_v15, %v4375_v18 }
 0xa87   :  { %v4380_v8 = vmul.f32 %v4379_v27, %v4368_v16 }
 0xa89   :  { %v4397_v35 = vpack.c.bf16 %v4380_v8, %v4380_v8 }
 0xa8b   :  { %4458 = vmatmul.bf16.vlgmr.msra.gmra.mxu3 %v4397_v35 }
 0xb0e   :  { %v4459_v20 = vpop.f32.mrf.mxu3 }
 0xb0f   :  { %v4460_v51 = vadd.f32 %v6818_v19, %v4459_v20 }
 0xb11   :  { %v4463_v38 = vmax.f32 %v4460_v51, 0.0 }
 0xb13   :  { %v4464_v22 = vmul.f32 %v4463_v38, %v4463_v38  ;;  %v4465_v0 = vrot.slane %v4463_v38, 4 }
 0xb15   :  { %v4466_v40 = vadd.f32 %v4465_v0, %v4463_v38  ;;  %v4471_v41 = vrot.slane %v4464_v22, 4 }
 0xb16   :  { %v4461_v4 = vpop.f32.mrf.mxu3 }
 0xb17   :  { %v4467_v43 = vrot.slane %v4466_v40, 2  ;;  %v4472_v32 = vadd.f32 %v4471_v41, %v4464_v22 }
 0xb19   :  { %v4468_v10 = vadd.f32 %v4467_v43, %v4466_v40  ;;  %v4473_v9 = vrot.slane %v4472_v32, 2 }
 0xb1b   :  { %v4469_v58 = vrot.slane %v4468_v10, 1  ;;  %v4474_v30 = vadd.f32 %v4473_v9, %v4472_v32 }
 0xb1d   :  { %v4470_v5 = vadd.f32 %v4469_v58, %v4468_v10  ;;  %v4475_v55 = vrot.slane %v4474_v30, 1 }
 0xb1f   :  { %v4476_v47 = vadd.f32 %v4475_v55, %v4474_v30  ;;  %v4477_v48 = vmul.f32 %v4470_v5, %v6997_v26 }
 0xb21   :  { %v4478_v49 = vmul.f32 %v4476_v47, %v6997_v26  ;;  %v4479_v50 = vmul.f32 %v4477_v48, %v4477_v48  ;;  %v4482_v62 = vsub.f32 %v4463_v38, %v4477_v48  ;;  %v6819_v26 = vld [vmem:[%s9890_s5 + $0x16] ss:$0 sm:$0xff] }
 0xb23   :  { %v4480_v52 = vsub.f32 %v4478_v49, %v4479_v50 }
 0xb25   :  { %v4481_v11 = vmax.f32 %v4480_v52, 0.0 }
 0xb27   :  { %v4483_v12 = vadd.f32 1e-05, %v4481_v11 }
 0xb29   :  { %6874 = vrsqrt.f32 %v4483_v12  ;;  %vm4490_vm11 = vweird.f32 %v4483_v12 }
 0xb2f   :  { %v6875_v23 = vpop.eup %6874 }
 0xb30   :  { %v4485_v42 = vmul.f32 %v6875_v23, %v4483_v12  ;;  %vm4491_vm10 = vweird.f32 %v6875_v23 }
 0xb31   :  { %vm4492_vm12 = vmor %vm4490_vm11, %vm4491_vm10 }
 0xb32   :  { %v4486_v45 = vmul.f32 %v6875_v23, %v4485_v42 }
 0xb34   :  { %v4487_v46 = vmul.f32 0.5, %v4486_v45 }
 0xb36   :  { %v4488_v61 = vsub.f32 1.5, %v4487_v46 }
 0xb38   :  { %v4489_v44 = vmul.f32 %v6875_v23, %v4488_v61 }
 0xb3a   :  { %v4493_v63 = vsel %vm4492_vm12, %v6875_v23, %v4489_v44 }
 0xb3b   :  { %v4494_v33 = vmul.f32 %v4493_v63, %v4482_v62 }
 0xb3d   :  { %v4511_v25 = vpack.c.bf16 %v4494_v33, %v4494_v33 }
 0xb3f   :  { %4572 = vmatmul.bf16.vlgmr.msra.gmra.mxu0 %v4511_v25 }
 0xbbc   :  { %v4573_v54 = vpop.f32.mrf.mxu0 }
 0xbbd   :  { %v4574_v2 = vadd.f32 %v6819_v26, %v4573_v54 }
 0xbbf   :  { %v4577_v3 = vsub.f32 0.0, %v4574_v2 }
 0xbc1   :  { %v4578_v60 = vmul.f32 1.442695, %v4577_v3 }
 0xbc3   :  { %6876 = vpow2.f32 %v4578_v60 }
 0xbc4   :  { %v4575_v6 = vpop.f32.mrf.mxu0 }
 0xbc9   :  { %v6877_v7 = vpop.eup %6876 }
 0xbca   :  { %v4580_v59 = vadd.f32 1.0, %v6877_v7 }
 0xbcc   :  { %6878 = vrcp.f32 %v4580_v59  ;;  %v4592_v14 = vand.u32 2147483648, %v4580_v59  ;;  %v4590_v17 = vand.u32 2147483647, %v4580_v59  ;;  %vm4586_vm15 = vweird.f32 %v4580_v59 }
 0xbce   :  { %v4593_v21 = vor.u32 1.1754944e-38, %v4592_v14  ;;  %vm4591_vm1 = vcmp.eq.f32.partialorder %v4590_v17, 8.507059e+37 }
 0xbd2   :  { %v6879_v1 = vpop.eup %6878 }
 0xbd3   :  { %v4582_v13 = vmul.f32 %v6879_v1, %v4580_v59  ;;  %vm4587_vm13 = vweird.f32 %v6879_v1 }
 0xbd4   :  { %vm4588_vm0 = vmor %vm4586_vm15, %vm4587_vm13 }
 0xbd5   :  { %v4583_v36 = vsub.f32 1.0, %v4582_v13 }
 0xbd7   :  { %v4584_v15 = vmul.f32 %v6879_v1, %v4583_v36 }
 0xbd9   :  { %v4585_v57 = vadd.f32 %v6879_v1, %v4584_v15 }
 0xbdb   :  { %v4589_v39 = vsel %vm4588_vm0, %v6879_v1, %v4585_v57 }
 0xbdc   :  { %v4594_v18 = vsel %vm4591_vm1, %v4593_v21, %v4589_v39 }
 0xbdd   :  { %4596 = vst [vmem:[%s9900_s15] sm:$0xff] %v4594_v18 }
 0xbde   :  { %4601 = vsyncpa [#allocation3], 1 }

</bundles_post_ra>
